<compile_context>
chip_gen: v6e
topology: v6e:2x2x1
jax: 0.10.0
libtpu: 0.0.40
codegen_flags: <defaults>
</compile_context>

<pallas_src>
import jax
import jax.numpy as jnp
from jax import lax
from jax.experimental import pallas as pl
from jax.experimental.pallas import tpu as pltpu

P = 128  # lane-padded feature / hidden width (one full vreg row)


# ----------------------------------------------------------------------------
# Fused encoder kernel: all LSTM layers, inter-layer sigmoid, final tanh.
# Gate order follows PyTorch: i, f, g, o (gate k occupies lanes [k*P, k*P+H)).
# ----------------------------------------------------------------------------
def encoder_kernel(x_ref, wih_ref, whh_ref, b_ref, out_ref,
                   xbuf, gx, h_scr, c_scr):
    T = x_ref.shape[0]
    L = wih_ref.shape[0]

    # Current layer input, kept entirely in VMEM across layers.
    xbuf[...] = x_ref[...]

    for l in range(L):  # static Python loop over layers (L is tiny)
        last = (l == L - 1)

        # Hoisted input projection for ALL timesteps: one (T,P)@(P,4P) matmul.
        gx[...] = (
            jnp.dot(xbuf[...], wih_ref[l], preferred_element_type=jnp.float32)
            + b_ref[l]
        )

        h_scr[...] = jnp.zeros_like(h_scr)
        c_scr[...] = jnp.zeros_like(c_scr)

        def step(t, carry, *, l=l, last=last):
            # Serial critical path: one (1,P)@(P,4P) MXU op + precomputed row.
            gates = gx[pl.ds(t, 1), :] + jnp.dot(
                h_scr[...], whh_ref[l], preferred_element_type=jnp.float32
            )                                              # (1, 4P)
            i_g = jax.nn.sigmoid(gates[:, 0 * P:1 * P])
            f_g = jax.nn.sigmoid(gates[:, 1 * P:2 * P])
            g_g = jnp.tanh(gates[:, 2 * P:3 * P])
            o_g = jax.nn.sigmoid(gates[:, 3 * P:4 * P])

            c_new = f_g * c_scr[...] + i_g * g_g
            h_new = o_g * jnp.tanh(c_new)

            c_scr[...] = c_new
            h_scr[...] = h_new
            if not last:
                # y becomes the next layer's input; gx already holds this
                # layer's x-projection, so overwriting xbuf is safe.
                xbuf[pl.ds(t, 1), :] = h_new
            return carry

        # T is static & small: fully unroll so the LLO scheduler can overlap
        # the EUP/VPU tail of step t with step t+1's MXU push.
        lax.fori_loop(0, T, step, 0, unroll=True)

        if not last:
            xbuf[...] = jax.nn.sigmoid(xbuf[...])   # h_activ between layers

    # out_activ(h_n); padded lanes are exactly 0 -> tanh(0) = 0, sliced outside.
    out_ref[...] = jnp.tanh(h_scr[...])


# ----------------------------------------------------------------------------
# One-time parameter prep: transpose, combine biases, pad to 128 lanes, stack.
# ----------------------------------------------------------------------------
def prepare_encoder_params(params):
    """params: list of (w_ih (4H,D), w_hh (4H,H), b_ih (4H,), b_hh (4H,))."""
    L = len(params)
    wih_all = jnp.zeros((L, P, 4 * P), jnp.float32)
    whh_all = jnp.zeros((L, P, 4 * P), jnp.float32)
    b_all = jnp.zeros((L, 1, 4 * P), jnp.float32)

    for l, (w_ih, w_hh, b_ih, b_hh) in enumerate(params):
        H4, D = w_ih.shape
        H = H4 // 4
        assert D <= P and H <= P, "feature/hidden dims must be <= 128"
        wt = jnp.asarray(w_ih, jnp.float32).T       # (D, 4H)
        ht = jnp.asarray(w_hh, jnp.float32).T       # (H, 4H)
        b = jnp.asarray(b_ih + b_hh, jnp.float32)   # (4H,)
        for k in range(4):                          # place each gate at k*P
            wih_all = wih_all.at[l, :D, k * P:k * P + H].set(wt[:, k * H:(k + 1) * H])
            whh_all = whh_all.at[l, :H, k * P:k * P + H].set(ht[:, k * H:(k + 1) * H])
            b_all = b_all.at[l, 0, k * P:k * P + H].set(b[k * H:(k + 1) * H])

    out_dim = params[-1][1].shape[1]                # last layer hidden size
    return wih_all, whh_all, b_all, out_dim


# ----------------------------------------------------------------------------
# Encoder forward: one fused pallas_call for the whole stack.
# ----------------------------------------------------------------------------
def encoder_forward(x, prep):
    """x: (seq_len, input_dim) float32.  prep: output of prepare_encoder_params."""
    wih_all, whh_all, b_all, out_dim = prep
    T, D0 = x.shape
    L = wih_all.shape[0]

    x_pad = jnp.zeros((T, P), jnp.float32).at[:, :D0].set(x.astype(jnp.float32))

    out = pl.pallas_call(
        encoder_kernel,
        out_shape=jax.ShapeDtypeStruct((1, P), jnp.float32),
        grid=(1,),
        in_specs=[
            pl.BlockSpec((T, P), lambda i: (0, 0)),
            pl.BlockSpec((L, P, 4 * P), lambda i: (0, 0, 0)),
            pl.BlockSpec((L, P, 4 * P), lambda i: (0, 0, 0)),
            pl.BlockSpec((L, 1, 4 * P), lambda i: (0, 0, 0)),
        ],
        out_specs=pl.BlockSpec((1, P), lambda i: (0, 0)),
        scratch_shapes=[
            pltpu.VMEM((T, P), jnp.float32),       # xbuf: current layer input / y
            pltpu.VMEM((T, 4 * P), jnp.float32),   # gx:   hoisted x @ W_ih + b
            pltpu.VMEM((1, P), jnp.float32),       # h
            pltpu.VMEM((1, P), jnp.float32),       # c
        ],
        compiler_params=pltpu.CompilerParams(
            dimension_semantics=("arbitrary",)),
    )(x_pad, wih_all, whh_all, b_all)

    return out[0, :out_dim]                         # tanh(h_n).squeeze()


# ----------------------------------------------------------------------------
# Pure-JAX reference (lax.scan) for validation.
# ----------------------------------------------------------------------------
def lstm_layer_ref(x, w_ih, w_hh, b_ih, b_hh):
    H = w_hh.shape[1]

    def step(carry, x_t):
        h, c = carry
        gates = x_t @ w_ih.T + h @ w_hh.T + b_ih + b_hh
        i = jax.nn.sigmoid(gates[0 * H:1 * H])
        f = jax.nn.sigmoid(gates[1 * H:2 * H])
        g = jnp.tanh(gates[2 * H:3 * H])
        o = jax.nn.sigmoid(gates[3 * H:4 * H])
        c = f * c + i * g
        h = o * jnp.tanh(c)
        return (h, c), h

    (h_n, _), ys = lax.scan(step, (jnp.zeros((H,)), jnp.zeros((H,))), x)
    return ys, h_n


def encoder_forward_ref(x, params):
    num_layers = len(params)
    for idx, p in enumerate(params):
        y, h_n = lstm_layer_ref(x, *p)
        if idx < num_layers - 1:
            x = jax.nn.sigmoid(y)
        else:
            return jnp.tanh(h_n)
    return h_n


# ----------------------------------------------------------------------------
def init_lstm_params(key, input_size, hidden_size):
    k = 1.0 / jnp.sqrt(hidden_size)
    k1, k2, k3, k4 = jax.random.split(key, 4)
    w_ih = jax.random.uniform(k1, (4 * hidden_size, input_size), jnp.float32, -k, k)
    w_hh = jax.random.uniform(k2, (4 * hidden_size, hidden_size), jnp.float32, -k, k)
    b_ih = jax.random.uniform(k3, (4 * hidden_size,), jnp.float32, -k, k)
    b_hh = jax.random.uniform(k4, (4 * hidden_size,), jnp.float32, -k, k)
    return (w_ih, w_hh, b_ih, b_hh)


if __name__ == "__main__":
    # Encoder(input_dim=16, out_dim=32, h_dims=[64], h_activ=Sigmoid, out_activ=Tanh)
    input_dim, out_dim = 16, 32
    h_dims = [64]
    seq_len = 8

    layer_dims = [input_dim] + h_dims + [out_dim]
    key = jax.random.PRNGKey(0)
    keys = jax.random.split(key, len(layer_dims))  # last key used for x

    params = [
        init_lstm_params(keys[i], layer_dims[i], layer_dims[i + 1])
        for i in range(len(layer_dims) - 1)
    ]
    x = jax.random.normal(keys[-1], (seq_len, input_dim), jnp.float32)

    prep = prepare_encoder_params(params)          # one-time param prep
    out = jax.block_until_ready(encoder_forward(x, prep))
    ref = jax.block_until_ready(encoder_forward_ref(x, params))

    assert out.shape == (out_dim,), out.shape
    assert jnp.allclose(out, ref, atol=2e-5, rtol=2e-5), (out, ref)
    print("KERNEL_OK")
</pallas_src>

<mosaic_0001>
module attributes {stable_mosaic.version = 11 : i64} {
  func.func @encoder_kernel(%arg0: i32, %arg1: memref<8x128xf32, #tpu.memory_space<vmem>>, %arg2: memref<2x128x512xf32, #tpu.memory_space<vmem>>, %arg3: memref<2x128x512xf32, #tpu.memory_space<vmem>>, %arg4: memref<2x1x512xf32, #tpu.memory_space<vmem>>, %arg5: memref<1x128xf32, #tpu.memory_space<vmem>>, %arg6: memref<8x128xf32, #tpu.memory_space<vmem>>, %arg7: memref<8x512xf32, #tpu.memory_space<vmem>>, %arg8: memref<1x128xf32, #tpu.memory_space<vmem>>, %arg9: memref<1x128xf32, #tpu.memory_space<vmem>>) attributes {dimension_semantics = [#tpu.dimension_semantics<arbitrary>], iteration_bounds = array<i64: 1>, scalar_prefetch = 0 : i64, scratch_operands = 4 : i64, tpu.core_type = #tpu.core_type<tc>, window_params = [{pipeline_mode = #tpu.pipeline_mode<synchronous>, transform_indices = @transform_0, window_bounds = array<i64: 8, 128>}, {pipeline_mode = #tpu.pipeline_mode<synchronous>, transform_indices = @transform_1, window_bounds = array<i64: 2, 128, 512>}, {pipeline_mode = #tpu.pipeline_mode<synchronous>, transform_indices = @transform_2, window_bounds = array<i64: 2, 128, 512>}, {pipeline_mode = #tpu.pipeline_mode<synchronous>, transform_indices = @transform_3, window_bounds = array<i64: 2, 1, 512>}, {pipeline_mode = #tpu.pipeline_mode<synchronous>, transform_indices = @transform_4, window_bounds = array<i64: 1, 128>}]} {
    %c0 = arith.constant 0 : index
    %c0_0 = arith.constant 0 : index
    %0 = vector.load %arg1[%c0, %c0_0] : memref<8x128xf32, #tpu.memory_space<vmem>>, vector<8x128xf32>
    %c0_1 = arith.constant 0 : index
    %c0_2 = arith.constant 0 : index
    %1 = vector.load %arg6[%c0_1, %c0_2] : memref<8x128xf32, #tpu.memory_space<vmem>>, vector<8x128xf32>
    tpu.vector_store %arg6[%c0_1, %c0_2], %0 {strides = array<i32>} : memref<8x128xf32, #tpu.memory_space<vmem>>, vector<8x128xf32>,
    %c0_3 = arith.constant 0 : index
    %c0_4 = arith.constant 0 : index
    %2 = vector.load %arg6[%c0_3, %c0_4] : memref<8x128xf32, #tpu.memory_space<vmem>>, vector<8x128xf32>
    %c0_5 = arith.constant 0 : index
    %c0_6 = arith.constant 0 : index
    %c0_7 = arith.constant 0 : index
    %3 = vector.load %arg2[%c0_5, %c0_6, %c0_7] : memref<2x128x512xf32, #tpu.memory_space<vmem>>, vector<1x128x512xf32>
    %4 = vector.shape_cast %3 : vector<1x128x512xf32> to vector<128x512xf32>
    %cst = arith.constant dense<0.000000e+00> : vector<8x512xf32>
    %5 = tpu.matmul %2, %4, %cst {dimension_numbers = #tpu.dot_dimension_numbers<[1], [0], [0], [1], [0, 0, 1, 1], [], []>} : vector<8x128xf32>, vector<128x512xf32>, vector<8x512xf32> -> vector<8x512xf32>
    %c0_8 = arith.constant 0 : index
    %c0_9 = arith.constant 0 : index
    %c0_10 = arith.constant 0 : index
    %6 = vector.load %arg4[%c0_8, %c0_9, %c0_10] : memref<2x1x512xf32, #tpu.memory_space<vmem>>, vector<1x1x512xf32>
    %7 = vector.shape_cast %6 : vector<1x1x512xf32> to vector<1x512xf32>
    %8 = vector.broadcast %7 : vector<1x512xf32> to vector<8x512xf32>
    %9 = arith.addf %5, %8 : vector<8x512xf32>
    %c0_11 = arith.constant 0 : index
    %c0_12 = arith.constant 0 : index
    %10 = vector.load %arg7[%c0_11, %c0_12] : memref<8x512xf32, #tpu.memory_space<vmem>>, vector<8x512xf32>
    tpu.vector_store %arg7[%c0_11, %c0_12], %9 {strides = array<i32>} : memref<8x512xf32, #tpu.memory_space<vmem>>, vector<8x512xf32>,
    %cst_13 = arith.constant 0.000000e+00 : f32
    %11 = vector.broadcast %cst_13 : f32 to vector<1x128xf32>
    %c0_14 = arith.constant 0 : index
    %c0_15 = arith.constant 0 : index
    %12 = vector.load %arg8[%c0_14, %c0_15] : memref<1x128xf32, #tpu.memory_space<vmem>>, vector<1x128xf32>
    tpu.vector_store %arg8[%c0_14, %c0_15], %11 {strides = array<i32>} : memref<1x128xf32, #tpu.memory_space<vmem>>, vector<1x128xf32>,
    %cst_16 = arith.constant 0.000000e+00 : f32
    %13 = vector.broadcast %cst_16 : f32 to vector<1x128xf32>
    %c0_17 = arith.constant 0 : index
    %c0_18 = arith.constant 0 : index
    %14 = vector.load %arg9[%c0_17, %c0_18] : memref<1x128xf32, #tpu.memory_space<vmem>>, vector<1x128xf32>
    tpu.vector_store %arg9[%c0_17, %c0_18], %13 {strides = array<i32>} : memref<1x128xf32, #tpu.memory_space<vmem>>, vector<1x128xf32>,
    %c0_i32 = arith.constant 0 : i32
    %15 = arith.index_cast %c0_i32 : i32 to index
    %c0_19 = arith.constant 0 : index
    %16 = vector.load %arg7[%15, %c0_19] : memref<8x512xf32, #tpu.memory_space<vmem>>, vector<1x512xf32>
    %c0_20 = arith.constant 0 : index
    %c0_21 = arith.constant 0 : index
    %17 = vector.load %arg8[%c0_20, %c0_21] : memref<1x128xf32, #tpu.memory_space<vmem>>, vector<1x128xf32>
    %c0_22 = arith.constant 0 : index
    %c0_23 = arith.constant 0 : index
    %c0_24 = arith.constant 0 : index
    %18 = vector.load %arg3[%c0_22, %c0_23, %c0_24] : memref<2x128x512xf32, #tpu.memory_space<vmem>>, vector<1x128x512xf32>
    %19 = vector.shape_cast %18 : vector<1x128x512xf32> to vector<128x512xf32>
    %cst_25 = arith.constant dense<0.000000e+00> : vector<1x512xf32>
    %20 = tpu.matmul %17, %19, %cst_25 {dimension_numbers = #tpu.dot_dimension_numbers<[1], [0], [0], [1], [0, 0, 1, 1], [], []>} : vector<1x128xf32>, vector<128x512xf32>, vector<1x512xf32> -> vector<1x512xf32>
    %21 = arith.addf %16, %20 : vector<1x512xf32>
    %22 = vector.extract_strided_slice %21 {offsets = [0, 0], sizes = [1, 128], strides = [1, 1]} : vector<1x512xf32> to vector<1x128xf32>
    %23 = arith.negf %22 : vector<1x128xf32>
    %24 = math.exp %23 : vector<1x128xf32>
    %cst_26 = arith.constant 1.000000e+00 : f32
    %25 = vector.broadcast %cst_26 : f32 to vector<1x128xf32>
    %26 = arith.addf %25, %24 : vector<1x128xf32>
    %27 = arith.divf %25, %26 : vector<1x128xf32>
    %28 = vector.extract_strided_slice %21 {offsets = [0, 128], sizes = [1, 128], strides = [1, 1]} : vector<1x512xf32> to vector<1x128xf32>
    %29 = arith.negf %28 : vector<1x128xf32>
    %30 = math.exp %29 : vector<1x128xf32>
    %cst_27 = arith.constant 1.000000e+00 : f32
    %31 = vector.broadcast %cst_27 : f32 to vector<1x128xf32>
    %32 = arith.addf %31, %30 : vector<1x128xf32>
    %33 = arith.divf %31, %32 : vector<1x128xf32>
    %34 = vector.extract_strided_slice %21 {offsets = [0, 256], sizes = [1, 128], strides = [1, 1]} : vector<1x512xf32> to vector<1x128xf32>
    %35 = math.tanh %34 : vector<1x128xf32>
    %36 = vector.extract_strided_slice %21 {offsets = [0, 384], sizes = [1, 128], strides = [1, 1]} : vector<1x512xf32> to vector<1x128xf32>
    %37 = arith.negf %36 : vector<1x128xf32>
    %38 = math.exp %37 : vector<1x128xf32>
    %cst_28 = arith.constant 1.000000e+00 : f32
    %39 = vector.broadcast %cst_28 : f32 to vector<1x128xf32>
    %40 = arith.addf %39, %38 : vector<1x128xf32>
    %41 = arith.divf %39, %40 : vector<1x128xf32>
    %c0_29 = arith.constant 0 : index
    %c0_30 = arith.constant 0 : index
    %42 = vector.load %arg9[%c0_29, %c0_30] : memref<1x128xf32, #tpu.memory_space<vmem>>, vector<1x128xf32>
    %43 = arith.mulf %33, %42 : vector<1x128xf32>
    %44 = arith.mulf %27, %35 : vector<1x128xf32>
    %45 = arith.addf %43, %44 : vector<1x128xf32>
    %46 = math.tanh %45 : vector<1x128xf32>
    %47 = arith.mulf %41, %46 : vector<1x128xf32>
    %c0_31 = arith.constant 0 : index
    %c0_32 = arith.constant 0 : index
    %48 = vector.load %arg9[%c0_31, %c0_32] : memref<1x128xf32, #tpu.memory_space<vmem>>, vector<1x128xf32>
    tpu.vector_store %arg9[%c0_31, %c0_32], %45 {strides = array<i32>} : memref<1x128xf32, #tpu.memory_space<vmem>>, vector<1x128xf32>,
    %c0_33 = arith.constant 0 : index
    %c0_34 = arith.constant 0 : index
    %49 = vector.load %arg8[%c0_33, %c0_34] : memref<1x128xf32, #tpu.memory_space<vmem>>, vector<1x128xf32>
    tpu.vector_store %arg8[%c0_33, %c0_34], %47 {strides = array<i32>} : memref<1x128xf32, #tpu.memory_space<vmem>>, vector<1x128xf32>,
    %50 = arith.index_cast %c0_i32 : i32 to index
    %c0_35 = arith.constant 0 : index
    %51 = vector.load %arg6[%50, %c0_35] : memref<8x128xf32, #tpu.memory_space<vmem>>, vector<1x128xf32>
    tpu.vector_store %arg6[%50, %c0_35], %47 {strides = array<i32>} : memref<8x128xf32, #tpu.memory_space<vmem>>, vector<1x128xf32>,
    %c1_i32 = arith.constant 1 : i32
    %52 = arith.index_cast %c1_i32 : i32 to index
    %c0_36 = arith.constant 0 : index
    %53 = vector.load %arg7[%52, %c0_36] : memref<8x512xf32, #tpu.memory_space<vmem>>, vector<1x512xf32>
    %c0_37 = arith.constant 0 : index
    %c0_38 = arith.constant 0 : index
    %54 = vector.load %arg8[%c0_37, %c0_38] : memref<1x128xf32, #tpu.memory_space<vmem>>, vector<1x128xf32>
    %c0_39 = arith.constant 0 : index
    %c0_40 = arith.constant 0 : index
    %c0_41 = arith.constant 0 : index
    %55 = vector.load %arg3[%c0_39, %c0_40, %c0_41] : memref<2x128x512xf32, #tpu.memory_space<vmem>>, vector<1x128x512xf32>
    %56 = vector.shape_cast %55 : vector<1x128x512xf32> to vector<128x512xf32>
    %cst_42 = arith.constant dense<0.000000e+00> : vector<1x512xf32>
    %57 = tpu.matmul %54, %56, %cst_42 {dimension_numbers = #tpu.dot_dimension_numbers<[1], [0], [0], [1], [0, 0, 1, 1], [], []>} : vector<1x128xf32>, vector<128x512xf32>, vector<1x512xf32> -> vector<1x512xf32>
    %58 = arith.addf %53, %57 : vector<1x512xf32>
    %59 = vector.extract_strided_slice %58 {offsets = [0, 0], sizes = [1, 128], strides = [1, 1]} : vector<1x512xf32> to vector<1x128xf32>
    %60 = arith.negf %59 : vector<1x128xf32>
    %61 = math.exp %60 : vector<1x128xf32>
    %cst_43 = arith.constant 1.000000e+00 : f32
    %62 = vector.broadcast %cst_43 : f32 to vector<1x128xf32>
    %63 = arith.addf %62, %61 : vector<1x128xf32>
    %64 = arith.divf %62, %63 : vector<1x128xf32>
    %65 = vector.extract_strided_slice %58 {offsets = [0, 128], sizes = [1, 128], strides = [1, 1]} : vector<1x512xf32> to vector<1x128xf32>
    %66 = arith.negf %65 : vector<1x128xf32>
    %67 = math.exp %66 : vector<1x128xf32>
    %cst_44 = arith.constant 1.000000e+00 : f32
    %68 = vector.broadcast %cst_44 : f32 to vector<1x128xf32>
    %69 = arith.addf %68, %67 : vector<1x128xf32>
    %70 = arith.divf %68, %69 : vector<1x128xf32>
    %71 = vector.extract_strided_slice %58 {offsets = [0, 256], sizes = [1, 128], strides = [1, 1]} : vector<1x512xf32> to vector<1x128xf32>
    %72 = math.tanh %71 : vector<1x128xf32>
    %73 = vector.extract_strided_slice %58 {offsets = [0, 384], sizes = [1, 128], strides = [1, 1]} : vector<1x512xf32> to vector<1x128xf32>
    %74 = arith.negf %73 : vector<1x128xf32>
    %75 = math.exp %74 : vector<1x128xf32>
    %cst_45 = arith.constant 1.000000e+00 : f32
    %76 = vector.broadcast %cst_45 : f32 to vector<1x128xf32>
    %77 = arith.addf %76, %75 : vector<1x128xf32>
    %78 = arith.divf %76, %77 : vector<1x128xf32>
    %c0_46 = arith.constant 0 : index
    %c0_47 = arith.constant 0 : index
    %79 = vector.load %arg9[%c0_46, %c0_47] : memref<1x128xf32, #tpu.memory_space<vmem>>, vector<1x128xf32>
    %80 = arith.mulf %70, %79 : vector<1x128xf32>
    %81 = arith.mulf %64, %72 : vector<1x128xf32>
    %82 = arith.addf %80, %81 : vector<1x128xf32>
    %83 = math.tanh %82 : vector<1x128xf32>
    %84 = arith.mulf %78, %83 : vector<1x128xf32>
    %c0_48 = arith.constant 0 : index
    %c0_49 = arith.constant 0 : index
    %85 = vector.load %arg9[%c0_48, %c0_49] : memref<1x128xf32, #tpu.memory_space<vmem>>, vector<1x128xf32>
    tpu.vector_store %arg9[%c0_48, %c0_49], %82 {strides = array<i32>} : memref<1x128xf32, #tpu.memory_space<vmem>>, vector<1x128xf32>,
    %c0_50 = arith.constant 0 : index
    %c0_51 = arith.constant 0 : index
    %86 = vector.load %arg8[%c0_50, %c0_51] : memref<1x128xf32, #tpu.memory_space<vmem>>, vector<1x128xf32>
    tpu.vector_store %arg8[%c0_50, %c0_51], %84 {strides = array<i32>} : memref<1x128xf32, #tpu.memory_space<vmem>>, vector<1x128xf32>,
    %87 = arith.index_cast %c1_i32 : i32 to index
    %c0_52 = arith.constant 0 : index
    %88 = vector.load %arg6[%87, %c0_52] : memref<8x128xf32, #tpu.memory_space<vmem>>, vector<1x128xf32>
    tpu.vector_store %arg6[%87, %c0_52], %84 {strides = array<i32>} : memref<8x128xf32, #tpu.memory_space<vmem>>, vector<1x128xf32>,
    %c2_i32 = arith.constant 2 : i32
    %89 = arith.index_cast %c2_i32 : i32 to index
    %c0_53 = arith.constant 0 : index
    %90 = vector.load %arg7[%89, %c0_53] : memref<8x512xf32, #tpu.memory_space<vmem>>, vector<1x512xf32>
    %c0_54 = arith.constant 0 : index
    %c0_55 = arith.constant 0 : index
    %91 = vector.load %arg8[%c0_54, %c0_55] : memref<1x128xf32, #tpu.memory_space<vmem>>, vector<1x128xf32>
    %c0_56 = arith.constant 0 : index
    %c0_57 = arith.constant 0 : index
    %c0_58 = arith.constant 0 : index
    %92 = vector.load %arg3[%c0_56, %c0_57, %c0_58] : memref<2x128x512xf32, #tpu.memory_space<vmem>>, vector<1x128x512xf32>
    %93 = vector.shape_cast %92 : vector<1x128x512xf32> to vector<128x512xf32>
    %cst_59 = arith.constant dense<0.000000e+00> : vector<1x512xf32>
    %94 = tpu.matmul %91, %93, %cst_59 {dimension_numbers = #tpu.dot_dimension_numbers<[1], [0], [0], [1], [0, 0, 1, 1], [], []>} : vector<1x128xf32>, vector<128x512xf32>, vector<1x512xf32> -> vector<1x512xf32>
    %95 = arith.addf %90, %94 : vector<1x512xf32>
    %96 = vector.extract_strided_slice %95 {offsets = [0, 0], sizes = [1, 128], strides = [1, 1]} : vector<1x512xf32> to vector<1x128xf32>
    %97 = arith.negf %96 : vector<1x128xf32>
    %98 = math.exp %97 : vector<1x128xf32>
    %cst_60 = arith.constant 1.000000e+00 : f32
    %99 = vector.broadcast %cst_60 : f32 to vector<1x128xf32>
    %100 = arith.addf %99, %98 : vector<1x128xf32>
    %101 = arith.divf %99, %100 : vector<1x128xf32>
    %102 = vector.extract_strided_slice %95 {offsets = [0, 128], sizes = [1, 128], strides = [1, 1]} : vector<1x512xf32> to vector<1x128xf32>
    %103 = arith.negf %102 : vector<1x128xf32>
    %104 = math.exp %103 : vector<1x128xf32>
    %cst_61 = arith.constant 1.000000e+00 : f32
    %105 = vector.broadcast %cst_61 : f32 to vector<1x128xf32>
    %106 = arith.addf %105, %104 : vector<1x128xf32>
    %107 = arith.divf %105, %106 : vector<1x128xf32>
    %108 = vector.extract_strided_slice %95 {offsets = [0, 256], sizes = [1, 128], strides = [1, 1]} : vector<1x512xf32> to vector<1x128xf32>
    %109 = math.tanh %108 : vector<1x128xf32>
    %110 = vector.extract_strided_slice %95 {offsets = [0, 384], sizes = [1, 128], strides = [1, 1]} : vector<1x512xf32> to vector<1x128xf32>
    %111 = arith.negf %110 : vector<1x128xf32>
    %112 = math.exp %111 : vector<1x128xf32>
    %cst_62 = arith.constant 1.000000e+00 : f32
    %113 = vector.broadcast %cst_62 : f32 to vector<1x128xf32>
    %114 = arith.addf %113, %112 : vector<1x128xf32>
    %115 = arith.divf %113, %114 : vector<1x128xf32>
    %c0_63 = arith.constant 0 : index
    %c0_64 = arith.constant 0 : index
    %116 = vector.load %arg9[%c0_63, %c0_64] : memref<1x128xf32, #tpu.memory_space<vmem>>, vector<1x128xf32>
    %117 = arith.mulf %107, %116 : vector<1x128xf32>
    %118 = arith.mulf %101, %109 : vector<1x128xf32>
    %119 = arith.addf %117, %118 : vector<1x128xf32>
    %120 = math.tanh %119 : vector<1x128xf32>
    %121 = arith.mulf %115, %120 : vector<1x128xf32>
    %c0_65 = arith.constant 0 : index
    %c0_66 = arith.constant 0 : index
    %122 = vector.load %arg9[%c0_65, %c0_66] : memref<1x128xf32, #tpu.memory_space<vmem>>, vector<1x128xf32>
    tpu.vector_store %arg9[%c0_65, %c0_66], %119 {strides = array<i32>} : memref<1x128xf32, #tpu.memory_space<vmem>>, vector<1x128xf32>,
    %c0_67 = arith.constant 0 : index
    %c0_68 = arith.constant 0 : index
    %123 = vector.load %arg8[%c0_67, %c0_68] : memref<1x128xf32, #tpu.memory_space<vmem>>, vector<1x128xf32>
    tpu.vector_store %arg8[%c0_67, %c0_68], %121 {strides = array<i32>} : memref<1x128xf32, #tpu.memory_space<vmem>>, vector<1x128xf32>,
    %124 = arith.index_cast %c2_i32 : i32 to index
    %c0_69 = arith.constant 0 : index
    %125 = vector.load %arg6[%124, %c0_69] : memref<8x128xf32, #tpu.memory_space<vmem>>, vector<1x128xf32>
    tpu.vector_store %arg6[%124, %c0_69], %121 {strides = array<i32>} : memref<8x128xf32, #tpu.memory_space<vmem>>, vector<1x128xf32>,
    %c3_i32 = arith.constant 3 : i32
    %126 = arith.index_cast %c3_i32 : i32 to index
    %c0_70 = arith.constant 0 : index
    %127 = vector.load %arg7[%126, %c0_70] : memref<8x512xf32, #tpu.memory_space<vmem>>, vector<1x512xf32>
    %c0_71 = arith.constant 0 : index
    %c0_72 = arith.constant 0 : index
    %128 = vector.load %arg8[%c0_71, %c0_72] : memref<1x128xf32, #tpu.memory_space<vmem>>, vector<1x128xf32>
    %c0_73 = arith.constant 0 : index
    %c0_74 = arith.constant 0 : index
    %c0_75 = arith.constant 0 : index
    %129 = vector.load %arg3[%c0_73, %c0_74, %c0_75] : memref<2x128x512xf32, #tpu.memory_space<vmem>>, vector<1x128x512xf32>
    %130 = vector.shape_cast %129 : vector<1x128x512xf32> to vector<128x512xf32>
    %cst_76 = arith.constant dense<0.000000e+00> : vector<1x512xf32>
    %131 = tpu.matmul %128, %130, %cst_76 {dimension_numbers = #tpu.dot_dimension_numbers<[1], [0], [0], [1], [0, 0, 1, 1], [], []>} : vector<1x128xf32>, vector<128x512xf32>, vector<1x512xf32> -> vector<1x512xf32>
    %132 = arith.addf %127, %131 : vector<1x512xf32>
    %133 = vector.extract_strided_slice %132 {offsets = [0, 0], sizes = [1, 128], strides = [1, 1]} : vector<1x512xf32> to vector<1x128xf32>
    %134 = arith.negf %133 : vector<1x128xf32>
    %135 = math.exp %134 : vector<1x128xf32>
    %cst_77 = arith.constant 1.000000e+00 : f32
    %136 = vector.broadcast %cst_77 : f32 to vector<1x128xf32>
    %137 = arith.addf %136, %135 : vector<1x128xf32>
    %138 = arith.divf %136, %137 : vector<1x128xf32>
    %139 = vector.extract_strided_slice %132 {offsets = [0, 128], sizes = [1, 128], strides = [1, 1]} : vector<1x512xf32> to vector<1x128xf32>
    %140 = arith.negf %139 : vector<1x128xf32>
    %141 = math.exp %140 : vector<1x128xf32>
    %cst_78 = arith.constant 1.000000e+00 : f32
    %142 = vector.broadcast %cst_78 : f32 to vector<1x128xf32>
    %143 = arith.addf %142, %141 : vector<1x128xf32>
    %144 = arith.divf %142, %143 : vector<1x128xf32>
    %145 = vector.extract_strided_slice %132 {offsets = [0, 256], sizes = [1, 128], strides = [1, 1]} : vector<1x512xf32> to vector<1x128xf32>
    %146 = math.tanh %145 : vector<1x128xf32>
    %147 = vector.extract_strided_slice %132 {offsets = [0, 384], sizes = [1, 128], strides = [1, 1]} : vector<1x512xf32> to vector<1x128xf32>
    %148 = arith.negf %147 : vector<1x128xf32>
    %149 = math.exp %148 : vector<1x128xf32>
    %cst_79 = arith.constant 1.000000e+00 : f32
    %150 = vector.broadcast %cst_79 : f32 to vector<1x128xf32>
    %151 = arith.addf %150, %149 : vector<1x128xf32>
    %152 = arith.divf %150, %151 : vector<1x128xf32>
    %c0_80 = arith.constant 0 : index
    %c0_81 = arith.constant 0 : index
    %153 = vector.load %arg9[%c0_80, %c0_81] : memref<1x128xf32, #tpu.memory_space<vmem>>, vector<1x128xf32>
    %154 = arith.mulf %144, %153 : vector<1x128xf32>
    %155 = arith.mulf %138, %146 : vector<1x128xf32>
    %156 = arith.addf %154, %155 : vector<1x128xf32>
    %157 = math.tanh %156 : vector<1x128xf32>
    %158 = arith.mulf %152, %157 : vector<1x128xf32>
    %c0_82 = arith.constant 0 : index
    %c0_83 = arith.constant 0 : index
    %159 = vector.load %arg9[%c0_82, %c0_83] : memref<1x128xf32, #tpu.memory_space<vmem>>, vector<1x128xf32>
    tpu.vector_store %arg9[%c0_82, %c0_83], %156 {strides = array<i32>} : memref<1x128xf32, #tpu.memory_space<vmem>>, vector<1x128xf32>,
    %c0_84 = arith.constant 0 : index
    %c0_85 = arith.constant 0 : index
    %160 = vector.load %arg8[%c0_84, %c0_85] : memref<1x128xf32, #tpu.memory_space<vmem>>, vector<1x128xf32>
    tpu.vector_store %arg8[%c0_84, %c0_85], %158 {strides = array<i32>} : memref<1x128xf32, #tpu.memory_space<vmem>>, vector<1x128xf32>,
    %161 = arith.index_cast %c3_i32 : i32 to index
    %c0_86 = arith.constant 0 : index
    %162 = vector.load %arg6[%161, %c0_86] : memref<8x128xf32, #tpu.memory_space<vmem>>, vector<1x128xf32>
    tpu.vector_store %arg6[%161, %c0_86], %158 {strides = array<i32>} : memref<8x128xf32, #tpu.memory_space<vmem>>, vector<1x128xf32>,
    %c4_i32 = arith.constant 4 : i32
    %163 = arith.index_cast %c4_i32 : i32 to index
    %c0_87 = arith.constant 0 : index
    %164 = vector.load %arg7[%163, %c0_87] : memref<8x512xf32, #tpu.memory_space<vmem>>, vector<1x512xf32>
    %c0_88 = arith.constant 0 : index
    %c0_89 = arith.constant 0 : index
    %165 = vector.load %arg8[%c0_88, %c0_89] : memref<1x128xf32, #tpu.memory_space<vmem>>, vector<1x128xf32>
    %c0_90 = arith.constant 0 : index
    %c0_91 = arith.constant 0 : index
    %c0_92 = arith.constant 0 : index
    %166 = vector.load %arg3[%c0_90, %c0_91, %c0_92] : memref<2x128x512xf32, #tpu.memory_space<vmem>>, vector<1x128x512xf32>
    %167 = vector.shape_cast %166 : vector<1x128x512xf32> to vector<128x512xf32>
    %cst_93 = arith.constant dense<0.000000e+00> : vector<1x512xf32>
    %168 = tpu.matmul %165, %167, %cst_93 {dimension_numbers = #tpu.dot_dimension_numbers<[1], [0], [0], [1], [0, 0, 1, 1], [], []>} : vector<1x128xf32>, vector<128x512xf32>, vector<1x512xf32> -> vector<1x512xf32>
    %169 = arith.addf %164, %168 : vector<1x512xf32>
    %170 = vector.extract_strided_slice %169 {offsets = [0, 0], sizes = [1, 128], strides = [1, 1]} : vector<1x512xf32> to vector<1x128xf32>
    %171 = arith.negf %170 : vector<1x128xf32>
    %172 = math.exp %171 : vector<1x128xf32>
    %cst_94 = arith.constant 1.000000e+00 : f32
    %173 = vector.broadcast %cst_94 : f32 to vector<1x128xf32>
    %174 = arith.addf %173, %172 : vector<1x128xf32>
    %175 = arith.divf %173, %174 : vector<1x128xf32>
    %176 = vector.extract_strided_slice %169 {offsets = [0, 128], sizes = [1, 128], strides = [1, 1]} : vector<1x512xf32> to vector<1x128xf32>
    %177 = arith.negf %176 : vector<1x128xf32>
    %178 = math.exp %177 : vector<1x128xf32>
    %cst_95 = arith.constant 1.000000e+00 : f32
    %179 = vector.broadcast %cst_95 : f32 to vector<1x128xf32>
    %180 = arith.addf %179, %178 : vector<1x128xf32>
    %181 = arith.divf %179, %180 : vector<1x128xf32>
    %182 = vector.extract_strided_slice %169 {offsets = [0, 256], sizes = [1, 128], strides = [1, 1]} : vector<1x512xf32> to vector<1x128xf32>
    %183 = math.tanh %182 : vector<1x128xf32>
    %184 = vector.extract_strided_slice %169 {offsets = [0, 384], sizes = [1, 128], strides = [1, 1]} : vector<1x512xf32> to vector<1x128xf32>
    %185 = arith.negf %184 : vector<1x128xf32>
    %186 = math.exp %185 : vector<1x128xf32>
    %cst_96 = arith.constant 1.000000e+00 : f32
    %187 = vector.broadcast %cst_96 : f32 to vector<1x128xf32>
    %188 = arith.addf %187, %186 : vector<1x128xf32>
    %189 = arith.divf %187, %188 : vector<1x128xf32>
    %c0_97 = arith.constant 0 : index
    %c0_98 = arith.constant 0 : index
    %190 = vector.load %arg9[%c0_97, %c0_98] : memref<1x128xf32, #tpu.memory_space<vmem>>, vector<1x128xf32>
    %191 = arith.mulf %181, %190 : vector<1x128xf32>
    %192 = arith.mulf %175, %183 : vector<1x128xf32>
    %193 = arith.addf %191, %192 : vector<1x128xf32>
    %194 = math.tanh %193 : vector<1x128xf32>
    %195 = arith.mulf %189, %194 : vector<1x128xf32>
    %c0_99 = arith.constant 0 : index
    %c0_100 = arith.constant 0 : index
    %196 = vector.load %arg9[%c0_99, %c0_100] : memref<1x128xf32, #tpu.memory_space<vmem>>, vector<1x128xf32>
    tpu.vector_store %arg9[%c0_99, %c0_100], %193 {strides = array<i32>} : memref<1x128xf32, #tpu.memory_space<vmem>>, vector<1x128xf32>,
    %c0_101 = arith.constant 0 : index
    %c0_102 = arith.constant 0 : index
    %197 = vector.load %arg8[%c0_101, %c0_102] : memref<1x128xf32, #tpu.memory_space<vmem>>, vector<1x128xf32>
    tpu.vector_store %arg8[%c0_101, %c0_102], %195 {strides = array<i32>} : memref<1x128xf32, #tpu.memory_space<vmem>>, vector<1x128xf32>,
    %198 = arith.index_cast %c4_i32 : i32 to index
    %c0_103 = arith.constant 0 : index
    %199 = vector.load %arg6[%198, %c0_103] : memref<8x128xf32, #tpu.memory_space<vmem>>, vector<1x128xf32>
    tpu.vector_store %arg6[%198, %c0_103], %195 {strides = array<i32>} : memref<8x128xf32, #tpu.memory_space<vmem>>, vector<1x128xf32>,
    %c5_i32 = arith.constant 5 : i32
    %200 = arith.index_cast %c5_i32 : i32 to index
    %c0_104 = arith.constant 0 : index
    %201 = vector.load %arg7[%200, %c0_104] : memref<8x512xf32, #tpu.memory_space<vmem>>, vector<1x512xf32>
    %c0_105 = arith.constant 0 : index
    %c0_106 = arith.constant 0 : index
    %202 = vector.load %arg8[%c0_105, %c0_106] : memref<1x128xf32, #tpu.memory_space<vmem>>, vector<1x128xf32>
    %c0_107 = arith.constant 0 : index
    %c0_108 = arith.constant 0 : index
    %c0_109 = arith.constant 0 : index
    %203 = vector.load %arg3[%c0_107, %c0_108, %c0_109] : memref<2x128x512xf32, #tpu.memory_space<vmem>>, vector<1x128x512xf32>
    %204 = vector.shape_cast %203 : vector<1x128x512xf32> to vector<128x512xf32>
    %cst_110 = arith.constant dense<0.000000e+00> : vector<1x512xf32>
    %205 = tpu.matmul %202, %204, %cst_110 {dimension_numbers = #tpu.dot_dimension_numbers<[1], [0], [0], [1], [0, 0, 1, 1], [], []>} : vector<1x128xf32>, vector<128x512xf32>, vector<1x512xf32> -> vector<1x512xf32>
    %206 = arith.addf %201, %205 : vector<1x512xf32>
    %207 = vector.extract_strided_slice %206 {offsets = [0, 0], sizes = [1, 128], strides = [1, 1]} : vector<1x512xf32> to vector<1x128xf32>
    %208 = arith.negf %207 : vector<1x128xf32>
    %209 = math.exp %208 : vector<1x128xf32>
    %cst_111 = arith.constant 1.000000e+00 : f32
    %210 = vector.broadcast %cst_111 : f32 to vector<1x128xf32>
    %211 = arith.addf %210, %209 : vector<1x128xf32>
    %212 = arith.divf %210, %211 : vector<1x128xf32>
    %213 = vector.extract_strided_slice %206 {offsets = [0, 128], sizes = [1, 128], strides = [1, 1]} : vector<1x512xf32> to vector<1x128xf32>
    %214 = arith.negf %213 : vector<1x128xf32>
    %215 = math.exp %214 : vector<1x128xf32>
    %cst_112 = arith.constant 1.000000e+00 : f32
    %216 = vector.broadcast %cst_112 : f32 to vector<1x128xf32>
    %217 = arith.addf %216, %215 : vector<1x128xf32>
    %218 = arith.divf %216, %217 : vector<1x128xf32>
    %219 = vector.extract_strided_slice %206 {offsets = [0, 256], sizes = [1, 128], strides = [1, 1]} : vector<1x512xf32> to vector<1x128xf32>
    %220 = math.tanh %219 : vector<1x128xf32>
    %221 = vector.extract_strided_slice %206 {offsets = [0, 384], sizes = [1, 128], strides = [1, 1]} : vector<1x512xf32> to vector<1x128xf32>
    %222 = arith.negf %221 : vector<1x128xf32>
    %223 = math.exp %222 : vector<1x128xf32>
    %cst_113 = arith.constant 1.000000e+00 : f32
    %224 = vector.broadcast %cst_113 : f32 to vector<1x128xf32>
    %225 = arith.addf %224, %223 : vector<1x128xf32>
    %226 = arith.divf %224, %225 : vector<1x128xf32>
    %c0_114 = arith.constant 0 : index
    %c0_115 = arith.constant 0 : index
    %227 = vector.load %arg9[%c0_114, %c0_115] : memref<1x128xf32, #tpu.memory_space<vmem>>, vector<1x128xf32>
    %228 = arith.mulf %218, %227 : vector<1x128xf32>
    %229 = arith.mulf %212, %220 : vector<1x128xf32>
    %230 = arith.addf %228, %229 : vector<1x128xf32>
    %231 = math.tanh %230 : vector<1x128xf32>
    %232 = arith.mulf %226, %231 : vector<1x128xf32>
    %c0_116 = arith.constant 0 : index
    %c0_117 = arith.constant 0 : index
    %233 = vector.load %arg9[%c0_116, %c0_117] : memref<1x128xf32, #tpu.memory_space<vmem>>, vector<1x128xf32>
    tpu.vector_store %arg9[%c0_116, %c0_117], %230 {strides = array<i32>} : memref<1x128xf32, #tpu.memory_space<vmem>>, vector<1x128xf32>,
    %c0_118 = arith.constant 0 : index
    %c0_119 = arith.constant 0 : index
    %234 = vector.load %arg8[%c0_118, %c0_119] : memref<1x128xf32, #tpu.memory_space<vmem>>, vector<1x128xf32>
    tpu.vector_store %arg8[%c0_118, %c0_119], %232 {strides = array<i32>} : memref<1x128xf32, #tpu.memory_space<vmem>>, vector<1x128xf32>,
    %235 = arith.index_cast %c5_i32 : i32 to index
    %c0_120 = arith.constant 0 : index
    %236 = vector.load %arg6[%235, %c0_120] : memref<8x128xf32, #tpu.memory_space<vmem>>, vector<1x128xf32>
    tpu.vector_store %arg6[%235, %c0_120], %232 {strides = array<i32>} : memref<8x128xf32, #tpu.memory_space<vmem>>, vector<1x128xf32>,
    %c6_i32 = arith.constant 6 : i32
    %237 = arith.index_cast %c6_i32 : i32 to index
    %c0_121 = arith.constant 0 : index
    %238 = vector.load %arg7[%237, %c0_121] : memref<8x512xf32, #tpu.memory_space<vmem>>, vector<1x512xf32>
    %c0_122 = arith.constant 0 : index
    %c0_123 = arith.constant 0 : index
    %239 = vector.load %arg8[%c0_122, %c0_123] : memref<1x128xf32, #tpu.memory_space<vmem>>, vector<1x128xf32>
    %c0_124 = arith.constant 0 : index
    %c0_125 = arith.constant 0 : index
    %c0_126 = arith.constant 0 : index
    %240 = vector.load %arg3[%c0_124, %c0_125, %c0_126] : memref<2x128x512xf32, #tpu.memory_space<vmem>>, vector<1x128x512xf32>
    %241 = vector.shape_cast %240 : vector<1x128x512xf32> to vector<128x512xf32>
    %cst_127 = arith.constant dense<0.000000e+00> : vector<1x512xf32>
    %242 = tpu.matmul %239, %241, %cst_127 {dimension_numbers = #tpu.dot_dimension_numbers<[1], [0], [0], [1], [0, 0, 1, 1], [], []>} : vector<1x128xf32>, vector<128x512xf32>, vector<1x512xf32> -> vector<1x512xf32>
    %243 = arith.addf %238, %242 : vector<1x512xf32>
    %244 = vector.extract_strided_slice %243 {offsets = [0, 0], sizes = [1, 128], strides = [1, 1]} : vector<1x512xf32> to vector<1x128xf32>
    %245 = arith.negf %244 : vector<1x128xf32>
    %246 = math.exp %245 : vector<1x128xf32>
    %cst_128 = arith.constant 1.000000e+00 : f32
    %247 = vector.broadcast %cst_128 : f32 to vector<1x128xf32>
    %248 = arith.addf %247, %246 : vector<1x128xf32>
    %249 = arith.divf %247, %248 : vector<1x128xf32>
    %250 = vector.extract_strided_slice %243 {offsets = [0, 128], sizes = [1, 128], strides = [1, 1]} : vector<1x512xf32> to vector<1x128xf32>
    %251 = arith.negf %250 : vector<1x128xf32>
    %252 = math.exp %251 : vector<1x128xf32>
    %cst_129 = arith.constant 1.000000e+00 : f32
    %253 = vector.broadcast %cst_129 : f32 to vector<1x128xf32>
    %254 = arith.addf %253, %252 : vector<1x128xf32>
    %255 = arith.divf %253, %254 : vector<1x128xf32>
    %256 = vector.extract_strided_slice %243 {offsets = [0, 256], sizes = [1, 128], strides = [1, 1]} : vector<1x512xf32> to vector<1x128xf32>
    %257 = math.tanh %256 : vector<1x128xf32>
    %258 = vector.extract_strided_slice %243 {offsets = [0, 384], sizes = [1, 128], strides = [1, 1]} : vector<1x512xf32> to vector<1x128xf32>
    %259 = arith.negf %258 : vector<1x128xf32>
    %260 = math.exp %259 : vector<1x128xf32>
    %cst_130 = arith.constant 1.000000e+00 : f32
    %261 = vector.broadcast %cst_130 : f32 to vector<1x128xf32>
    %262 = arith.addf %261, %260 : vector<1x128xf32>
    %263 = arith.divf %261, %262 : vector<1x128xf32>
    %c0_131 = arith.constant 0 : index
    %c0_132 = arith.constant 0 : index
    %264 = vector.load %arg9[%c0_131, %c0_132] : memref<1x128xf32, #tpu.memory_space<vmem>>, vector<1x128xf32>
    %265 = arith.mulf %255, %264 : vector<1x128xf32>
    %266 = arith.mulf %249, %257 : vector<1x128xf32>
    %267 = arith.addf %265, %266 : vector<1x128xf32>
    %268 = math.tanh %267 : vector<1x128xf32>
    %269 = arith.mulf %263, %268 : vector<1x128xf32>
    %c0_133 = arith.constant 0 : index
    %c0_134 = arith.constant 0 : index
    %270 = vector.load %arg9[%c0_133, %c0_134] : memref<1x128xf32, #tpu.memory_space<vmem>>, vector<1x128xf32>
    tpu.vector_store %arg9[%c0_133, %c0_134], %267 {strides = array<i32>} : memref<1x128xf32, #tpu.memory_space<vmem>>, vector<1x128xf32>,
    %c0_135 = arith.constant 0 : index
    %c0_136 = arith.constant 0 : index
    %271 = vector.load %arg8[%c0_135, %c0_136] : memref<1x128xf32, #tpu.memory_space<vmem>>, vector<1x128xf32>
    tpu.vector_store %arg8[%c0_135, %c0_136], %269 {strides = array<i32>} : memref<1x128xf32, #tpu.memory_space<vmem>>, vector<1x128xf32>,
    %272 = arith.index_cast %c6_i32 : i32 to index
    %c0_137 = arith.constant 0 : index
    %273 = vector.load %arg6[%272, %c0_137] : memref<8x128xf32, #tpu.memory_space<vmem>>, vector<1x128xf32>
    tpu.vector_store %arg6[%272, %c0_137], %269 {strides = array<i32>} : memref<8x128xf32, #tpu.memory_space<vmem>>, vector<1x128xf32>,
    %c7_i32 = arith.constant 7 : i32
    %274 = arith.index_cast %c7_i32 : i32 to index
    %c0_138 = arith.constant 0 : index
    %275 = vector.load %arg7[%274, %c0_138] : memref<8x512xf32, #tpu.memory_space<vmem>>, vector<1x512xf32>
    %c0_139 = arith.constant 0 : index
    %c0_140 = arith.constant 0 : index
    %276 = vector.load %arg8[%c0_139, %c0_140] : memref<1x128xf32, #tpu.memory_space<vmem>>, vector<1x128xf32>
    %c0_141 = arith.constant 0 : index
    %c0_142 = arith.constant 0 : index
    %c0_143 = arith.constant 0 : index
    %277 = vector.load %arg3[%c0_141, %c0_142, %c0_143] : memref<2x128x512xf32, #tpu.memory_space<vmem>>, vector<1x128x512xf32>
    %278 = vector.shape_cast %277 : vector<1x128x512xf32> to vector<128x512xf32>
    %cst_144 = arith.constant dense<0.000000e+00> : vector<1x512xf32>
    %279 = tpu.matmul %276, %278, %cst_144 {dimension_numbers = #tpu.dot_dimension_numbers<[1], [0], [0], [1], [0, 0, 1, 1], [], []>} : vector<1x128xf32>, vector<128x512xf32>, vector<1x512xf32> -> vector<1x512xf32>
    %280 = arith.addf %275, %279 : vector<1x512xf32>
    %281 = vector.extract_strided_slice %280 {offsets = [0, 0], sizes = [1, 128], strides = [1, 1]} : vector<1x512xf32> to vector<1x128xf32>
    %282 = arith.negf %281 : vector<1x128xf32>
    %283 = math.exp %282 : vector<1x128xf32>
    %cst_145 = arith.constant 1.000000e+00 : f32
    %284 = vector.broadcast %cst_145 : f32 to vector<1x128xf32>
    %285 = arith.addf %284, %283 : vector<1x128xf32>
    %286 = arith.divf %284, %285 : vector<1x128xf32>
    %287 = vector.extract_strided_slice %280 {offsets = [0, 128], sizes = [1, 128], strides = [1, 1]} : vector<1x512xf32> to vector<1x128xf32>
    %288 = arith.negf %287 : vector<1x128xf32>
    %289 = math.exp %288 : vector<1x128xf32>
    %cst_146 = arith.constant 1.000000e+00 : f32
    %290 = vector.broadcast %cst_146 : f32 to vector<1x128xf32>
    %291 = arith.addf %290, %289 : vector<1x128xf32>
    %292 = arith.divf %290, %291 : vector<1x128xf32>
    %293 = vector.extract_strided_slice %280 {offsets = [0, 256], sizes = [1, 128], strides = [1, 1]} : vector<1x512xf32> to vector<1x128xf32>
    %294 = math.tanh %293 : vector<1x128xf32>
    %295 = vector.extract_strided_slice %280 {offsets = [0, 384], sizes = [1, 128], strides = [1, 1]} : vector<1x512xf32> to vector<1x128xf32>
    %296 = arith.negf %295 : vector<1x128xf32>
    %297 = math.exp %296 : vector<1x128xf32>
    %cst_147 = arith.constant 1.000000e+00 : f32
    %298 = vector.broadcast %cst_147 : f32 to vector<1x128xf32>
    %299 = arith.addf %298, %297 : vector<1x128xf32>
    %300 = arith.divf %298, %299 : vector<1x128xf32>
    %c0_148 = arith.constant 0 : index
    %c0_149 = arith.constant 0 : index
    %301 = vector.load %arg9[%c0_148, %c0_149] : memref<1x128xf32, #tpu.memory_space<vmem>>, vector<1x128xf32>
    %302 = arith.mulf %292, %301 : vector<1x128xf32>
    %303 = arith.mulf %286, %294 : vector<1x128xf32>
    %304 = arith.addf %302, %303 : vector<1x128xf32>
    %305 = math.tanh %304 : vector<1x128xf32>
    %306 = arith.mulf %300, %305 : vector<1x128xf32>
    %c0_150 = arith.constant 0 : index
    %c0_151 = arith.constant 0 : index
    %307 = vector.load %arg9[%c0_150, %c0_151] : memref<1x128xf32, #tpu.memory_space<vmem>>, vector<1x128xf32>
    tpu.vector_store %arg9[%c0_150, %c0_151], %304 {strides = array<i32>} : memref<1x128xf32, #tpu.memory_space<vmem>>, vector<1x128xf32>,
    %c0_152 = arith.constant 0 : index
    %c0_153 = arith.constant 0 : index
    %308 = vector.load %arg8[%c0_152, %c0_153] : memref<1x128xf32, #tpu.memory_space<vmem>>, vector<1x128xf32>
    tpu.vector_store %arg8[%c0_152, %c0_153], %306 {strides = array<i32>} : memref<1x128xf32, #tpu.memory_space<vmem>>, vector<1x128xf32>,
    %309 = arith.index_cast %c7_i32 : i32 to index
    %c0_154 = arith.constant 0 : index
    %310 = vector.load %arg6[%309, %c0_154] : memref<8x128xf32, #tpu.memory_space<vmem>>, vector<1x128xf32>
    tpu.vector_store %arg6[%309, %c0_154], %306 {strides = array<i32>} : memref<8x128xf32, #tpu.memory_space<vmem>>, vector<1x128xf32>,
    %c8_i32 = arith.constant 8 : i32
    %c0_155 = arith.constant 0 : index
    %c0_156 = arith.constant 0 : index
    %311 = vector.load %arg6[%c0_155, %c0_156] : memref<8x128xf32, #tpu.memory_space<vmem>>, vector<8x128xf32>
    %312 = arith.negf %311 : vector<8x128xf32>
    %313 = math.exp %312 : vector<8x128xf32>
    %cst_157 = arith.constant 1.000000e+00 : f32
    %314 = vector.broadcast %cst_157 : f32 to vector<8x128xf32>
    %315 = arith.addf %314, %313 : vector<8x128xf32>
    %316 = arith.divf %314, %315 : vector<8x128xf32>
    %c0_158 = arith.constant 0 : index
    %c0_159 = arith.constant 0 : index
    %317 = vector.load %arg6[%c0_158, %c0_159] : memref<8x128xf32, #tpu.memory_space<vmem>>, vector<8x128xf32>
    tpu.vector_store %arg6[%c0_158, %c0_159], %316 {strides = array<i32>} : memref<8x128xf32, #tpu.memory_space<vmem>>, vector<8x128xf32>,
    %c0_160 = arith.constant 0 : index
    %c0_161 = arith.constant 0 : index
    %318 = vector.load %arg6[%c0_160, %c0_161] : memref<8x128xf32, #tpu.memory_space<vmem>>, vector<8x128xf32>
    %c1 = arith.constant 1 : index
    %c0_162 = arith.constant 0 : index
    %c0_163 = arith.constant 0 : index
    %319 = vector.load %arg2[%c1, %c0_162, %c0_163] : memref<2x128x512xf32, #tpu.memory_space<vmem>>, vector<1x128x512xf32>
    %320 = vector.shape_cast %319 : vector<1x128x512xf32> to vector<128x512xf32>
    %cst_164 = arith.constant dense<0.000000e+00> : vector<8x512xf32>
    %321 = tpu.matmul %318, %320, %cst_164 {dimension_numbers = #tpu.dot_dimension_numbers<[1], [0], [0], [1], [0, 0, 1, 1], [], []>} : vector<8x128xf32>, vector<128x512xf32>, vector<8x512xf32> -> vector<8x512xf32>
    %c1_165 = arith.constant 1 : index
    %c0_166 = arith.constant 0 : index
    %c0_167 = arith.constant 0 : index
    %322 = vector.load %arg4[%c1_165, %c0_166, %c0_167] : memref<2x1x512xf32, #tpu.memory_space<vmem>>, vector<1x1x512xf32>
    %323 = vector.shape_cast %322 : vector<1x1x512xf32> to vector<1x512xf32>
    %324 = vector.broadcast %323 : vector<1x512xf32> to vector<8x512xf32>
    %325 = arith.addf %321, %324 : vector<8x512xf32>
    %c0_168 = arith.constant 0 : index
    %c0_169 = arith.constant 0 : index
    %326 = vector.load %arg7[%c0_168, %c0_169] : memref<8x512xf32, #tpu.memory_space<vmem>>, vector<8x512xf32>
    tpu.vector_store %arg7[%c0_168, %c0_169], %325 {strides = array<i32>} : memref<8x512xf32, #tpu.memory_space<vmem>>, vector<8x512xf32>,
    %cst_170 = arith.constant 0.000000e+00 : f32
    %327 = vector.broadcast %cst_170 : f32 to vector<1x128xf32>
    %c0_171 = arith.constant 0 : index
    %c0_172 = arith.constant 0 : index
    %328 = vector.load %arg8[%c0_171, %c0_172] : memref<1x128xf32, #tpu.memory_space<vmem>>, vector<1x128xf32>
    tpu.vector_store %arg8[%c0_171, %c0_172], %327 {strides = array<i32>} : memref<1x128xf32, #tpu.memory_space<vmem>>, vector<1x128xf32>,
    %cst_173 = arith.constant 0.000000e+00 : f32
    %329 = vector.broadcast %cst_173 : f32 to vector<1x128xf32>
    %c0_174 = arith.constant 0 : index
    %c0_175 = arith.constant 0 : index
    %330 = vector.load %arg9[%c0_174, %c0_175] : memref<1x128xf32, #tpu.memory_space<vmem>>, vector<1x128xf32>
    tpu.vector_store %arg9[%c0_174, %c0_175], %329 {strides = array<i32>} : memref<1x128xf32, #tpu.memory_space<vmem>>, vector<1x128xf32>,
    %c0_i32_176 = arith.constant 0 : i32
    %331 = arith.index_cast %c0_i32_176 : i32 to index
    %c0_177 = arith.constant 0 : index
    %332 = vector.load %arg7[%331, %c0_177] : memref<8x512xf32, #tpu.memory_space<vmem>>, vector<1x512xf32>
    %c0_178 = arith.constant 0 : index
    %c0_179 = arith.constant 0 : index
    %333 = vector.load %arg8[%c0_178, %c0_179] : memref<1x128xf32, #tpu.memory_space<vmem>>, vector<1x128xf32>
    %c1_180 = arith.constant 1 : index
    %c0_181 = arith.constant 0 : index
    %c0_182 = arith.constant 0 : index
    %334 = vector.load %arg3[%c1_180, %c0_181, %c0_182] : memref<2x128x512xf32, #tpu.memory_space<vmem>>, vector<1x128x512xf32>
    %335 = vector.shape_cast %334 : vector<1x128x512xf32> to vector<128x512xf32>
    %cst_183 = arith.constant dense<0.000000e+00> : vector<1x512xf32>
    %336 = tpu.matmul %333, %335, %cst_183 {dimension_numbers = #tpu.dot_dimension_numbers<[1], [0], [0], [1], [0, 0, 1, 1], [], []>} : vector<1x128xf32>, vector<128x512xf32>, vector<1x512xf32> -> vector<1x512xf32>
    %337 = arith.addf %332, %336 : vector<1x512xf32>
    %338 = vector.extract_strided_slice %337 {offsets = [0, 0], sizes = [1, 128], strides = [1, 1]} : vector<1x512xf32> to vector<1x128xf32>
    %339 = arith.negf %338 : vector<1x128xf32>
    %340 = math.exp %339 : vector<1x128xf32>
    %cst_184 = arith.constant 1.000000e+00 : f32
    %341 = vector.broadcast %cst_184 : f32 to vector<1x128xf32>
    %342 = arith.addf %341, %340 : vector<1x128xf32>
    %343 = arith.divf %341, %342 : vector<1x128xf32>
    %344 = vector.extract_strided_slice %337 {offsets = [0, 128], sizes = [1, 128], strides = [1, 1]} : vector<1x512xf32> to vector<1x128xf32>
    %345 = arith.negf %344 : vector<1x128xf32>
    %346 = math.exp %345 : vector<1x128xf32>
    %cst_185 = arith.constant 1.000000e+00 : f32
    %347 = vector.broadcast %cst_185 : f32 to vector<1x128xf32>
    %348 = arith.addf %347, %346 : vector<1x128xf32>
    %349 = arith.divf %347, %348 : vector<1x128xf32>
    %350 = vector.extract_strided_slice %337 {offsets = [0, 256], sizes = [1, 128], strides = [1, 1]} : vector<1x512xf32> to vector<1x128xf32>
    %351 = math.tanh %350 : vector<1x128xf32>
    %352 = vector.extract_strided_slice %337 {offsets = [0, 384], sizes = [1, 128], strides = [1, 1]} : vector<1x512xf32> to vector<1x128xf32>
    %353 = arith.negf %352 : vector<1x128xf32>
    %354 = math.exp %353 : vector<1x128xf32>
    %cst_186 = arith.constant 1.000000e+00 : f32
    %355 = vector.broadcast %cst_186 : f32 to vector<1x128xf32>
    %356 = arith.addf %355, %354 : vector<1x128xf32>
    %357 = arith.divf %355, %356 : vector<1x128xf32>
    %c0_187 = arith.constant 0 : index
    %c0_188 = arith.constant 0 : index
    %358 = vector.load %arg9[%c0_187, %c0_188] : memref<1x128xf32, #tpu.memory_space<vmem>>, vector<1x128xf32>
    %359 = arith.mulf %349, %358 : vector<1x128xf32>
    %360 = arith.mulf %343, %351 : vector<1x128xf32>
    %361 = arith.addf %359, %360 : vector<1x128xf32>
    %362 = math.tanh %361 : vector<1x128xf32>
    %363 = arith.mulf %357, %362 : vector<1x128xf32>
    %c0_189 = arith.constant 0 : index
    %c0_190 = arith.constant 0 : index
    %364 = vector.load %arg9[%c0_189, %c0_190] : memref<1x128xf32, #tpu.memory_space<vmem>>, vector<1x128xf32>
    tpu.vector_store %arg9[%c0_189, %c0_190], %361 {strides = array<i32>} : memref<1x128xf32, #tpu.memory_space<vmem>>, vector<1x128xf32>,
    %c0_191 = arith.constant 0 : index
    %c0_192 = arith.constant 0 : index
    %365 = vector.load %arg8[%c0_191, %c0_192] : memref<1x128xf32, #tpu.memory_space<vmem>>, vector<1x128xf32>
    tpu.vector_store %arg8[%c0_191, %c0_192], %363 {strides = array<i32>} : memref<1x128xf32, #tpu.memory_space<vmem>>, vector<1x128xf32>,
    %c1_i32_193 = arith.constant 1 : i32
    %366 = arith.index_cast %c1_i32_193 : i32 to index
    %c0_194 = arith.constant 0 : index
    %367 = vector.load %arg7[%366, %c0_194] : memref<8x512xf32, #tpu.memory_space<vmem>>, vector<1x512xf32>
    %c0_195 = arith.constant 0 : index
    %c0_196 = arith.constant 0 : index
    %368 = vector.load %arg8[%c0_195, %c0_196] : memref<1x128xf32, #tpu.memory_space<vmem>>, vector<1x128xf32>
    %c1_197 = arith.constant 1 : index
    %c0_198 = arith.constant 0 : index
    %c0_199 = arith.constant 0 : index
    %369 = vector.load %arg3[%c1_197, %c0_198, %c0_199] : memref<2x128x512xf32, #tpu.memory_space<vmem>>, vector<1x128x512xf32>
    %370 = vector.shape_cast %369 : vector<1x128x512xf32> to vector<128x512xf32>
    %cst_200 = arith.constant dense<0.000000e+00> : vector<1x512xf32>
    %371 = tpu.matmul %368, %370, %cst_200 {dimension_numbers = #tpu.dot_dimension_numbers<[1], [0], [0], [1], [0, 0, 1, 1], [], []>} : vector<1x128xf32>, vector<128x512xf32>, vector<1x512xf32> -> vector<1x512xf32>
    %372 = arith.addf %367, %371 : vector<1x512xf32>
    %373 = vector.extract_strided_slice %372 {offsets = [0, 0], sizes = [1, 128], strides = [1, 1]} : vector<1x512xf32> to vector<1x128xf32>
    %374 = arith.negf %373 : vector<1x128xf32>
    %375 = math.exp %374 : vector<1x128xf32>
    %cst_201 = arith.constant 1.000000e+00 : f32
    %376 = vector.broadcast %cst_201 : f32 to vector<1x128xf32>
    %377 = arith.addf %376, %375 : vector<1x128xf32>
    %378 = arith.divf %376, %377 : vector<1x128xf32>
    %379 = vector.extract_strided_slice %372 {offsets = [0, 128], sizes = [1, 128], strides = [1, 1]} : vector<1x512xf32> to vector<1x128xf32>
    %380 = arith.negf %379 : vector<1x128xf32>
    %381 = math.exp %380 : vector<1x128xf32>
    %cst_202 = arith.constant 1.000000e+00 : f32
    %382 = vector.broadcast %cst_202 : f32 to vector<1x128xf32>
    %383 = arith.addf %382, %381 : vector<1x128xf32>
    %384 = arith.divf %382, %383 : vector<1x128xf32>
    %385 = vector.extract_strided_slice %372 {offsets = [0, 256], sizes = [1, 128], strides = [1, 1]} : vector<1x512xf32> to vector<1x128xf32>
    %386 = math.tanh %385 : vector<1x128xf32>
    %387 = vector.extract_strided_slice %372 {offsets = [0, 384], sizes = [1, 128], strides = [1, 1]} : vector<1x512xf32> to vector<1x128xf32>
    %388 = arith.negf %387 : vector<1x128xf32>
    %389 = math.exp %388 : vector<1x128xf32>
    %cst_203 = arith.constant 1.000000e+00 : f32
    %390 = vector.broadcast %cst_203 : f32 to vector<1x128xf32>
    %391 = arith.addf %390, %389 : vector<1x128xf32>
    %392 = arith.divf %390, %391 : vector<1x128xf32>
    %c0_204 = arith.constant 0 : index
    %c0_205 = arith.constant 0 : index
    %393 = vector.load %arg9[%c0_204, %c0_205] : memref<1x128xf32, #tpu.memory_space<vmem>>, vector<1x128xf32>
    %394 = arith.mulf %384, %393 : vector<1x128xf32>
    %395 = arith.mulf %378, %386 : vector<1x128xf32>
    %396 = arith.addf %394, %395 : vector<1x128xf32>
    %397 = math.tanh %396 : vector<1x128xf32>
    %398 = arith.mulf %392, %397 : vector<1x128xf32>
    %c0_206 = arith.constant 0 : index
    %c0_207 = arith.constant 0 : index
    %399 = vector.load %arg9[%c0_206, %c0_207] : memref<1x128xf32, #tpu.memory_space<vmem>>, vector<1x128xf32>
    tpu.vector_store %arg9[%c0_206, %c0_207], %396 {strides = array<i32>} : memref<1x128xf32, #tpu.memory_space<vmem>>, vector<1x128xf32>,
    %c0_208 = arith.constant 0 : index
    %c0_209 = arith.constant 0 : index
    %400 = vector.load %arg8[%c0_208, %c0_209] : memref<1x128xf32, #tpu.memory_space<vmem>>, vector<1x128xf32>
    tpu.vector_store %arg8[%c0_208, %c0_209], %398 {strides = array<i32>} : memref<1x128xf32, #tpu.memory_space<vmem>>, vector<1x128xf32>,
    %c2_i32_210 = arith.constant 2 : i32
    %401 = arith.index_cast %c2_i32_210 : i32 to index
    %c0_211 = arith.constant 0 : index
    %402 = vector.load %arg7[%401, %c0_211] : memref<8x512xf32, #tpu.memory_space<vmem>>, vector<1x512xf32>
    %c0_212 = arith.constant 0 : index
    %c0_213 = arith.constant 0 : index
    %403 = vector.load %arg8[%c0_212, %c0_213] : memref<1x128xf32, #tpu.memory_space<vmem>>, vector<1x128xf32>
    %c1_214 = arith.constant 1 : index
    %c0_215 = arith.constant 0 : index
    %c0_216 = arith.constant 0 : index
    %404 = vector.load %arg3[%c1_214, %c0_215, %c0_216] : memref<2x128x512xf32, #tpu.memory_space<vmem>>, vector<1x128x512xf32>
    %405 = vector.shape_cast %404 : vector<1x128x512xf32> to vector<128x512xf32>
    %cst_217 = arith.constant dense<0.000000e+00> : vector<1x512xf32>
    %406 = tpu.matmul %403, %405, %cst_217 {dimension_numbers = #tpu.dot_dimension_numbers<[1], [0], [0], [1], [0, 0, 1, 1], [], []>} : vector<1x128xf32>, vector<128x512xf32>, vector<1x512xf32> -> vector<1x512xf32>
    %407 = arith.addf %402, %406 : vector<1x512xf32>
    %408 = vector.extract_strided_slice %407 {offsets = [0, 0], sizes = [1, 128], strides = [1, 1]} : vector<1x512xf32> to vector<1x128xf32>
    %409 = arith.negf %408 : vector<1x128xf32>
    %410 = math.exp %409 : vector<1x128xf32>
    %cst_218 = arith.constant 1.000000e+00 : f32
    %411 = vector.broadcast %cst_218 : f32 to vector<1x128xf32>
    %412 = arith.addf %411, %410 : vector<1x128xf32>
    %413 = arith.divf %411, %412 : vector<1x128xf32>
    %414 = vector.extract_strided_slice %407 {offsets = [0, 128], sizes = [1, 128], strides = [1, 1]} : vector<1x512xf32> to vector<1x128xf32>
    %415 = arith.negf %414 : vector<1x128xf32>
    %416 = math.exp %415 : vector<1x128xf32>
    %cst_219 = arith.constant 1.000000e+00 : f32
    %417 = vector.broadcast %cst_219 : f32 to vector<1x128xf32>
    %418 = arith.addf %417, %416 : vector<1x128xf32>
    %419 = arith.divf %417, %418 : vector<1x128xf32>
    %420 = vector.extract_strided_slice %407 {offsets = [0, 256], sizes = [1, 128], strides = [1, 1]} : vector<1x512xf32> to vector<1x128xf32>
    %421 = math.tanh %420 : vector<1x128xf32>
    %422 = vector.extract_strided_slice %407 {offsets = [0, 384], sizes = [1, 128], strides = [1, 1]} : vector<1x512xf32> to vector<1x128xf32>
    %423 = arith.negf %422 : vector<1x128xf32>
    %424 = math.exp %423 : vector<1x128xf32>
    %cst_220 = arith.constant 1.000000e+00 : f32
    %425 = vector.broadcast %cst_220 : f32 to vector<1x128xf32>
    %426 = arith.addf %425, %424 : vector<1x128xf32>
    %427 = arith.divf %425, %426 : vector<1x128xf32>
    %c0_221 = arith.constant 0 : index
    %c0_222 = arith.constant 0 : index
    %428 = vector.load %arg9[%c0_221, %c0_222] : memref<1x128xf32, #tpu.memory_space<vmem>>, vector<1x128xf32>
    %429 = arith.mulf %419, %428 : vector<1x128xf32>
    %430 = arith.mulf %413, %421 : vector<1x128xf32>
    %431 = arith.addf %429, %430 : vector<1x128xf32>
    %432 = math.tanh %431 : vector<1x128xf32>
    %433 = arith.mulf %427, %432 : vector<1x128xf32>
    %c0_223 = arith.constant 0 : index
    %c0_224 = arith.constant 0 : index
    %434 = vector.load %arg9[%c0_223, %c0_224] : memref<1x128xf32, #tpu.memory_space<vmem>>, vector<1x128xf32>
    tpu.vector_store %arg9[%c0_223, %c0_224], %431 {strides = array<i32>} : memref<1x128xf32, #tpu.memory_space<vmem>>, vector<1x128xf32>,
    %c0_225 = arith.constant 0 : index
    %c0_226 = arith.constant 0 : index
    %435 = vector.load %arg8[%c0_225, %c0_226] : memref<1x128xf32, #tpu.memory_space<vmem>>, vector<1x128xf32>
    tpu.vector_store %arg8[%c0_225, %c0_226], %433 {strides = array<i32>} : memref<1x128xf32, #tpu.memory_space<vmem>>, vector<1x128xf32>,
    %c3_i32_227 = arith.constant 3 : i32
    %436 = arith.index_cast %c3_i32_227 : i32 to index
    %c0_228 = arith.constant 0 : index
    %437 = vector.load %arg7[%436, %c0_228] : memref<8x512xf32, #tpu.memory_space<vmem>>, vector<1x512xf32>
    %c0_229 = arith.constant 0 : index
    %c0_230 = arith.constant 0 : index
    %438 = vector.load %arg8[%c0_229, %c0_230] : memref<1x128xf32, #tpu.memory_space<vmem>>, vector<1x128xf32>
    %c1_231 = arith.constant 1 : index
    %c0_232 = arith.constant 0 : index
    %c0_233 = arith.constant 0 : index
    %439 = vector.load %arg3[%c1_231, %c0_232, %c0_233] : memref<2x128x512xf32, #tpu.memory_space<vmem>>, vector<1x128x512xf32>
    %440 = vector.shape_cast %439 : vector<1x128x512xf32> to vector<128x512xf32>
    %cst_234 = arith.constant dense<0.000000e+00> : vector<1x512xf32>
    %441 = tpu.matmul %438, %440, %cst_234 {dimension_numbers = #tpu.dot_dimension_numbers<[1], [0], [0], [1], [0, 0, 1, 1], [], []>} : vector<1x128xf32>, vector<128x512xf32>, vector<1x512xf32> -> vector<1x512xf32>
    %442 = arith.addf %437, %441 : vector<1x512xf32>
    %443 = vector.extract_strided_slice %442 {offsets = [0, 0], sizes = [1, 128], strides = [1, 1]} : vector<1x512xf32> to vector<1x128xf32>
    %444 = arith.negf %443 : vector<1x128xf32>
    %445 = math.exp %444 : vector<1x128xf32>
    %cst_235 = arith.constant 1.000000e+00 : f32
    %446 = vector.broadcast %cst_235 : f32 to vector<1x128xf32>
    %447 = arith.addf %446, %445 : vector<1x128xf32>
    %448 = arith.divf %446, %447 : vector<1x128xf32>
    %449 = vector.extract_strided_slice %442 {offsets = [0, 128], sizes = [1, 128], strides = [1, 1]} : vector<1x512xf32> to vector<1x128xf32>
    %450 = arith.negf %449 : vector<1x128xf32>
    %451 = math.exp %450 : vector<1x128xf32>
    %cst_236 = arith.constant 1.000000e+00 : f32
    %452 = vector.broadcast %cst_236 : f32 to vector<1x128xf32>
    %453 = arith.addf %452, %451 : vector<1x128xf32>
    %454 = arith.divf %452, %453 : vector<1x128xf32>
    %455 = vector.extract_strided_slice %442 {offsets = [0, 256], sizes = [1, 128], strides = [1, 1]} : vector<1x512xf32> to vector<1x128xf32>
    %456 = math.tanh %455 : vector<1x128xf32>
    %457 = vector.extract_strided_slice %442 {offsets = [0, 384], sizes = [1, 128], strides = [1, 1]} : vector<1x512xf32> to vector<1x128xf32>
    %458 = arith.negf %457 : vector<1x128xf32>
    %459 = math.exp %458 : vector<1x128xf32>
    %cst_237 = arith.constant 1.000000e+00 : f32
    %460 = vector.broadcast %cst_237 : f32 to vector<1x128xf32>
    %461 = arith.addf %460, %459 : vector<1x128xf32>
    %462 = arith.divf %460, %461 : vector<1x128xf32>
    %c0_238 = arith.constant 0 : index
    %c0_239 = arith.constant 0 : index
    %463 = vector.load %arg9[%c0_238, %c0_239] : memref<1x128xf32, #tpu.memory_space<vmem>>, vector<1x128xf32>
    %464 = arith.mulf %454, %463 : vector<1x128xf32>
    %465 = arith.mulf %448, %456 : vector<1x128xf32>
    %466 = arith.addf %464, %465 : vector<1x128xf32>
    %467 = math.tanh %466 : vector<1x128xf32>
    %468 = arith.mulf %462, %467 : vector<1x128xf32>
    %c0_240 = arith.constant 0 : index
    %c0_241 = arith.constant 0 : index
    %469 = vector.load %arg9[%c0_240, %c0_241] : memref<1x128xf32, #tpu.memory_space<vmem>>, vector<1x128xf32>
    tpu.vector_store %arg9[%c0_240, %c0_241], %466 {strides = array<i32>} : memref<1x128xf32, #tpu.memory_space<vmem>>, vector<1x128xf32>,
    %c0_242 = arith.constant 0 : index
    %c0_243 = arith.constant 0 : index
    %470 = vector.load %arg8[%c0_242, %c0_243] : memref<1x128xf32, #tpu.memory_space<vmem>>, vector<1x128xf32>
    tpu.vector_store %arg8[%c0_242, %c0_243], %468 {strides = array<i32>} : memref<1x128xf32, #tpu.memory_space<vmem>>, vector<1x128xf32>,
    %c4_i32_244 = arith.constant 4 : i32
    %471 = arith.index_cast %c4_i32_244 : i32 to index
    %c0_245 = arith.constant 0 : index
    %472 = vector.load %arg7[%471, %c0_245] : memref<8x512xf32, #tpu.memory_space<vmem>>, vector<1x512xf32>
    %c0_246 = arith.constant 0 : index
    %c0_247 = arith.constant 0 : index
    %473 = vector.load %arg8[%c0_246, %c0_247] : memref<1x128xf32, #tpu.memory_space<vmem>>, vector<1x128xf32>
    %c1_248 = arith.constant 1 : index
    %c0_249 = arith.constant 0 : index
    %c0_250 = arith.constant 0 : index
    %474 = vector.load %arg3[%c1_248, %c0_249, %c0_250] : memref<2x128x512xf32, #tpu.memory_space<vmem>>, vector<1x128x512xf32>
    %475 = vector.shape_cast %474 : vector<1x128x512xf32> to vector<128x512xf32>
    %cst_251 = arith.constant dense<0.000000e+00> : vector<1x512xf32>
    %476 = tpu.matmul %473, %475, %cst_251 {dimension_numbers = #tpu.dot_dimension_numbers<[1], [0], [0], [1], [0, 0, 1, 1], [], []>} : vector<1x128xf32>, vector<128x512xf32>, vector<1x512xf32> -> vector<1x512xf32>
    %477 = arith.addf %472, %476 : vector<1x512xf32>
    %478 = vector.extract_strided_slice %477 {offsets = [0, 0], sizes = [1, 128], strides = [1, 1]} : vector<1x512xf32> to vector<1x128xf32>
    %479 = arith.negf %478 : vector<1x128xf32>
    %480 = math.exp %479 : vector<1x128xf32>
    %cst_252 = arith.constant 1.000000e+00 : f32
    %481 = vector.broadcast %cst_252 : f32 to vector<1x128xf32>
    %482 = arith.addf %481, %480 : vector<1x128xf32>
    %483 = arith.divf %481, %482 : vector<1x128xf32>
    %484 = vector.extract_strided_slice %477 {offsets = [0, 128], sizes = [1, 128], strides = [1, 1]} : vector<1x512xf32> to vector<1x128xf32>
    %485 = arith.negf %484 : vector<1x128xf32>
    %486 = math.exp %485 : vector<1x128xf32>
    %cst_253 = arith.constant 1.000000e+00 : f32
    %487 = vector.broadcast %cst_253 : f32 to vector<1x128xf32>
    %488 = arith.addf %487, %486 : vector<1x128xf32>
    %489 = arith.divf %487, %488 : vector<1x128xf32>
    %490 = vector.extract_strided_slice %477 {offsets = [0, 256], sizes = [1, 128], strides = [1, 1]} : vector<1x512xf32> to vector<1x128xf32>
    %491 = math.tanh %490 : vector<1x128xf32>
    %492 = vector.extract_strided_slice %477 {offsets = [0, 384], sizes = [1, 128], strides = [1, 1]} : vector<1x512xf32> to vector<1x128xf32>
    %493 = arith.negf %492 : vector<1x128xf32>
    %494 = math.exp %493 : vector<1x128xf32>
    %cst_254 = arith.constant 1.000000e+00 : f32
    %495 = vector.broadcast %cst_254 : f32 to vector<1x128xf32>
    %496 = arith.addf %495, %494 : vector<1x128xf32>
    %497 = arith.divf %495, %496 : vector<1x128xf32>
    %c0_255 = arith.constant 0 : index
    %c0_256 = arith.constant 0 : index
    %498 = vector.load %arg9[%c0_255, %c0_256] : memref<1x128xf32, #tpu.memory_space<vmem>>, vector<1x128xf32>
    %499 = arith.mulf %489, %498 : vector<1x128xf32>
    %500 = arith.mulf %483, %491 : vector<1x128xf32>
    %501 = arith.addf %499, %500 : vector<1x128xf32>
    %502 = math.tanh %501 : vector<1x128xf32>
    %503 = arith.mulf %497, %502 : vector<1x128xf32>
    %c0_257 = arith.constant 0 : index
    %c0_258 = arith.constant 0 : index
    %504 = vector.load %arg9[%c0_257, %c0_258] : memref<1x128xf32, #tpu.memory_space<vmem>>, vector<1x128xf32>
    tpu.vector_store %arg9[%c0_257, %c0_258], %501 {strides = array<i32>} : memref<1x128xf32, #tpu.memory_space<vmem>>, vector<1x128xf32>,
    %c0_259 = arith.constant 0 : index
    %c0_260 = arith.constant 0 : index
    %505 = vector.load %arg8[%c0_259, %c0_260] : memref<1x128xf32, #tpu.memory_space<vmem>>, vector<1x128xf32>
    tpu.vector_store %arg8[%c0_259, %c0_260], %503 {strides = array<i32>} : memref<1x128xf32, #tpu.memory_space<vmem>>, vector<1x128xf32>,
    %c5_i32_261 = arith.constant 5 : i32
    %506 = arith.index_cast %c5_i32_261 : i32 to index
    %c0_262 = arith.constant 0 : index
    %507 = vector.load %arg7[%506, %c0_262] : memref<8x512xf32, #tpu.memory_space<vmem>>, vector<1x512xf32>
    %c0_263 = arith.constant 0 : index
    %c0_264 = arith.constant 0 : index
    %508 = vector.load %arg8[%c0_263, %c0_264] : memref<1x128xf32, #tpu.memory_space<vmem>>, vector<1x128xf32>
    %c1_265 = arith.constant 1 : index
    %c0_266 = arith.constant 0 : index
    %c0_267 = arith.constant 0 : index
    %509 = vector.load %arg3[%c1_265, %c0_266, %c0_267] : memref<2x128x512xf32, #tpu.memory_space<vmem>>, vector<1x128x512xf32>
    %510 = vector.shape_cast %509 : vector<1x128x512xf32> to vector<128x512xf32>
    %cst_268 = arith.constant dense<0.000000e+00> : vector<1x512xf32>
    %511 = tpu.matmul %508, %510, %cst_268 {dimension_numbers = #tpu.dot_dimension_numbers<[1], [0], [0], [1], [0, 0, 1, 1], [], []>} : vector<1x128xf32>, vector<128x512xf32>, vector<1x512xf32> -> vector<1x512xf32>
    %512 = arith.addf %507, %511 : vector<1x512xf32>
    %513 = vector.extract_strided_slice %512 {offsets = [0, 0], sizes = [1, 128], strides = [1, 1]} : vector<1x512xf32> to vector<1x128xf32>
    %514 = arith.negf %513 : vector<1x128xf32>
    %515 = math.exp %514 : vector<1x128xf32>
    %cst_269 = arith.constant 1.000000e+00 : f32
    %516 = vector.broadcast %cst_269 : f32 to vector<1x128xf32>
    %517 = arith.addf %516, %515 : vector<1x128xf32>
    %518 = arith.divf %516, %517 : vector<1x128xf32>
    %519 = vector.extract_strided_slice %512 {offsets = [0, 128], sizes = [1, 128], strides = [1, 1]} : vector<1x512xf32> to vector<1x128xf32>
    %520 = arith.negf %519 : vector<1x128xf32>
    %521 = math.exp %520 : vector<1x128xf32>
    %cst_270 = arith.constant 1.000000e+00 : f32
    %522 = vector.broadcast %cst_270 : f32 to vector<1x128xf32>
    %523 = arith.addf %522, %521 : vector<1x128xf32>
    %524 = arith.divf %522, %523 : vector<1x128xf32>
    %525 = vector.extract_strided_slice %512 {offsets = [0, 256], sizes = [1, 128], strides = [1, 1]} : vector<1x512xf32> to vector<1x128xf32>
    %526 = math.tanh %525 : vector<1x128xf32>
    %527 = vector.extract_strided_slice %512 {offsets = [0, 384], sizes = [1, 128], strides = [1, 1]} : vector<1x512xf32> to vector<1x128xf32>
    %528 = arith.negf %527 : vector<1x128xf32>
    %529 = math.exp %528 : vector<1x128xf32>
    %cst_271 = arith.constant 1.000000e+00 : f32
    %530 = vector.broadcast %cst_271 : f32 to vector<1x128xf32>
    %531 = arith.addf %530, %529 : vector<1x128xf32>
    %532 = arith.divf %530, %531 : vector<1x128xf32>
    %c0_272 = arith.constant 0 : index
    %c0_273 = arith.constant 0 : index
    %533 = vector.load %arg9[%c0_272, %c0_273] : memref<1x128xf32, #tpu.memory_space<vmem>>, vector<1x128xf32>
    %534 = arith.mulf %524, %533 : vector<1x128xf32>
    %535 = arith.mulf %518, %526 : vector<1x128xf32>
    %536 = arith.addf %534, %535 : vector<1x128xf32>
    %537 = math.tanh %536 : vector<1x128xf32>
    %538 = arith.mulf %532, %537 : vector<1x128xf32>
    %c0_274 = arith.constant 0 : index
    %c0_275 = arith.constant 0 : index
    %539 = vector.load %arg9[%c0_274, %c0_275] : memref<1x128xf32, #tpu.memory_space<vmem>>, vector<1x128xf32>
    tpu.vector_store %arg9[%c0_274, %c0_275], %536 {strides = array<i32>} : memref<1x128xf32, #tpu.memory_space<vmem>>, vector<1x128xf32>,
    %c0_276 = arith.constant 0 : index
    %c0_277 = arith.constant 0 : index
    %540 = vector.load %arg8[%c0_276, %c0_277] : memref<1x128xf32, #tpu.memory_space<vmem>>, vector<1x128xf32>
    tpu.vector_store %arg8[%c0_276, %c0_277], %538 {strides = array<i32>} : memref<1x128xf32, #tpu.memory_space<vmem>>, vector<1x128xf32>,
    %c6_i32_278 = arith.constant 6 : i32
    %541 = arith.index_cast %c6_i32_278 : i32 to index
    %c0_279 = arith.constant 0 : index
    %542 = vector.load %arg7[%541, %c0_279] : memref<8x512xf32, #tpu.memory_space<vmem>>, vector<1x512xf32>
    %c0_280 = arith.constant 0 : index
    %c0_281 = arith.constant 0 : index
    %543 = vector.load %arg8[%c0_280, %c0_281] : memref<1x128xf32, #tpu.memory_space<vmem>>, vector<1x128xf32>
    %c1_282 = arith.constant 1 : index
    %c0_283 = arith.constant 0 : index
    %c0_284 = arith.constant 0 : index
    %544 = vector.load %arg3[%c1_282, %c0_283, %c0_284] : memref<2x128x512xf32, #tpu.memory_space<vmem>>, vector<1x128x512xf32>
    %545 = vector.shape_cast %544 : vector<1x128x512xf32> to vector<128x512xf32>
    %cst_285 = arith.constant dense<0.000000e+00> : vector<1x512xf32>
    %546 = tpu.matmul %543, %545, %cst_285 {dimension_numbers = #tpu.dot_dimension_numbers<[1], [0], [0], [1], [0, 0, 1, 1], [], []>} : vector<1x128xf32>, vector<128x512xf32>, vector<1x512xf32> -> vector<1x512xf32>
    %547 = arith.addf %542, %546 : vector<1x512xf32>
    %548 = vector.extract_strided_slice %547 {offsets = [0, 0], sizes = [1, 128], strides = [1, 1]} : vector<1x512xf32> to vector<1x128xf32>
    %549 = arith.negf %548 : vector<1x128xf32>
    %550 = math.exp %549 : vector<1x128xf32>
    %cst_286 = arith.constant 1.000000e+00 : f32
    %551 = vector.broadcast %cst_286 : f32 to vector<1x128xf32>
    %552 = arith.addf %551, %550 : vector<1x128xf32>
    %553 = arith.divf %551, %552 : vector<1x128xf32>
    %554 = vector.extract_strided_slice %547 {offsets = [0, 128], sizes = [1, 128], strides = [1, 1]} : vector<1x512xf32> to vector<1x128xf32>
    %555 = arith.negf %554 : vector<1x128xf32>
    %556 = math.exp %555 : vector<1x128xf32>
    %cst_287 = arith.constant 1.000000e+00 : f32
    %557 = vector.broadcast %cst_287 : f32 to vector<1x128xf32>
    %558 = arith.addf %557, %556 : vector<1x128xf32>
    %559 = arith.divf %557, %558 : vector<1x128xf32>
    %560 = vector.extract_strided_slice %547 {offsets = [0, 256], sizes = [1, 128], strides = [1, 1]} : vector<1x512xf32> to vector<1x128xf32>
    %561 = math.tanh %560 : vector<1x128xf32>
    %562 = vector.extract_strided_slice %547 {offsets = [0, 384], sizes = [1, 128], strides = [1, 1]} : vector<1x512xf32> to vector<1x128xf32>
    %563 = arith.negf %562 : vector<1x128xf32>
    %564 = math.exp %563 : vector<1x128xf32>
    %cst_288 = arith.constant 1.000000e+00 : f32
    %565 = vector.broadcast %cst_288 : f32 to vector<1x128xf32>
    %566 = arith.addf %565, %564 : vector<1x128xf32>
    %567 = arith.divf %565, %566 : vector<1x128xf32>
    %c0_289 = arith.constant 0 : index
    %c0_290 = arith.constant 0 : index
    %568 = vector.load %arg9[%c0_289, %c0_290] : memref<1x128xf32, #tpu.memory_space<vmem>>, vector<1x128xf32>
    %569 = arith.mulf %559, %568 : vector<1x128xf32>
    %570 = arith.mulf %553, %561 : vector<1x128xf32>
    %571 = arith.addf %569, %570 : vector<1x128xf32>
    %572 = math.tanh %571 : vector<1x128xf32>
    %573 = arith.mulf %567, %572 : vector<1x128xf32>
    %c0_291 = arith.constant 0 : index
    %c0_292 = arith.constant 0 : index
    %574 = vector.load %arg9[%c0_291, %c0_292] : memref<1x128xf32, #tpu.memory_space<vmem>>, vector<1x128xf32>
    tpu.vector_store %arg9[%c0_291, %c0_292], %571 {strides = array<i32>} : memref<1x128xf32, #tpu.memory_space<vmem>>, vector<1x128xf32>,
    %c0_293 = arith.constant 0 : index
    %c0_294 = arith.constant 0 : index
    %575 = vector.load %arg8[%c0_293, %c0_294] : memref<1x128xf32, #tpu.memory_space<vmem>>, vector<1x128xf32>
    tpu.vector_store %arg8[%c0_293, %c0_294], %573 {strides = array<i32>} : memref<1x128xf32, #tpu.memory_space<vmem>>, vector<1x128xf32>,
    %c7_i32_295 = arith.constant 7 : i32
    %576 = arith.index_cast %c7_i32_295 : i32 to index
    %c0_296 = arith.constant 0 : index
    %577 = vector.load %arg7[%576, %c0_296] : memref<8x512xf32, #tpu.memory_space<vmem>>, vector<1x512xf32>
    %c0_297 = arith.constant 0 : index
    %c0_298 = arith.constant 0 : index
    %578 = vector.load %arg8[%c0_297, %c0_298] : memref<1x128xf32, #tpu.memory_space<vmem>>, vector<1x128xf32>
    %c1_299 = arith.constant 1 : index
    %c0_300 = arith.constant 0 : index
    %c0_301 = arith.constant 0 : index
    %579 = vector.load %arg3[%c1_299, %c0_300, %c0_301] : memref<2x128x512xf32, #tpu.memory_space<vmem>>, vector<1x128x512xf32>
    %580 = vector.shape_cast %579 : vector<1x128x512xf32> to vector<128x512xf32>
    %cst_302 = arith.constant dense<0.000000e+00> : vector<1x512xf32>
    %581 = tpu.matmul %578, %580, %cst_302 {dimension_numbers = #tpu.dot_dimension_numbers<[1], [0], [0], [1], [0, 0, 1, 1], [], []>} : vector<1x128xf32>, vector<128x512xf32>, vector<1x512xf32> -> vector<1x512xf32>
    %582 = arith.addf %577, %581 : vector<1x512xf32>
    %583 = vector.extract_strided_slice %582 {offsets = [0, 0], sizes = [1, 128], strides = [1, 1]} : vector<1x512xf32> to vector<1x128xf32>
    %584 = arith.negf %583 : vector<1x128xf32>
    %585 = math.exp %584 : vector<1x128xf32>
    %cst_303 = arith.constant 1.000000e+00 : f32
    %586 = vector.broadcast %cst_303 : f32 to vector<1x128xf32>
    %587 = arith.addf %586, %585 : vector<1x128xf32>
    %588 = arith.divf %586, %587 : vector<1x128xf32>
    %589 = vector.extract_strided_slice %582 {offsets = [0, 128], sizes = [1, 128], strides = [1, 1]} : vector<1x512xf32> to vector<1x128xf32>
    %590 = arith.negf %589 : vector<1x128xf32>
    %591 = math.exp %590 : vector<1x128xf32>
    %cst_304 = arith.constant 1.000000e+00 : f32
    %592 = vector.broadcast %cst_304 : f32 to vector<1x128xf32>
    %593 = arith.addf %592, %591 : vector<1x128xf32>
    %594 = arith.divf %592, %593 : vector<1x128xf32>
    %595 = vector.extract_strided_slice %582 {offsets = [0, 256], sizes = [1, 128], strides = [1, 1]} : vector<1x512xf32> to vector<1x128xf32>
    %596 = math.tanh %595 : vector<1x128xf32>
    %597 = vector.extract_strided_slice %582 {offsets = [0, 384], sizes = [1, 128], strides = [1, 1]} : vector<1x512xf32> to vector<1x128xf32>
    %598 = arith.negf %597 : vector<1x128xf32>
    %599 = math.exp %598 : vector<1x128xf32>
    %cst_305 = arith.constant 1.000000e+00 : f32
    %600 = vector.broadcast %cst_305 : f32 to vector<1x128xf32>
    %601 = arith.addf %600, %599 : vector<1x128xf32>
    %602 = arith.divf %600, %601 : vector<1x128xf32>
    %c0_306 = arith.constant 0 : index
    %c0_307 = arith.constant 0 : index
    %603 = vector.load %arg9[%c0_306, %c0_307] : memref<1x128xf32, #tpu.memory_space<vmem>>, vector<1x128xf32>
    %604 = arith.mulf %594, %603 : vector<1x128xf32>
    %605 = arith.mulf %588, %596 : vector<1x128xf32>
    %606 = arith.addf %604, %605 : vector<1x128xf32>
    %607 = math.tanh %606 : vector<1x128xf32>
    %608 = arith.mulf %602, %607 : vector<1x128xf32>
    %c0_308 = arith.constant 0 : index
    %c0_309 = arith.constant 0 : index
    %609 = vector.load %arg9[%c0_308, %c0_309] : memref<1x128xf32, #tpu.memory_space<vmem>>, vector<1x128xf32>
    tpu.vector_store %arg9[%c0_308, %c0_309], %606 {strides = array<i32>} : memref<1x128xf32, #tpu.memory_space<vmem>>, vector<1x128xf32>,
    %c0_310 = arith.constant 0 : index
    %c0_311 = arith.constant 0 : index
    %610 = vector.load %arg8[%c0_310, %c0_311] : memref<1x128xf32, #tpu.memory_space<vmem>>, vector<1x128xf32>
    tpu.vector_store %arg8[%c0_310, %c0_311], %608 {strides = array<i32>} : memref<1x128xf32, #tpu.memory_space<vmem>>, vector<1x128xf32>,
    %c8_i32_312 = arith.constant 8 : i32
    %c0_313 = arith.constant 0 : index
    %c0_314 = arith.constant 0 : index
    %611 = vector.load %arg8[%c0_313, %c0_314] : memref<1x128xf32, #tpu.memory_space<vmem>>, vector<1x128xf32>
    %612 = math.tanh %611 : vector<1x128xf32>
    %c0_315 = arith.constant 0 : index
    %c0_316 = arith.constant 0 : index
    %613 = vector.load %arg5[%c0_315, %c0_316] : memref<1x128xf32, #tpu.memory_space<vmem>>, vector<1x128xf32>
    tpu.vector_store %arg5[%c0_315, %c0_316], %612 {strides = array<i32>} : memref<1x128xf32, #tpu.memory_space<vmem>>, vector<1x128xf32>,
    return
  }
  func.func @transform_0(%arg0: i32) -> (i32, i32) {
    %c0_i32 = arith.constant 0 : i32
    %c0_i32_0 = arith.constant 0 : i32
    %c0_i32_1 = arith.constant 0 : i32
    return %c0_i32, %c0_i32_0 : i32, i32
  }
  func.func @transform_1(%arg0: i32) -> (i32, i32, i32) {
    %c0_i32 = arith.constant 0 : i32
    %c0_i32_0 = arith.constant 0 : i32
    %c0_i32_1 = arith.constant 0 : i32
    %c0_i32_2 = arith.constant 0 : i32
    return %c0_i32, %c0_i32_0, %c0_i32_1 : i32, i32, i32
  }
  func.func @transform_2(%arg0: i32) -> (i32, i32, i32) {
    %c0_i32 = arith.constant 0 : i32
    %c0_i32_0 = arith.constant 0 : i32
    %c0_i32_1 = arith.constant 0 : i32
    %c0_i32_2 = arith.constant 0 : i32
    return %c0_i32, %c0_i32_0, %c0_i32_1 : i32, i32, i32
  }
  func.func @transform_3(%arg0: i32) -> (i32, i32, i32) {
    %c0_i32 = arith.constant 0 : i32
    %c0_i32_0 = arith.constant 0 : i32
    %c0_i32_1 = arith.constant 0 : i32
    %c0_i32_2 = arith.constant 0 : i32
    return %c0_i32, %c0_i32_0, %c0_i32_1 : i32, i32, i32
  }
  func.func @transform_4(%arg0: i32) -> (i32, i32) {
    %c0_i32 = arith.constant 0 : i32
    %c0_i32_0 = arith.constant 0 : i32
    %c0_i32_1 = arith.constant 0 : i32
    return %c0_i32, %c0_i32_0 : i32, i32
  }
}

</mosaic_0001>

<bundles_post_ra>
// kernel: tpu_custom_call.1
= control target key start
LH: loop header
LB: loop body
LE: loop exit
PB: predicated region body
PF: predicated region fallthrough
CT: control target
= control target key end

     0   :  { %9 = vsyncpa [#allocation7], 0  ;;  %s6943_s0 = inlined_call_operand.hbm [shape: f32[8,128], index: 0, kind: input, shape index: {}]   ;;  %s6944_s1 = inlined_call_operand.hbm [shape: f32[2,128,512], index: 1, kind: input, shape index: {}]   ;;  %s6945_s2 = inlined_call_operand.hbm [shape: f32[2,128,512], index: 2, kind: input, shape index: {}]   ;;  %s6946_s3 = inlined_call_operand.hbm [shape: f32[2,1,512], index: 3, kind: input, shape index: {}]   ;;  %s6947_s4 = inlined_call_operand.hbm [shape: f32[1,128], index: 4, kind: output, shape index: {}]  }
   0x1   :  { %10 = vsyncpa [#allocation10], 0 }
   0x2   :  { %11 = vsyncpa [#allocation13], 0 }
   0x3   :  { %12 = vsyncpa [#allocation8], 0  ;;  %s5371_s15 = smov [#allocation9]  }
   0x4   :  { %s28_s16 = sshll.u32 %s5371_s15, 4  ;;  %s29_s16 = int_to_ptr.vmem [resolvable:$true] %s28_s16 }
   0x5   :  { %s5271_s17 = scalar_lea.vmem %s29_s16, 16384  ;;  %p5276_p1 = scmp.lt.s32.totalorder %s29_s16, %s29_s16 }
   0x6   :  { %p5272_p0 = scmp.ne.s32.totalorder %s29_s16, %s5271_s17  ;;  %p5277_p2 = scmp.lt.s32.totalorder %s5271_s17, %s5271_s17 }
   0x8   :  { %p5278_p3 = por %p5277_p2, %p5276_p1 }
   0xa   :  { %p5279_p4 = pnand %p5278_p3, %p5272_p0 }
   0xc   :  { %5282 = shalt.err (!%p5279_p4)
}
   0xd   :  { %s5372_s18 = smov 512   ;;  %s5373_s19 = smov 32  }
   0xe   :  { %34 = dma.hbm_to_vmem [thread:$0]  %s6944_s1, 16384, %s29_s16, [#allocation10], %s5372_s18, %s5372_s18, %s5373_s19  }
   0xf   :  { %s5374_s22 = smov [#allocation6]   ;;  %s5375_s24 = smov [#allocation11]  }
  0x10   :  { %s19_s23 = sshll.u32 %s5374_s22, 4  ;;  %s40_s25 = sshll.u32 %s5375_s24, 4  ;;  %s20_s23 = int_to_ptr.vmem [resolvable:$true] %s19_s23  ;;  %s41_s25 = int_to_ptr.vmem [resolvable:$true] %s40_s25 }
  0x11   :  { %s5291_s26 = scalar_lea.vmem %s20_s23, 128  ;;  %p5296_p6 = scmp.lt.s32.totalorder %s20_s23, %s20_s23 }
  0x12   :  { %p5292_p5 = scmp.ne.s32.totalorder %s20_s23, %s5291_s26  ;;  %p5297_p7 = scmp.lt.s32.totalorder %s5291_s26, %s5291_s26 }
  0x14   :  { %p5298_p8 = por %p5297_p7, %p5296_p6 }
  0x16   :  { %p5299_p9 = pnand %p5298_p8, %p5292_p5 }
  0x18   :  { %5302 = shalt.err (!%p5299_p9)
}
  0x19   :  { %22 = dma.hbm_to_vmem [thread:$0]  %s6943_s0, 128, %s20_s23, [#allocation7]  }
  0x1a   :  { %s5311_s29 = scalar_lea.vmem %s41_s25, 16384  ;;  %p5316_p11 = scmp.lt.s32.totalorder %s41_s25, %s41_s25 }
  0x1b   :  { %p5312_p10 = scmp.ne.s32.totalorder %s41_s25, %s5311_s29  ;;  %p5317_p12 = scmp.lt.s32.totalorder %s5311_s29, %s5311_s29 }
  0x1d   :  { %p5318_p13 = por %p5317_p12, %p5316_p11 }
  0x1f   :  { %p5319_p0 = pnand %p5318_p13, %p5312_p10 }
  0x21   :  { %5322 = shalt.err (!%p5319_p0)
}
  0x22   :  { %46 = dma.hbm_to_vmem [thread:$0]  %s6945_s2, 16384, %s41_s25, [#allocation10], %s5372_s18, %s5372_s18, %s5373_s19  }
  0x23   :  { %s5376_s5 = smov [#allocation12]  }
  0x24   :  { %s52_s6 = sshll.u32 %s5376_s5, 4  ;;  %s53_s6 = int_to_ptr.vmem [resolvable:$true] %s52_s6 }
  0x25   :  { %s5331_s7 = scalar_lea.vmem %s53_s6, 128  ;;  %p5336_p2 = scmp.lt.s32.totalorder %s53_s6, %s53_s6 }
  0x26   :  { %p5332_p1 = scmp.ne.s32.totalorder %s53_s6, %s5331_s7  ;;  %p5337_p3 = scmp.lt.s32.totalorder %s5331_s7, %s5331_s7 }
  0x28   :  { %p5338_p4 = por %p5337_p3, %p5336_p2 }
  0x2a   :  { %p5339_p5 = pnand %p5338_p4, %p5332_p1 }
  0x2c   :  { %5342 = shalt.err (!%p5339_p5)
}
  0x2d   :  { %s5377_s0 = smov 64   ;;  %s5378_s8 = smov 4  }
  0x2e   :  { %58 = dma.hbm_to_vmem [thread:$0]  %s6946_s3, 128, %s53_s6, [#allocation13], %s5377_s0, %s5377_s0, %s5378_s8  }
  0x2f   :  { %5363 = dma.done.wait [#allocation7], 128  }
  0x30   :  { %5364 = vsyncadd [#allocation7], 4294967168 }
  0x31   :  { %5365 = dma.done.wait [#allocation10], 32768  }
  0x32   :  { %5366 = vsyncadd [#allocation10], 4294934528 }
  0x33   :  { %5367 = dma.done.wait [#allocation13], 128  }
  0x34   :  { %5368 = vsyncadd [#allocation13], 4294967168  ;;  %v6948_v0 = vmov 0.0   ;;  %v135_v1 = vld [vmem:[#allocation9 + $0x1e8] sm:$0xff]  ;;  %v137_v2 = vld [vmem:[#allocation9 + $0x1f8] sm:$0xff]  ;;  %s5381_s2 = smov [#allocation14]  }
  0x35   :  { %224 = vmatprep.mubr.f32.mxu0 %v6948_v0  ;;  %306 = vst [vmem:[#allocation4] sm:$0x1] %v6948_v0  ;;  %307 = vst [vmem:[#allocation5] sm:$0x1] %v6948_v0  ;;  %295 = vmatprep.mubr.f32.mxu1 %v6948_v0  ;;  %v134_v3 = vld [vmem:[#allocation9 + $0x1e0] sm:$0xff]  ;;  %v136_v4 = vld [vmem:[#allocation9 + $0x1f0] sm:$0xff] }
  0x36   :  { %160 = vmatprep.subr.mxu0 %v135_v1  ;;  %231 = vmatprep.subr.mxu1 %v137_v2  ;;  %v131_v5 = vld [vmem:[#allocation9 + $0x1c8] sm:$0xff]  ;;  %v133_v6 = vld [vmem:[#allocation9 + $0x1d8] sm:$0xff]  ;;  %v130_v7 = vld [vmem:[#allocation9 + $0x1c0] sm:$0xff]  ;;  %s4930_s3 = sshll.u32 %s5381_s2, 4  ;;  %s4931_s3 = int_to_ptr.vmem [resolvable:$true] %s4930_s3 }
  0x37   :  { %161 = vmatpush1.msra.mxu0 %v134_v3  ;;  %232 = vmatpush1.msra.mxu1 %v136_v4  ;;  %v132_v8 = vld [vmem:[#allocation9 + $0x1d0] sm:$0xff]  ;;  %v127_v9 = vld [vmem:[#allocation9 + $0x1a8] sm:$0xff]  ;;  %v129_v10 = vld [vmem:[#allocation9 + $0x1b8] sm:$0xff]  ;;  %s5343_s11 = scalar_lea.vmem %s4931_s3, 16  ;;  %s5347_s12 = scalar_lea.vmem %s4931_s3, 32 }
  0x38   :  { %162 = vmatprep.subr.mxu0 %v131_v5  ;;  %233 = vmatprep.subr.mxu1 %v133_v6  ;;  %v126_v11 = vld [vmem:[#allocation9 + $0x1a0] sm:$0xff]  ;;  %v128_v12 = vld [vmem:[#allocation9 + $0x1b0] sm:$0xff]  ;;  %v123_v13 = vld [vmem:[#allocation9 + $0x188] sm:$0xff]  ;;  %p5344_p6 = scmp.ne.s32.totalorder %s4931_s3, %s5343_s11  ;;  %p5348_p7 = scmp.lt.s32.totalorder %s4931_s3, %s4931_s3 }
  0x39   :  { %163 = vmatpush1.msra.mxu0 %v130_v7  ;;  %234 = vmatpush1.msra.mxu1 %v132_v8  ;;  %v125_v14 = vld [vmem:[#allocation9 + $0x198] sm:$0xff]  ;;  %v122_v15 = vld [vmem:[#allocation9 + $0x180] sm:$0xff]  ;;  %v124_v16 = vld [vmem:[#allocation9 + $0x190] sm:$0xff]  ;;  %p5349_p8 = scmp.lt.s32.totalorder %s5347_s12, %s5343_s11 }
  0x3a   :  { %164 = vmatprep.subr.mxu0 %v127_v9  ;;  %235 = vmatprep.subr.mxu1 %v129_v10  ;;  %v119_v17 = vld [vmem:[#allocation9 + $0x168] sm:$0xff]  ;;  %v121_v18 = vld [vmem:[#allocation9 + $0x178] sm:$0xff]  ;;  %v118_v19 = vld [vmem:[#allocation9 + $0x160] sm:$0xff] }
  0x3b   :  { %165 = vmatpush1.msra.mxu0 %v126_v11  ;;  %236 = vmatpush1.msra.mxu1 %v128_v12  ;;  %v120_v20 = vld [vmem:[#allocation9 + $0x170] sm:$0xff]  ;;  %v115_v21 = vld [vmem:[#allocation9 + $0x148] sm:$0xff]  ;;  %v117_v22 = vld [vmem:[#allocation9 + $0x158] sm:$0xff]  ;;  %p5350_p9 = por %p5349_p8, %p5348_p7 }
  0x3c   :  { %166 = vmatprep.subr.mxu0 %v123_v13  ;;  %237 = vmatprep.subr.mxu1 %v125_v14  ;;  %v114_v23 = vld [vmem:[#allocation9 + $0x140] sm:$0xff]  ;;  %v116_v24 = vld [vmem:[#allocation9 + $0x150] sm:$0xff]  ;;  %v111_v25 = vld [vmem:[#allocation9 + $0x128] sm:$0xff] }
  0x3d   :  { %167 = vmatpush1.msra.mxu0 %v122_v15  ;;  %238 = vmatpush1.msra.mxu1 %v124_v16  ;;  %v113_v26 = vld [vmem:[#allocation9 + $0x138] sm:$0xff]  ;;  %v110_v27 = vld [vmem:[#allocation9 + $0x120] sm:$0xff]  ;;  %v112_v28 = vld [vmem:[#allocation9 + $0x130] sm:$0xff]  ;;  %p5351_p10 = pnand %p5350_p9, %p5344_p6 }
  0x3e   :  { %168 = vmatprep.subr.mxu0 %v119_v17  ;;  %239 = vmatprep.subr.mxu1 %v121_v18  ;;  %v107_v29 = vld [vmem:[#allocation9 + $0x108] sm:$0xff]  ;;  %v109_v30 = vld [vmem:[#allocation9 + $0x118] sm:$0xff]  ;;  %v106_v31 = vld [vmem:[#allocation9 + $0x100] sm:$0xff] }
  0x3f   :  { %169 = vmatpush1.msra.mxu0 %v118_v19  ;;  %240 = vmatpush1.msra.mxu1 %v120_v20  ;;  %v108_v32 = vld [vmem:[#allocation9 + $0x110] sm:$0xff]  ;;  %v103_v33 = vld [vmem:[#allocation9 + $0xe8] sm:$0xff]  ;;  %v105_v34 = vld [vmem:[#allocation9 + $0xf8] sm:$0xff] }
  0x40   :  { %170 = vmatprep.subr.mxu0 %v115_v21  ;;  %241 = vmatprep.subr.mxu1 %v117_v22  ;;  %v102_v35 = vld [vmem:[#allocation9 + $0xe0] sm:$0xff]  ;;  %v104_v36 = vld [vmem:[#allocation9 + $0xf0] sm:$0xff]  ;;  %v99_v37 = vld [vmem:[#allocation9 + $0xc8] sm:$0xff] }
  0x41   :  { %171 = vmatpush1.msra.mxu0 %v114_v23  ;;  %242 = vmatpush1.msra.mxu1 %v116_v24  ;;  %v101_v38 = vld [vmem:[#allocation9 + $0xd8] sm:$0xff]  ;;  %v98_v39 = vld [vmem:[#allocation9 + $0xc0] sm:$0xff]  ;;  %v100_v40 = vld [vmem:[#allocation9 + $0xd0] sm:$0xff] }
  0x42   :  { %172 = vmatprep.subr.mxu0 %v111_v25  ;;  %243 = vmatprep.subr.mxu1 %v113_v26  ;;  %v95_v41 = vld [vmem:[#allocation9 + $0xa8] sm:$0xff]  ;;  %v97_v42 = vld [vmem:[#allocation9 + $0xb8] sm:$0xff]  ;;  %v94_v43 = vld [vmem:[#allocation9 + $0xa0] sm:$0xff] }
  0x43   :  { %173 = vmatpush1.msra.mxu0 %v110_v27  ;;  %244 = vmatpush1.msra.mxu1 %v112_v28  ;;  %v96_v44 = vld [vmem:[#allocation9 + $0xb0] sm:$0xff]  ;;  %v91_v45 = vld [vmem:[#allocation9 + $0x88] sm:$0xff]  ;;  %v93_v46 = vld [vmem:[#allocation9 + $0x98] sm:$0xff] }
  0x44   :  { %174 = vmatprep.subr.mxu0 %v107_v29  ;;  %245 = vmatprep.subr.mxu1 %v109_v30  ;;  %v90_v47 = vld [vmem:[#allocation9 + $0x80] sm:$0xff]  ;;  %v92_v48 = vld [vmem:[#allocation9 + $0x90] sm:$0xff]  ;;  %v71_v49 = vld [vmem:[#allocation6] sm:$0xff] }
  0x45   :  { %175 = vmatpush1.msra.mxu0 %v106_v31  ;;  %246 = vmatpush1.msra.mxu1 %v108_v32  ;;  %v87_v50 = vld [vmem:[#allocation9 + $0x68] sm:$0xff]  ;;  %v89_v51 = vld [vmem:[#allocation9 + $0x78] sm:$0xff]  ;;  %72 = vst [vmem:[#allocation2] sm:$0xff] %v71_v49  ;;  %v86_v52 = vld [vmem:[#allocation9 + $0x60] sm:$0xff] }
  0x46   :  { %176 = vmatprep.subr.mxu0 %v103_v33  ;;  %247 = vmatprep.subr.mxu1 %v105_v34  ;;  %v88_v53 = vld [vmem:[#allocation9 + $0x70] sm:$0xff]  ;;  %v83_v54 = vld [vmem:[#allocation9 + $0x48] sm:$0xff]  ;;  %v85_v55 = vld [vmem:[#allocation9 + $0x58] sm:$0xff] }
  0x47   :  { %177 = vmatpush1.msra.mxu0 %v102_v35  ;;  %248 = vmatpush1.msra.mxu1 %v104_v36  ;;  %v82_v56 = vld [vmem:[#allocation9 + $0x40] sm:$0xff]  ;;  %v84_v57 = vld [vmem:[#allocation9 + $0x50] sm:$0xff]  ;;  %v79_v58 = vld [vmem:[#allocation9 + $0x28] sm:$0xff] }
  0x48   :  { %178 = vmatprep.subr.mxu0 %v99_v37  ;;  %249 = vmatprep.subr.mxu1 %v101_v38  ;;  %v81_v59 = vld [vmem:[#allocation9 + $0x38] sm:$0xff]  ;;  %v78_v60 = vld [vmem:[#allocation9 + $0x20] sm:$0xff]  ;;  %v80_v61 = vld [vmem:[#allocation9 + $0x30] sm:$0xff] }
  0x49   :  { %179 = vmatpush1.msra.mxu0 %v98_v39  ;;  %250 = vmatpush1.msra.mxu1 %v100_v40  ;;  %v75_v62 = vld [vmem:[#allocation9 + $0x8] sm:$0xff]  ;;  %v77_v63 = vld [vmem:[#allocation9 + $0x18] sm:$0xff]  ;;  %v74_v1 = vld [vmem:[#allocation9] sm:$0xff] }
  0x4a   :  { %180 = vmatprep.subr.mxu0 %v95_v41  ;;  %251 = vmatprep.subr.mxu1 %v97_v42  ;;  %v76_v2 = vld [vmem:[#allocation9 + $0x10] sm:$0xff]  ;;  %v5423_v3 = vld [vmem:[#allocation11 + $0x1e8] sm:$0xff]  ;;  %v5425_v4 = vld [vmem:[#allocation11 + $0x1f8] sm:$0xff] }
  0x4b   :  { %181 = vmatpush1.msra.mxu0 %v94_v43  ;;  %252 = vmatpush1.msra.mxu1 %v96_v44  ;;  %v5427_v5 = vld [vmem:[#allocation11 + $0x1e0] sm:$0xff]  ;;  %v5429_v6 = vld [vmem:[#allocation11 + $0x1f0] sm:$0xff]  ;;  %v5431_v7 = vld [vmem:[#allocation11 + $0x1c8] sm:$0xff] }
  0x4c   :  { %182 = vmatprep.subr.mxu0 %v91_v45  ;;  %253 = vmatprep.subr.mxu1 %v93_v46  ;;  %v5433_v8 = vld [vmem:[#allocation11 + $0x1d8] sm:$0xff]  ;;  %v5437_v9 = vld [vmem:[#allocation11 + $0x1c0] sm:$0xff]  ;;  %v5439_v10 = vld [vmem:[#allocation11 + $0x1d0] sm:$0xff] }
  0x4d   :  { %183 = vmatpush1.msra.mxu0 %v90_v47  ;;  %254 = vmatpush1.msra.mxu1 %v92_v48  ;;  %v5443_v11 = vld [vmem:[#allocation11 + $0x1a8] sm:$0xff]  ;;  %v5445_v12 = vld [vmem:[#allocation11 + $0x1b8] sm:$0xff]  ;;  %v5449_v13 = vld [vmem:[#allocation11 + $0x1a0] sm:$0xff] }
  0x4e   :  { %184 = vmatprep.subr.mxu0 %v87_v50  ;;  %255 = vmatprep.subr.mxu1 %v89_v51  ;;  %v5451_v14 = vld [vmem:[#allocation11 + $0x1b0] sm:$0xff]  ;;  %v5455_v15 = vld [vmem:[#allocation11 + $0x188] sm:$0xff]  ;;  %v5457_v16 = vld [vmem:[#allocation11 + $0x198] sm:$0xff] }
  0x4f   :  { %185 = vmatpush1.msra.mxu0 %v86_v52  ;;  %256 = vmatpush1.msra.mxu1 %v88_v53  ;;  %v5461_v17 = vld [vmem:[#allocation11 + $0x180] sm:$0xff]  ;;  %v5463_v18 = vld [vmem:[#allocation11 + $0x190] sm:$0xff]  ;;  %v5467_v19 = vld [vmem:[#allocation11 + $0x168] sm:$0xff] }
  0x50   :  { %186 = vmatprep.subr.mxu0 %v83_v54  ;;  %257 = vmatprep.subr.mxu1 %v85_v55  ;;  %v5469_v20 = vld [vmem:[#allocation11 + $0x178] sm:$0xff]  ;;  %v5473_v21 = vld [vmem:[#allocation11 + $0x160] sm:$0xff]  ;;  %v5475_v22 = vld [vmem:[#allocation11 + $0x170] sm:$0xff] }
  0x51   :  { %187 = vmatpush1.msra.mxu0 %v82_v56  ;;  %258 = vmatpush1.msra.mxu1 %v84_v57  ;;  %v5479_v23 = vld [vmem:[#allocation11 + $0x148] sm:$0xff]  ;;  %v5481_v24 = vld [vmem:[#allocation11 + $0x158] sm:$0xff]  ;;  %v5485_v25 = vld [vmem:[#allocation11 + $0x140] sm:$0xff] }
  0x52   :  { %188 = vmatprep.subr.mxu0 %v79_v58  ;;  %259 = vmatprep.subr.mxu1 %v81_v59  ;;  %v5487_v26 = vld [vmem:[#allocation11 + $0x150] sm:$0xff]  ;;  %v5491_v27 = vld [vmem:[#allocation11 + $0x128] sm:$0xff]  ;;  %v5493_v28 = vld [vmem:[#allocation11 + $0x138] sm:$0xff] }
  0x53   :  { %189 = vmatpush1.msra.mxu0 %v78_v60  ;;  %260 = vmatpush1.msra.mxu1 %v80_v61  ;;  %v5497_v29 = vld [vmem:[#allocation11 + $0x120] sm:$0xff]  ;;  %v5499_v30 = vld [vmem:[#allocation11 + $0x130] sm:$0xff]  ;;  %v5503_v31 = vld [vmem:[#allocation11 + $0x108] sm:$0xff] }
  0x54   :  { %190 = vmatprep.subr.mxu0 %v75_v62  ;;  %261 = vmatprep.subr.mxu1 %v77_v63  ;;  %v5505_v32 = vld [vmem:[#allocation11 + $0x118] sm:$0xff]  ;;  %v5509_v33 = vld [vmem:[#allocation11 + $0x100] sm:$0xff]  ;;  %v5511_v34 = vld [vmem:[#allocation11 + $0x110] sm:$0xff] }
  0x55   :  { %191 = vmatpush1.msra.mxu0 %v74_v1  ;;  %262 = vmatpush1.msra.mxu1 %v76_v2  ;;  %v5515_v35 = vld [vmem:[#allocation11 + $0xe8] sm:$0xff]  ;;  %v5517_v36 = vld [vmem:[#allocation11 + $0xf8] sm:$0xff]  ;;  %v5521_v37 = vld [vmem:[#allocation11 + $0xe0] sm:$0xff] }
  0x56   :  { %225 = vmatmul.mubr.f32.vlgmr.msra.gmra.mxu0 %v71_v49  ;;  %296 = vmatmul.mubr.f32.vlgmr.msra.gmra.mxu1 %v71_v49  ;;  %v5523_v38 = vld [vmem:[#allocation11 + $0xf0] sm:$0xff]  ;;  %v5527_v39 = vld [vmem:[#allocation11 + $0xc8] sm:$0xff]  ;;  %v5529_v40 = vld [vmem:[#allocation11 + $0xd8] sm:$0xff] }
  0x57   :  { %374 = vmatprep.subr.mxu0 %v5423_v3  ;;  %445 = vmatprep.subr.mxu1 %v5425_v4  ;;  %v5533_v41 = vld [vmem:[#allocation11 + $0xc0] sm:$0xff]  ;;  %v5535_v42 = vld [vmem:[#allocation11 + $0xd0] sm:$0xff]  ;;  %v5539_v43 = vld [vmem:[#allocation11 + $0xa8] sm:$0xff] }
  0x58   :  { %375 = vmatpush1.msra.mxu0 %v5427_v5  ;;  %446 = vmatpush1.msra.mxu1 %v5429_v6  ;;  %v5541_v44 = vld [vmem:[#allocation11 + $0xb8] sm:$0xff]  ;;  %v5545_v45 = vld [vmem:[#allocation11 + $0xa0] sm:$0xff]  ;;  %v5547_v46 = vld [vmem:[#allocation11 + $0xb0] sm:$0xff] }
  0x59   :  { %376 = vmatprep.subr.mxu0 %v5431_v7  ;;  %447 = vmatprep.subr.mxu1 %v5433_v8  ;;  %v5551_v47 = vld [vmem:[#allocation11 + $0x88] sm:$0xff]  ;;  %v5553_v48 = vld [vmem:[#allocation11 + $0x98] sm:$0xff]  ;;  %v5557_v49 = vld [vmem:[#allocation11 + $0x80] sm:$0xff] }
  0x5a   :  { %377 = vmatpush1.msra.mxu0 %v5437_v9  ;;  %448 = vmatpush1.msra.mxu1 %v5439_v10  ;;  %7088 = vst [vmem:[#allocation19_spill] sm:$0xff] %v5551_v47  ;;  %7089 = vst [vmem:[#allocation20_spill] sm:$0xff] %v5557_v49  ;;  %v5559_v50 = vld [vmem:[#allocation11 + $0x90] sm:$0xff]  ;;  %v5563_v51 = vld [vmem:[#allocation11 + $0x68] sm:$0xff] }
  0x5b   :  { %378 = vmatprep.subr.mxu0 %v5443_v11  ;;  %449 = vmatprep.subr.mxu1 %v5445_v12  ;;  %7090 = vst [vmem:[#allocation21_spill] sm:$0xff] %v5559_v50  ;;  %7091 = vst [vmem:[#allocation22_spill] sm:$0xff] %v5563_v51  ;;  %v5565_v52 = vld [vmem:[#allocation11 + $0x78] sm:$0xff]  ;;  %v5569_v53 = vld [vmem:[#allocation11 + $0x60] sm:$0xff] }
  0x5c   :  { %379 = vmatpush1.msra.mxu0 %v5449_v13  ;;  %450 = vmatpush1.msra.mxu1 %v5451_v14  ;;  %7092 = vst [vmem:[#allocation23_spill] sm:$0xff] %v5565_v52  ;;  %7093 = vst [vmem:[#allocation24_spill] sm:$0xff] %v5569_v53  ;;  %v5571_v54 = vld [vmem:[#allocation11 + $0x70] sm:$0xff]  ;;  %v5575_v55 = vld [vmem:[#allocation11 + $0x48] sm:$0xff] }
  0x5d   :  { %380 = vmatprep.subr.mxu0 %v5455_v15  ;;  %451 = vmatprep.subr.mxu1 %v5457_v16  ;;  %7094 = vst [vmem:[#allocation25_spill] sm:$0xff] %v5571_v54  ;;  %7095 = vst [vmem:[#allocation26_spill] sm:$0xff] %v5575_v55  ;;  %v5577_v56 = vld [vmem:[#allocation11 + $0x58] sm:$0xff]  ;;  %v5581_v57 = vld [vmem:[#allocation11 + $0x40] sm:$0xff] }
  0x5e   :  { %381 = vmatpush1.msra.mxu0 %v5461_v17  ;;  %452 = vmatpush1.msra.mxu1 %v5463_v18  ;;  %7096 = vst [vmem:[#allocation27_spill] sm:$0xff] %v5577_v56  ;;  %7097 = vst [vmem:[#allocation28_spill] sm:$0xff] %v5581_v57  ;;  %v5583_v58 = vld [vmem:[#allocation11 + $0x50] sm:$0xff]  ;;  %v5587_v59 = vld [vmem:[#allocation11 + $0x28] sm:$0xff] }
  0x5f   :  { %382 = vmatprep.subr.mxu0 %v5467_v19  ;;  %453 = vmatprep.subr.mxu1 %v5469_v20  ;;  %7098 = vst [vmem:[#allocation29_spill] sm:$0xff] %v5583_v58  ;;  %7099 = vst [vmem:[#allocation30_spill] sm:$0xff] %v5587_v59  ;;  %v5589_v60 = vld [vmem:[#allocation11 + $0x38] sm:$0xff]  ;;  %v5593_v61 = vld [vmem:[#allocation11 + $0x20] sm:$0xff] }
  0x60   :  { %383 = vmatpush1.msra.mxu0 %v5473_v21  ;;  %454 = vmatpush1.msra.mxu1 %v5475_v22  ;;  %7100 = vst [vmem:[#allocation31_spill] sm:$0xff] %v5589_v60  ;;  %7101 = vst [vmem:[#allocation32_spill] sm:$0xff] %v5593_v61  ;;  %v5595_v62 = vld [vmem:[#allocation11 + $0x30] sm:$0xff]  ;;  %v5599_v63 = vld [vmem:[#allocation11 + $0x8] sm:$0xff] }
  0x61   :  { %384 = vmatprep.subr.mxu0 %v5479_v23  ;;  %455 = vmatprep.subr.mxu1 %v5481_v24  ;;  %7102 = vst [vmem:[#allocation33_spill] sm:$0xff] %v5595_v62  ;;  %7103 = vst [vmem:[#allocation34_spill] sm:$0xff] %v5599_v63  ;;  %v5601_v1 = vld [vmem:[#allocation11 + $0x18] sm:$0xff]  ;;  %v5605_v2 = vld [vmem:[#allocation11] sm:$0xff] }
  0x62   :  { %385 = vmatpush1.msra.mxu0 %v5485_v25  ;;  %456 = vmatpush1.msra.mxu1 %v5487_v26  ;;  %7104 = vst [vmem:[#allocation35_spill] sm:$0xff] %v5601_v1  ;;  %7105 = vst [vmem:[#allocation36_spill] sm:$0xff] %v5605_v2  ;;  %v5609_v0 = vld [vmem:[#allocation11 + $0x10] sm:$0xff] }
  0x63   :  { %386 = vmatprep.subr.mxu0 %v5491_v27  ;;  %457 = vmatprep.subr.mxu1 %v5493_v28  ;;  %7106 = vst [vmem:[#allocation37_spill] sm:$0xff] %v5609_v0 }
  0x64   :  { %387 = vmatpush1.msra.mxu0 %v5497_v29  ;;  %458 = vmatpush1.msra.mxu1 %v5499_v30 }
  0x65   :  { %388 = vmatprep.subr.mxu0 %v5503_v31  ;;  %459 = vmatprep.subr.mxu1 %v5505_v32 }
  0x66   :  { %389 = vmatpush1.msra.mxu0 %v5509_v33  ;;  %460 = vmatpush1.msra.mxu1 %v5511_v34 }
  0x67   :  { %390 = vmatprep.subr.mxu0 %v5515_v35  ;;  %461 = vmatprep.subr.mxu1 %v5517_v36 }
  0x68   :  { %391 = vmatpush1.msra.mxu0 %v5521_v37  ;;  %462 = vmatpush1.msra.mxu1 %v5523_v38 }
  0x69   :  { %392 = vmatprep.subr.mxu0 %v5527_v39  ;;  %463 = vmatprep.subr.mxu1 %v5529_v40 }
  0x6a   :  { %393 = vmatpush1.msra.mxu0 %v5533_v41  ;;  %464 = vmatpush1.msra.mxu1 %v5535_v42 }
  0x6b   :  { %394 = vmatprep.subr.mxu0 %v5539_v43  ;;  %465 = vmatprep.subr.mxu1 %v5541_v44 }
  0x6c   :  { %395 = vmatpush1.msra.mxu0 %v5545_v45  ;;  %466 = vmatpush1.msra.mxu1 %v5547_v46 }
  0x6d   :  { %396 = vmatprep.subr.mxu0 %v5551_v47  ;;  %467 = vmatprep.subr.mxu1 %v5553_v48 }
  0x6e   :  { %397 = vmatpush1.msra.mxu0 %v5557_v49  ;;  %468 = vmatpush1.msra.mxu1 %v5559_v50 }
  0x6f   :  { %398 = vmatprep.subr.mxu0 %v5563_v51  ;;  %469 = vmatprep.subr.mxu1 %v5565_v52 }
  0x70   :  { %399 = vmatpush1.msra.mxu0 %v5569_v53  ;;  %470 = vmatpush1.msra.mxu1 %v5571_v54 }
  0x71   :  { %400 = vmatprep.subr.mxu0 %v5575_v55  ;;  %471 = vmatprep.subr.mxu1 %v5577_v56 }
  0x72   :  { %401 = vmatpush1.msra.mxu0 %v5581_v57  ;;  %472 = vmatpush1.msra.mxu1 %v5583_v58  ;;  %v309_v58 = vld [vmem:[#allocation4] sm:$0x1]  ;;  %v7107_v57 = vmov 0.0  }
  0x73   :  { %402 = vmatprep.subr.mxu0 %v5587_v59  ;;  %473 = vmatprep.subr.mxu1 %v5589_v60 }
  0x74   :  { %403 = vmatpush1.msra.mxu0 %v5593_v61  ;;  %474 = vmatpush1.msra.mxu1 %v5595_v62 }
  0x75   :  { %404 = vmatprep.subr.mxu0 %v5599_v63  ;;  %475 = vmatprep.subr.mxu1 %v5601_v1 }
  0x76   :  { %405 = vmatpush1.msra.mxu0 %v5605_v2  ;;  %438 = vmatprep.mubr.f32.mxu0 %v7107_v57 }
  0x77   :  { %476 = vmatpush1.msra.mxu1 %v5609_v0  ;;  %509 = vmatprep.mubr.f32.mxu1 %v7107_v57 }
  0x78   :  { %439 = vmatmul.mubr.f32.vlgmr.msra.gmra.mxu0 %v309_v58  ;;  %510 = vmatmul.mubr.f32.vlgmr.msra.gmra.mxu1 %v309_v58  ;;  %v7108_v58 = vld [vmem:[#allocation28_spill] sm:$0xff] }
  0x79   :  { %648 = vmatprep.subr.mxu0 %v5423_v3  ;;  %719 = vmatprep.subr.mxu1 %v5425_v4 }
  0x7a   :  { %649 = vmatpush1.msra.mxu0 %v5427_v5  ;;  %720 = vmatpush1.msra.mxu1 %v5429_v6 }
  0x7b   :  { %650 = vmatprep.subr.mxu0 %v5431_v7  ;;  %721 = vmatprep.subr.mxu1 %v5433_v8 }
  0x7c   :  { %651 = vmatpush1.msra.mxu0 %v5437_v9  ;;  %722 = vmatpush1.msra.mxu1 %v5439_v10 }
  0x7d   :  { %652 = vmatprep.subr.mxu0 %v5443_v11  ;;  %723 = vmatprep.subr.mxu1 %v5445_v12 }
  0x7e   :  { %653 = vmatpush1.msra.mxu0 %v5449_v13  ;;  %724 = vmatpush1.msra.mxu1 %v5451_v14 }
  0x7f   :  { %654 = vmatprep.subr.mxu0 %v5455_v15  ;;  %725 = vmatprep.subr.mxu1 %v5457_v16 }
  0x80   :  { %655 = vmatpush1.msra.mxu0 %v5461_v17  ;;  %726 = vmatpush1.msra.mxu1 %v5463_v18 }
  0x81   :  { %656 = vmatprep.subr.mxu0 %v5467_v19  ;;  %727 = vmatprep.subr.mxu1 %v5469_v20 }
  0x82   :  { %657 = vmatpush1.msra.mxu0 %v5473_v21  ;;  %728 = vmatpush1.msra.mxu1 %v5475_v22 }
  0x83   :  { %658 = vmatprep.subr.mxu0 %v5479_v23  ;;  %729 = vmatprep.subr.mxu1 %v5481_v24 }
  0x84   :  { %659 = vmatpush1.msra.mxu0 %v5485_v25  ;;  %730 = vmatpush1.msra.mxu1 %v5487_v26 }
  0x85   :  { %660 = vmatprep.subr.mxu0 %v5491_v27  ;;  %731 = vmatprep.subr.mxu1 %v5493_v28 }
  0x86   :  { %661 = vmatpush1.msra.mxu0 %v5497_v29  ;;  %732 = vmatpush1.msra.mxu1 %v5499_v30 }
  0x87   :  { %662 = vmatprep.subr.mxu0 %v5503_v31  ;;  %733 = vmatprep.subr.mxu1 %v5505_v32 }
  0x88   :  { %663 = vmatpush1.msra.mxu0 %v5509_v33  ;;  %734 = vmatpush1.msra.mxu1 %v5511_v34 }
  0x89   :  { %664 = vmatprep.subr.mxu0 %v5515_v35  ;;  %735 = vmatprep.subr.mxu1 %v5517_v36 }
  0x8a   :  { %665 = vmatpush1.msra.mxu0 %v5521_v37  ;;  %736 = vmatpush1.msra.mxu1 %v5523_v38 }
  0x8b   :  { %666 = vmatprep.subr.mxu0 %v5527_v39  ;;  %737 = vmatprep.subr.mxu1 %v5529_v40 }
  0x8c   :  { %667 = vmatpush1.msra.mxu0 %v5533_v41  ;;  %738 = vmatpush1.msra.mxu1 %v5535_v42 }
  0x8d   :  { %668 = vmatprep.subr.mxu0 %v5539_v43  ;;  %739 = vmatprep.subr.mxu1 %v5541_v44 }
  0x8e   :  { %669 = vmatpush1.msra.mxu0 %v5545_v45  ;;  %740 = vmatpush1.msra.mxu1 %v5547_v46 }
  0x8f   :  { %670 = vmatprep.subr.mxu0 %v5551_v47  ;;  %741 = vmatprep.subr.mxu1 %v5553_v48  ;;  %v7109_v47 = vld [vmem:[#allocation29_spill] sm:$0xff] }
  0x90   :  { %671 = vmatpush1.msra.mxu0 %v5557_v49  ;;  %742 = vmatpush1.msra.mxu1 %v5559_v50 }
  0x91   :  { %672 = vmatprep.subr.mxu0 %v5563_v51  ;;  %743 = vmatprep.subr.mxu1 %v5565_v52 }
  0x92   :  { %673 = vmatpush1.msra.mxu0 %v5569_v53  ;;  %744 = vmatpush1.msra.mxu1 %v5571_v54 }
  0x93   :  { %674 = vmatprep.subr.mxu0 %v5575_v55  ;;  %745 = vmatprep.subr.mxu1 %v5577_v56 }
  0x94   :  { %675 = vmatpush1.msra.mxu0 %v7108_v58  ;;  %746 = vmatpush1.msra.mxu1 %v7109_v47 }
  0x95   :  { %676 = vmatprep.subr.mxu0 %v5587_v59  ;;  %747 = vmatprep.subr.mxu1 %v5589_v60  ;;  %v140_v60 = vlaneseq }
  0x96   :  { %677 = vmatpush1.msra.mxu0 %v5593_v61  ;;  %748 = vmatpush1.msra.mxu1 %v5595_v62 }
  0x97   :  { %678 = vmatprep.subr.mxu0 %v5599_v63  ;;  %749 = vmatprep.subr.mxu1 %v5601_v1  ;;  %v5685_v61 = vshrl.u32 %v140_v60, 7  ;;  %v138_v1 = vld [vmem:[#allocation12] sm:$0xf] }
  0x98   :  { %679 = vmatpush1.msra.mxu0 %v5605_v2  ;;  %712 = vmatprep.mubr.f32.mxu0 %v7107_v57 }
  0x99   :  { %750 = vmatpush1.msra.mxu1 %v5609_v0  ;;  %783 = vmatprep.mubr.f32.mxu1 %v7107_v57  ;;  %7110 = vst [vmem:[#allocation38_spill] sm:$0xff] %v5685_v61  ;;  %v6969_v62 = vsub.s32 0, %v5685_v61  ;;  %v6970_v63 = vsub.s32 2, %v5685_v61  ;;  %v6973_v2 = vsub.s32 1, %v5685_v61  ;;  %v6975_v59 = vsub.s32 3, %v5685_v61 }
  0x9a   :  { %922 = vmatprep.subr.mxu0 %v5423_v3  ;;  %993 = vmatprep.subr.mxu1 %v5425_v4 }
  0x9b   :  { %v143_v0 = vrot.slane %v138_v1, %v6969_v62  ;;  %v151_v3 = vrot.slane %v138_v1, %v6970_v63  ;;  %v147_v4 = vrot.slane %v138_v1, %v6973_v2  ;;  %v155_v60 = vrot.slane %v138_v1, %v6975_v59 }
  0x9c   :  { %v5380_v62 = vmov 1966171168  }
  0x9d   :  { %v523_v63 = vunpack.c.l.s4 %v5380_v62 }
  0x9f   :  { %v524_v51 = vunpack.c.0.s8 %v523_v63 }
  0xa1   :  { %v5700_v49 = vsub.s32 %v524_v51, %v5685_v61  ;;  %v5952_v61 = vld [vmem:[#allocation11 + $0x18] sm:$0xff] }
  0xa3   :  { %7111 = vst [vmem:[#allocation39_spill] sm:$0xff] %v5700_v49 }
 0x116   :  { %v226_v57 = vpop.f32.mrf.mxu0  ;;  %v297_v47 = vpop.f32.mrf.mxu1 }
 0x117   :  { %v227_v58 = vadd.f32 %v226_v57, %v143_v0  ;;  %v298_v56 = vadd.f32 %v297_v47, %v151_v3 }
 0x118   :  { %v228_v55 = vpop.f32.mrf.mxu0  ;;  %v299_v54 = vpop.f32.mrf.mxu1 }
 0x119   :  { %302 = vst [vmem:[#allocation3] sm:$0xff] %v227_v58  ;;  %304 = vst [vmem:[#allocation3 + $0x10] sm:$0xff] %v298_v56  ;;  %v229_v53 = vadd.f32 %v228_v55, %v147_v4  ;;  %v300_v52 = vadd.f32 %v299_v54, %v155_v60 }
 0x11b   :  { %303 = vst [vmem:[#allocation3 + $0x8] sm:$0xff] %v229_v53  ;;  %305 = vst [vmem:[#allocation3 + $0x18] sm:$0xff] %v300_v52 }
 0x122   :  { %v308_v52 = vld [vmem:[#allocation3] ss:$8 sm:$0xf] }
 0x138   :  { %v440_v50 = vpop.f32.mrf.mxu0  ;;  %v511_v2 = vpop.f32.mrf.mxu1 }
 0x13a   :  { %v442_v1 = vpop.f32.mrf.mxu0  ;;  %v513_v59 = vpop.f32.mrf.mxu1 }
 0x13b   :  { %v520_v0 = vcombine.low %v440_v50, %v442_v1  ;;  %v521_v47 = vcombine.low %v511_v2, %v513_v59 }
 0x13d   :  { %v528_v57 = vrot.slane %v520_v0, %v5700_v49  ;;  %v535_v56 = vrot.slane %v521_v47, %v5700_v49  ;;  %v572_v47 = vld [vmem:[#allocation5] sm:$0x1] }
 0x13f   :  { %v536_v55 = vcombine.low %v528_v57, %v535_v56 }
 0x141   :  { %v543_v53 = vrot.slane %v536_v55, %v5700_v49 }
 0x143   :  { %v545_v54 = vadd.f32 %v543_v53, %v308_v52 }
 0x145   :  { %v4941_v62 = vmul.f32 -1.442695, %v545_v54  ;;  %v553_v63 = vrot.slane %v545_v54, 1  ;;  %v564_v51 = vrot.slane %v545_v54, 3  ;;  %v561_v60 = vrot.slane %v545_v54, 2 }
 0x147   :  { %5001 = vpow2.f32 %v4941_v62  ;;  %v4942_v58 = vmul.f32 -1.442695, %v553_v63  ;;  %v4943_v3 = vmul.f32 -1.442695, %v564_v51 }
 0x149   :  { %5003 = vpow2.f32 %v4942_v58 }
 0x14a   :  { %5005 = vpow2.f32 %v4943_v3 }
 0x154   :  { %v5002_v4 = vpop.eup %5001 }
 0x155   :  { %v549_v50 = vadd.f32 1.0, %v5002_v4 }
 0x156   :  { %v5004_v59 = vpop.eup %5003 }
 0x157   :  { %5007 = vrcp.f32 %v549_v50  ;;  %v558_v2 = vadd.f32 1.0, %v5004_v59  ;;  %v5006_v1 = vpop.eup %5005 }
 0x158   :  { %5009 = vtanh.f32 %v561_v60  ;;  %v569_v55 = vadd.f32 1.0, %v5006_v1 }
 0x159   :  { %5011 = vrcp.f32 %v558_v2 }
 0x15a   :  { %5013 = vrcp.f32 %v569_v55 }
 0x164   :  { %v5008_v0 = vpop.eup %5007 }
 0x165   :  { %v5010_v57 = vpop.eup %5009 }
 0x166   :  { %v5012_v56 = vpop.eup %5011  ;;  %v574_v52 = vmul.f32 %v5010_v57, %v5008_v0 }
 0x167   :  { %v573_v53 = vmul.f32 %v5012_v56, %v572_v47  ;;  %v5014_v54 = vpop.eup %5013 }
 0x169   :  { %v575_v62 = vadd.f32 %v574_v52, %v573_v53  ;;  %v5774_v53 = vld [vmem:[#allocation11 + $0x1e8] sm:$0xff]  ;;  %v5776_v52 = vld [vmem:[#allocation11 + $0x1f8] sm:$0xff] }
 0x16b   :  { %5015 = vtanh.f32 %v575_v62  ;;  %578 = vst [vmem:[#allocation5] sm:$0x1] %v575_v62  ;;  %v5780_v62 = vld [vmem:[#allocation11 + $0x1e0] sm:$0xff] }
 0x172   :  { %v846_v50 = vld [vmem:[#allocation5] sm:$0x1] }
 0x178   :  { %v5016_v63 = vpop.eup %5015 }
 0x179   :  { %v577_v58 = vmul.f32 %v5016_v63, %v5014_v54  ;;  %v5782_v54 = vld [vmem:[#allocation11 + $0x1f0] sm:$0xff]  ;;  %v5786_v63 = vld [vmem:[#allocation11 + $0x1c8] sm:$0xff] }
 0x17b   :  { %579 = vst [vmem:[#allocation4] sm:$0x1] %v577_v58  ;;  %580 = vst [vmem:[#allocation2] sm:$0x1] %v577_v58  ;;  %v5788_v58 = vld [vmem:[#allocation11 + $0x1d8] sm:$0xff] }
 0x182   :  { %v583_v51 = vld [vmem:[#allocation4] sm:$0x1] }
 0x183   :  { %713 = vmatmul.mubr.f32.vlgmr.msra.gmra.mxu0 %v583_v51  ;;  %784 = vmatmul.mubr.f32.vlgmr.msra.gmra.mxu1 %v583_v51  ;;  %v5792_v51 = vld [vmem:[#allocation11 + $0x1c0] sm:$0xff] }
 0x184   :  { %923 = vmatpush1.msra.mxu0 %v5427_v5  ;;  %994 = vmatpush1.msra.mxu1 %v5429_v6  ;;  %v7112_v5 = vld [vmem:[#allocation19_spill] sm:$0xff]  ;;  %v7113_v6 = vld [vmem:[#allocation20_spill] sm:$0xff] }
 0x185   :  { %924 = vmatprep.subr.mxu0 %v5431_v7  ;;  %995 = vmatprep.subr.mxu1 %v5433_v8  ;;  %v7114_v7 = vld [vmem:[#allocation21_spill] sm:$0xff]  ;;  %v7115_v8 = vld [vmem:[#allocation22_spill] sm:$0xff]  ;;  %7132 = vst [vmem:[#allocation19_spill] sm:$0xff] %v5774_v53  ;;  %7133 = vst [vmem:[#allocation20_spill] sm:$0xff] %v5776_v52 }
 0x186   :  { %925 = vmatpush1.msra.mxu0 %v5437_v9  ;;  %996 = vmatpush1.msra.mxu1 %v5439_v10  ;;  %v7116_v9 = vld [vmem:[#allocation23_spill] sm:$0xff]  ;;  %v7117_v10 = vld [vmem:[#allocation24_spill] sm:$0xff] }
 0x187   :  { %926 = vmatprep.subr.mxu0 %v5443_v11  ;;  %997 = vmatprep.subr.mxu1 %v5445_v12  ;;  %v7118_v11 = vld [vmem:[#allocation25_spill] sm:$0xff]  ;;  %v7119_v12 = vld [vmem:[#allocation26_spill] sm:$0xff] }
 0x188   :  { %927 = vmatpush1.msra.mxu0 %v5449_v13  ;;  %998 = vmatpush1.msra.mxu1 %v5451_v14  ;;  %v7120_v13 = vld [vmem:[#allocation27_spill] sm:$0xff]  ;;  %v7121_v14 = vld [vmem:[#allocation28_spill] sm:$0xff] }
 0x189   :  { %928 = vmatprep.subr.mxu0 %v5455_v15  ;;  %999 = vmatprep.subr.mxu1 %v5457_v16  ;;  %v7122_v15 = vld [vmem:[#allocation29_spill] sm:$0xff]  ;;  %v7123_v16 = vld [vmem:[#allocation30_spill] sm:$0xff] }
 0x18a   :  { %929 = vmatpush1.msra.mxu0 %v5461_v17  ;;  %1000 = vmatpush1.msra.mxu1 %v5463_v18  ;;  %v7124_v17 = vld [vmem:[#allocation31_spill] sm:$0xff]  ;;  %v7125_v18 = vld [vmem:[#allocation32_spill] sm:$0xff] }
 0x18b   :  { %930 = vmatprep.subr.mxu0 %v5467_v19  ;;  %1001 = vmatprep.subr.mxu1 %v5469_v20  ;;  %v7126_v19 = vld [vmem:[#allocation33_spill] sm:$0xff]  ;;  %v7127_v20 = vld [vmem:[#allocation34_spill] sm:$0xff] }
 0x18c   :  { %931 = vmatpush1.msra.mxu0 %v5473_v21  ;;  %1002 = vmatpush1.msra.mxu1 %v5475_v22  ;;  %v7128_v21 = vld [vmem:[#allocation35_spill] sm:$0xff]  ;;  %v7129_v22 = vld [vmem:[#allocation36_spill] sm:$0xff] }
 0x18d   :  { %932 = vmatprep.subr.mxu0 %v5479_v23  ;;  %1003 = vmatprep.subr.mxu1 %v5481_v24  ;;  %v7130_v23 = vmov 0.0   ;;  %v7131_v24 = vld [vmem:[#allocation37_spill] sm:$0xff]  ;;  %7149 = vst [vmem:[#allocation36_spill] sm:$0xff] %v5952_v61 }
 0x18e   :  { %933 = vmatpush1.msra.mxu0 %v5485_v25  ;;  %1004 = vmatpush1.msra.mxu1 %v5487_v26 }
 0x18f   :  { %934 = vmatprep.subr.mxu0 %v5491_v27  ;;  %1005 = vmatprep.subr.mxu1 %v5493_v28 }
 0x190   :  { %935 = vmatpush1.msra.mxu0 %v5497_v29  ;;  %1006 = vmatpush1.msra.mxu1 %v5499_v30 }
 0x191   :  { %936 = vmatprep.subr.mxu0 %v5503_v31  ;;  %1007 = vmatprep.subr.mxu1 %v5505_v32 }
 0x192   :  { %937 = vmatpush1.msra.mxu0 %v5509_v33  ;;  %1008 = vmatpush1.msra.mxu1 %v5511_v34 }
 0x193   :  { %938 = vmatprep.subr.mxu0 %v5515_v35  ;;  %1009 = vmatprep.subr.mxu1 %v5517_v36  ;;  %v582_v35 = vld [vmem:[#allocation3 + $0x1] ss:$8 sm:$0xf] }
 0x194   :  { %939 = vmatpush1.msra.mxu0 %v5521_v37  ;;  %1010 = vmatpush1.msra.mxu1 %v5523_v38 }
 0x195   :  { %940 = vmatprep.subr.mxu0 %v5527_v39  ;;  %1011 = vmatprep.subr.mxu1 %v5529_v40 }
 0x196   :  { %941 = vmatpush1.msra.mxu0 %v5533_v41  ;;  %1012 = vmatpush1.msra.mxu1 %v5535_v42 }
 0x197   :  { %942 = vmatprep.subr.mxu0 %v5539_v43  ;;  %1013 = vmatprep.subr.mxu1 %v5541_v44 }
 0x198   :  { %943 = vmatpush1.msra.mxu0 %v5545_v45  ;;  %1014 = vmatpush1.msra.mxu1 %v5547_v46 }
 0x199   :  { %944 = vmatprep.subr.mxu0 %v7112_v5  ;;  %1015 = vmatprep.subr.mxu1 %v5553_v48  ;;  %v5794_v5 = vld [vmem:[#allocation11 + $0x1d0] sm:$0xff] }
 0x19a   :  { %945 = vmatpush1.msra.mxu0 %v7113_v6  ;;  %1016 = vmatpush1.msra.mxu1 %v7114_v7  ;;  %v5798_v6 = vld [vmem:[#allocation11 + $0x1a8] sm:$0xff]  ;;  %v5800_v7 = vld [vmem:[#allocation11 + $0x1b8] sm:$0xff] }
 0x19b   :  { %946 = vmatprep.subr.mxu0 %v7115_v8  ;;  %1017 = vmatprep.subr.mxu1 %v7116_v9  ;;  %v5804_v8 = vld [vmem:[#allocation11 + $0x1a0] sm:$0xff]  ;;  %v5806_v9 = vld [vmem:[#allocation11 + $0x1b0] sm:$0xff] }
 0x19c   :  { %947 = vmatpush1.msra.mxu0 %v7117_v10  ;;  %1018 = vmatpush1.msra.mxu1 %v7118_v11  ;;  %v5810_v10 = vld [vmem:[#allocation11 + $0x188] sm:$0xff]  ;;  %v5812_v11 = vld [vmem:[#allocation11 + $0x198] sm:$0xff] }
 0x19d   :  { %948 = vmatprep.subr.mxu0 %v7119_v12  ;;  %1019 = vmatprep.subr.mxu1 %v7120_v13  ;;  %v5816_v12 = vld [vmem:[#allocation11 + $0x180] sm:$0xff]  ;;  %v5818_v13 = vld [vmem:[#allocation11 + $0x190] sm:$0xff] }
 0x19e   :  { %949 = vmatpush1.msra.mxu0 %v7121_v14  ;;  %1020 = vmatpush1.msra.mxu1 %v7122_v15  ;;  %v5822_v14 = vld [vmem:[#allocation11 + $0x168] sm:$0xff]  ;;  %v5824_v15 = vld [vmem:[#allocation11 + $0x178] sm:$0xff] }
 0x19f   :  { %950 = vmatprep.subr.mxu0 %v7123_v16  ;;  %1021 = vmatprep.subr.mxu1 %v7124_v17  ;;  %v5828_v16 = vld [vmem:[#allocation11 + $0x160] sm:$0xff]  ;;  %v5830_v17 = vld [vmem:[#allocation11 + $0x170] sm:$0xff] }
 0x1a0   :  { %951 = vmatpush1.msra.mxu0 %v7125_v18  ;;  %1022 = vmatpush1.msra.mxu1 %v7126_v19  ;;  %v5834_v18 = vld [vmem:[#allocation11 + $0x148] sm:$0xff]  ;;  %v5836_v19 = vld [vmem:[#allocation11 + $0x158] sm:$0xff] }
 0x1a1   :  { %952 = vmatprep.subr.mxu0 %v7127_v20  ;;  %1023 = vmatprep.subr.mxu1 %v7128_v21  ;;  %v5840_v20 = vld [vmem:[#allocation11 + $0x140] sm:$0xff]  ;;  %v5842_v21 = vld [vmem:[#allocation11 + $0x150] sm:$0xff] }
 0x1a2   :  { %953 = vmatpush1.msra.mxu0 %v7129_v22  ;;  %986 = vmatprep.mubr.f32.mxu0 %v7130_v23  ;;  %v5846_v22 = vld [vmem:[#allocation11 + $0x128] sm:$0xff] }
 0x1a3   :  { %1024 = vmatpush1.msra.mxu1 %v7131_v24  ;;  %1057 = vmatprep.mubr.f32.mxu1 %v7130_v23  ;;  %v5848_v24 = vld [vmem:[#allocation11 + $0x138] sm:$0xff] }
 0x1a4   :  { %1196 = vmatprep.subr.mxu0 %v5774_v53  ;;  %1267 = vmatprep.subr.mxu1 %v5776_v52 }
 0x243   :  { %v714_v25 = vpop.f32.mrf.mxu0  ;;  %v785_v26 = vpop.f32.mrf.mxu1 }
 0x245   :  { %v716_v27 = vpop.f32.mrf.mxu0  ;;  %v787_v28 = vpop.f32.mrf.mxu1 }
 0x246   :  { %v794_v29 = vcombine.low %v714_v25, %v716_v27  ;;  %v795_v30 = vcombine.low %v785_v26, %v787_v28  ;;  %v5852_v25 = vld [vmem:[#allocation11 + $0x120] sm:$0xff]  ;;  %v5854_v26 = vld [vmem:[#allocation11 + $0x130] sm:$0xff]  ;;  %v5858_v27 = vld [vmem:[#allocation11 + $0x108] sm:$0xff] }
 0x247   :  { %v5860_v28 = vld [vmem:[#allocation11 + $0x118] sm:$0xff] }
 0x248   :  { %v802_v31 = vrot.slane %v794_v29, %v5700_v49  ;;  %v809_v32 = vrot.slane %v795_v30, %v5700_v49  ;;  %v5864_v29 = vld [vmem:[#allocation11 + $0x100] sm:$0xff]  ;;  %v5866_v30 = vld [vmem:[#allocation11 + $0x110] sm:$0xff] }
 0x24a   :  { %v810_v33 = vcombine.low %v802_v31, %v809_v32  ;;  %v5870_v31 = vld [vmem:[#allocation11 + $0xe8] sm:$0xff]  ;;  %v5872_v32 = vld [vmem:[#allocation11 + $0xf8] sm:$0xff] }
 0x24c   :  { %v817_v34 = vrot.slane %v810_v33, %v5700_v49  ;;  %v5876_v33 = vld [vmem:[#allocation11 + $0xe0] sm:$0xff] }
 0x24e   :  { %v819_v36 = vadd.f32 %v817_v34, %v582_v35  ;;  %v5878_v34 = vld [vmem:[#allocation11 + $0xf0] sm:$0xff]  ;;  %v5882_v35 = vld [vmem:[#allocation11 + $0xc8] sm:$0xff] }
 0x250   :  { %v4944_v37 = vmul.f32 -1.442695, %v819_v36  ;;  %v827_v38 = vrot.slane %v819_v36, 1  ;;  %v838_v40 = vrot.slane %v819_v36, 3  ;;  %v835_v43 = vrot.slane %v819_v36, 2  ;;  %v5884_v36 = vld [vmem:[#allocation11 + $0xd8] sm:$0xff] }
 0x252   :  { %5017 = vpow2.f32 %v4944_v37  ;;  %v4945_v39 = vmul.f32 -1.442695, %v827_v38  ;;  %v4946_v41 = vmul.f32 -1.442695, %v838_v40  ;;  %v5888_v37 = vld [vmem:[#allocation11 + $0xc0] sm:$0xff]  ;;  %v5890_v38 = vld [vmem:[#allocation11 + $0xd0] sm:$0xff] }
 0x253   :  { %v5896_v40 = vld [vmem:[#allocation11 + $0xb8] sm:$0xff] }
 0x254   :  { %5019 = vpow2.f32 %v4945_v39  ;;  %v5894_v39 = vld [vmem:[#allocation11 + $0xa8] sm:$0xff] }
 0x255   :  { %5021 = vpow2.f32 %v4946_v41  ;;  %v5900_v41 = vld [vmem:[#allocation11 + $0xa0] sm:$0xff] }
 0x25f   :  { %v5018_v42 = vpop.eup %5017 }
 0x260   :  { %v823_v44 = vadd.f32 1.0, %v5018_v42  ;;  %v5902_v42 = vld [vmem:[#allocation11 + $0xb0] sm:$0xff] }
 0x261   :  { %v5020_v45 = vpop.eup %5019 }
 0x262   :  { %5023 = vrcp.f32 %v823_v44  ;;  %v832_v46 = vadd.f32 1.0, %v5020_v45  ;;  %v5022_v48 = vpop.eup %5021  ;;  %v5908_v44 = vld [vmem:[#allocation11 + $0x98] sm:$0xff]  ;;  %v5912_v45 = vld [vmem:[#allocation11 + $0x80] sm:$0xff] }
 0x263   :  { %5025 = vtanh.f32 %v835_v43  ;;  %v843_v59 = vadd.f32 1.0, %v5022_v48  ;;  %v5906_v43 = vld [vmem:[#allocation11 + $0x88] sm:$0xff]  ;;  %7134 = vst [vmem:[#allocation21_spill] sm:$0xff] %v5912_v45 }
 0x264   :  { %5027 = vrcp.f32 %v832_v46  ;;  %v5914_v46 = vld [vmem:[#allocation11 + $0x90] sm:$0xff]  ;;  %v5918_v48 = vld [vmem:[#allocation11 + $0x68] sm:$0xff] }
 0x265   :  { %5029 = vrcp.f32 %v843_v59  ;;  %7135 = vst [vmem:[#allocation22_spill] sm:$0xff] %v5914_v46  ;;  %7136 = vst [vmem:[#allocation23_spill] sm:$0xff] %v5918_v48  ;;  %v5930_v59 = vld [vmem:[#allocation11 + $0x58] sm:$0xff] }
 0x266   :  { %7141 = vst [vmem:[#allocation28_spill] sm:$0xff] %v5930_v59 }
 0x26f   :  { %v5024_v3 = vpop.eup %5023 }
 0x270   :  { %v5026_v4 = vpop.eup %5025 }
 0x271   :  { %v5028_v60 = vpop.eup %5027  ;;  %v848_v1 = vmul.f32 %v5026_v4, %v5024_v3  ;;  %v5920_v3 = vld [vmem:[#allocation11 + $0x78] sm:$0xff]  ;;  %v5922_v4 = vld [vmem:[#allocation11 + $0x60] sm:$0xff] }
 0x272   :  { %v847_v2 = vmul.f32 %v5028_v60, %v846_v50  ;;  %v5030_v47 = vpop.eup %5029  ;;  %7137 = vst [vmem:[#allocation24_spill] sm:$0xff] %v5920_v3  ;;  %7138 = vst [vmem:[#allocation25_spill] sm:$0xff] %v5922_v4  ;;  %v5926_v60 = vld [vmem:[#allocation11 + $0x70] sm:$0xff]  ;;  %v5928_v50 = vld [vmem:[#allocation11 + $0x48] sm:$0xff] }
 0x273   :  { %7139 = vst [vmem:[#allocation26_spill] sm:$0xff] %v5926_v60  ;;  %7140 = vst [vmem:[#allocation27_spill] sm:$0xff] %v5928_v50 }
 0x274   :  { %v849_v0 = vadd.f32 %v848_v1, %v847_v2  ;;  %v5934_v2 = vld [vmem:[#allocation11 + $0x40] sm:$0xff]  ;;  %v5936_v1 = vld [vmem:[#allocation11 + $0x50] sm:$0xff] }
 0x275   :  { %7142 = vst [vmem:[#allocation29_spill] sm:$0xff] %v5934_v2  ;;  %7143 = vst [vmem:[#allocation30_spill] sm:$0xff] %v5936_v1 }
 0x276   :  { %5031 = vtanh.f32 %v849_v0  ;;  %852 = vst [vmem:[#allocation5] sm:$0x1] %v849_v0  ;;  %v5938_v0 = vld [vmem:[#allocation11 + $0x28] sm:$0xff] }
 0x277   :  { %7144 = vst [vmem:[#allocation31_spill] sm:$0xff] %v5938_v0 }
 0x283   :  { %v5032_v57 = vpop.eup %5031 }
 0x284   :  { %v851_v56 = vmul.f32 %v5032_v57, %v5030_v47  ;;  %v5942_v47 = vld [vmem:[#allocation11 + $0x38] sm:$0xff]  ;;  %v5944_v57 = vld [vmem:[#allocation11 + $0x20] sm:$0xff] }
 0x285   :  { %7145 = vst [vmem:[#allocation32_spill] sm:$0xff] %v5942_v47  ;;  %7146 = vst [vmem:[#allocation33_spill] sm:$0xff] %v5944_v57 }
 0x286   :  { %853 = vst [vmem:[#allocation4] sm:$0x1] %v851_v56  ;;  %854 = vst [vmem:[#allocation2 + $0x1] sm:$0x1] %v851_v56  ;;  %v5946_v56 = vld [vmem:[#allocation11 + $0x30] sm:$0xff] }
 0x287   :  { %7147 = vst [vmem:[#allocation34_spill] sm:$0xff] %v5946_v56 }
 0x28d   :  { %v857_v55 = vld [vmem:[#allocation4] sm:$0x1] }
 0x28e   :  { %987 = vmatmul.mubr.f32.vlgmr.msra.gmra.mxu0 %v857_v55  ;;  %1058 = vmatmul.mubr.f32.vlgmr.msra.gmra.mxu1 %v857_v55  ;;  %v5950_v55 = vld [vmem:[#allocation11 + $0x8] sm:$0xff] }
 0x28f   :  { %1260 = vmatprep.mubr.f32.mxu0 %v7130_v23  ;;  %1331 = vmatprep.mubr.f32.mxu1 %v7130_v23  ;;  %7148 = vst [vmem:[#allocation35_spill] sm:$0xff] %v5950_v55  ;;  %v5956_v23 = vld [vmem:[#allocation11] sm:$0xff] }
 0x290   :  { %1197 = vmatpush1.msra.mxu0 %v5780_v62  ;;  %1268 = vmatpush1.msra.mxu1 %v5782_v54  ;;  %7150 = vst [vmem:[#allocation37_spill] sm:$0xff] %v5956_v23 }
 0x291   :  { %1198 = vmatprep.subr.mxu0 %v5786_v63  ;;  %1269 = vmatprep.subr.mxu1 %v5788_v58 }
 0x292   :  { %1199 = vmatpush1.msra.mxu0 %v5792_v51  ;;  %1270 = vmatpush1.msra.mxu1 %v5794_v5 }
 0x293   :  { %1200 = vmatprep.subr.mxu0 %v5798_v6  ;;  %1271 = vmatprep.subr.mxu1 %v5800_v7 }
 0x294   :  { %1201 = vmatpush1.msra.mxu0 %v5804_v8  ;;  %1272 = vmatpush1.msra.mxu1 %v5806_v9 }
 0x295   :  { %1202 = vmatprep.subr.mxu0 %v5810_v10  ;;  %1273 = vmatprep.subr.mxu1 %v5812_v11 }
 0x296   :  { %1203 = vmatpush1.msra.mxu0 %v5816_v12  ;;  %1274 = vmatpush1.msra.mxu1 %v5818_v13 }
 0x297   :  { %1204 = vmatprep.subr.mxu0 %v5822_v14  ;;  %1275 = vmatprep.subr.mxu1 %v5824_v15 }
 0x298   :  { %1205 = vmatpush1.msra.mxu0 %v5828_v16  ;;  %1276 = vmatpush1.msra.mxu1 %v5830_v17 }
 0x299   :  { %1206 = vmatprep.subr.mxu0 %v5834_v18  ;;  %1277 = vmatprep.subr.mxu1 %v5836_v19 }
 0x29a   :  { %1207 = vmatpush1.msra.mxu0 %v5840_v20  ;;  %1278 = vmatpush1.msra.mxu1 %v5842_v21 }
 0x29b   :  { %1208 = vmatprep.subr.mxu0 %v5846_v22  ;;  %1279 = vmatprep.subr.mxu1 %v5848_v24 }
 0x29c   :  { %1209 = vmatpush1.msra.mxu0 %v5852_v25  ;;  %1280 = vmatpush1.msra.mxu1 %v5854_v26 }
 0x29d   :  { %1210 = vmatprep.subr.mxu0 %v5858_v27  ;;  %1281 = vmatprep.subr.mxu1 %v5860_v28 }
 0x29e   :  { %1211 = vmatpush1.msra.mxu0 %v5864_v29  ;;  %1282 = vmatpush1.msra.mxu1 %v5866_v30 }
 0x29f   :  { %1212 = vmatprep.subr.mxu0 %v5870_v31  ;;  %1283 = vmatprep.subr.mxu1 %v5872_v32 }
 0x2a0   :  { %1213 = vmatpush1.msra.mxu0 %v5876_v33  ;;  %1284 = vmatpush1.msra.mxu1 %v5878_v34 }
 0x2a1   :  { %1214 = vmatprep.subr.mxu0 %v5882_v35  ;;  %1285 = vmatprep.subr.mxu1 %v5884_v36 }
 0x2a2   :  { %1215 = vmatpush1.msra.mxu0 %v5888_v37  ;;  %1286 = vmatpush1.msra.mxu1 %v5890_v38 }
 0x2a3   :  { %1216 = vmatprep.subr.mxu0 %v5894_v39  ;;  %1287 = vmatprep.subr.mxu1 %v5896_v40 }
 0x2a4   :  { %1217 = vmatpush1.msra.mxu0 %v5900_v41  ;;  %1288 = vmatpush1.msra.mxu1 %v5902_v42 }
 0x2a5   :  { %1218 = vmatprep.subr.mxu0 %v5906_v43  ;;  %1289 = vmatprep.subr.mxu1 %v5908_v44 }
 0x2a6   :  { %1219 = vmatpush1.msra.mxu0 %v5912_v45  ;;  %1290 = vmatpush1.msra.mxu1 %v5914_v46 }
 0x2a7   :  { %1220 = vmatprep.subr.mxu0 %v5918_v48  ;;  %1291 = vmatprep.subr.mxu1 %v5920_v3 }
 0x2a8   :  { %1221 = vmatpush1.msra.mxu0 %v5922_v4  ;;  %1292 = vmatpush1.msra.mxu1 %v5926_v60 }
 0x2a9   :  { %1222 = vmatprep.subr.mxu0 %v5928_v50  ;;  %1293 = vmatprep.subr.mxu1 %v5930_v59  ;;  %v5958_v59 = vld [vmem:[#allocation11 + $0x10] sm:$0xff] }
 0x2aa   :  { %1223 = vmatpush1.msra.mxu0 %v5934_v2  ;;  %1294 = vmatpush1.msra.mxu1 %v5936_v1  ;;  %7151 = vst [vmem:[#allocation40_spill] sm:$0xff] %v5958_v59 }
 0x2ab   :  { %1224 = vmatprep.subr.mxu0 %v5938_v0  ;;  %1295 = vmatprep.subr.mxu1 %v5942_v47 }
 0x2ac   :  { %1225 = vmatpush1.msra.mxu0 %v5944_v57  ;;  %1296 = vmatpush1.msra.mxu1 %v5946_v56 }
 0x2ad   :  { %1226 = vmatprep.subr.mxu0 %v5950_v55  ;;  %1297 = vmatprep.subr.mxu1 %v5952_v61 }
 0x2ae   :  { %1227 = vmatpush1.msra.mxu0 %v5956_v23  ;;  %1298 = vmatpush1.msra.mxu1 %v5958_v59  ;;  %v856_v23 = vld [vmem:[#allocation3 + $0x2] ss:$8 sm:$0xf] }
 0x2af   :  { %1470 = vmatprep.subr.mxu0 %v5774_v53  ;;  %1541 = vmatprep.subr.mxu1 %v5776_v52 }
 0x34e   :  { %v988_v47 = vpop.f32.mrf.mxu0  ;;  %v1059_v0 = vpop.f32.mrf.mxu1 }
 0x350   :  { %v990_v1 = vpop.f32.mrf.mxu0  ;;  %v1061_v2 = vpop.f32.mrf.mxu1 }
 0x351   :  { %v1068_v50 = vcombine.low %v988_v47, %v990_v1  ;;  %v1069_v57 = vcombine.low %v1059_v0, %v1061_v2 }
 0x353   :  { %v1076_v56 = vrot.slane %v1068_v50, %v5700_v49  ;;  %v1083_v55 = vrot.slane %v1069_v57, %v5700_v49 }
 0x355   :  { %v1084_v60 = vcombine.low %v1076_v56, %v1083_v55  ;;  %v7153_v56 = vld [vmem:[#allocation22_spill] sm:$0xff]  ;;  %v7154_v55 = vld [vmem:[#allocation23_spill] sm:$0xff] }
 0x357   :  { %v1091_v61 = vrot.slane %v1084_v60, %v5700_v49 }
 0x359   :  { %v1093_v4 = vadd.f32 %v1091_v61, %v856_v23  ;;  %v1120_v23 = vld [vmem:[#allocation5] sm:$0x1] }
 0x35b   :  { %v4947_v59 = vmul.f32 -1.442695, %v1093_v4  ;;  %v1101_v3 = vrot.slane %v1093_v4, 1  ;;  %v1112_v52 = vrot.slane %v1093_v4, 3  ;;  %v1109_v45 = vrot.slane %v1093_v4, 2 }
 0x35d   :  { %5033 = vpow2.f32 %v4947_v59  ;;  %v4948_v53 = vmul.f32 -1.442695, %v1101_v3  ;;  %v4949_v48 = vmul.f32 -1.442695, %v1112_v52 }
 0x35f   :  { %5035 = vpow2.f32 %v4948_v53 }
 0x360   :  { %5037 = vpow2.f32 %v4949_v48 }
 0x36a   :  { %v5034_v46 = vpop.eup %5033 }
 0x36b   :  { %v1097_v1 = vadd.f32 1.0, %v5034_v46 }
 0x36c   :  { %v5036_v2 = vpop.eup %5035 }
 0x36d   :  { %5039 = vrcp.f32 %v1097_v1  ;;  %v1106_v50 = vadd.f32 1.0, %v5036_v2  ;;  %v5038_v0 = vpop.eup %5037  ;;  %v7155_v1 = vld [vmem:[#allocation24_spill] sm:$0xff]  ;;  %v7156_v2 = vld [vmem:[#allocation25_spill] sm:$0xff] }
 0x36e   :  { %5041 = vtanh.f32 %v1109_v45  ;;  %v1117_v57 = vadd.f32 1.0, %v5038_v0  ;;  %v7152_v45 = vld [vmem:[#allocation21_spill] sm:$0xff]  ;;  %v7158_v0 = vld [vmem:[#allocation27_spill] sm:$0xff] }
 0x36f   :  { %5043 = vrcp.f32 %v1106_v50  ;;  %v7157_v50 = vld [vmem:[#allocation26_spill] sm:$0xff] }
 0x370   :  { %5045 = vrcp.f32 %v1117_v57  ;;  %v7163_v57 = vld [vmem:[#allocation32_spill] sm:$0xff] }
 0x37a   :  { %v5040_v60 = vpop.eup %5039 }
 0x37b   :  { %v5042_v47 = vpop.eup %5041 }
 0x37c   :  { %v5044_v61 = vpop.eup %5043  ;;  %v1122_v3 = vmul.f32 %v5042_v47, %v5040_v60  ;;  %v7159_v60 = vld [vmem:[#allocation28_spill] sm:$0xff]  ;;  %v7160_v47 = vld [vmem:[#allocation29_spill] sm:$0xff] }
 0x37d   :  { %v1121_v59 = vmul.f32 %v5044_v61, %v1120_v23  ;;  %v5046_v52 = vpop.eup %5045  ;;  %v7161_v61 = vld [vmem:[#allocation30_spill] sm:$0xff]  ;;  %v7162_v23 = vld [vmem:[#allocation31_spill] sm:$0xff] }
 0x37f   :  { %v1123_v53 = vadd.f32 %v1122_v3, %v1121_v59  ;;  %v7164_v59 = vld [vmem:[#allocation33_spill] sm:$0xff]  ;;  %v7165_v3 = vld [vmem:[#allocation34_spill] sm:$0xff] }
 0x381   :  { %5047 = vtanh.f32 %v1123_v53  ;;  %1126 = vst [vmem:[#allocation5] sm:$0x1] %v1123_v53  ;;  %v7166_v53 = vld [vmem:[#allocation35_spill] sm:$0xff] }
 0x38e   :  { %v5048_v46 = vpop.eup %5047 }
 0x38f   :  { %v1125_v4 = vmul.f32 %v5048_v46, %v5046_v52  ;;  %v7167_v52 = vld [vmem:[#allocation36_spill] sm:$0xff]  ;;  %v7168_v46 = vld [vmem:[#allocation37_spill] sm:$0xff] }
 0x391   :  { %1127 = vst [vmem:[#allocation4] sm:$0x1] %v1125_v4  ;;  %1128 = vst [vmem:[#allocation2 + $0x2] sm:$0x1] %v1125_v4  ;;  %v7169_v4 = vmov 0.0  }
 0x398   :  { %v1131_v48 = vld [vmem:[#allocation4] sm:$0x1] }
 0x399   :  { %1261 = vmatmul.mubr.f32.vlgmr.msra.gmra.mxu0 %v1131_v48  ;;  %1332 = vmatmul.mubr.f32.vlgmr.msra.gmra.mxu1 %v1131_v48  ;;  %v7170_v48 = vld [vmem:[#allocation40_spill] sm:$0xff] }
 0x39a   :  { %1471 = vmatpush1.msra.mxu0 %v5780_v62  ;;  %1542 = vmatpush1.msra.mxu1 %v5782_v54 }
 0x39b   :  { %1472 = vmatprep.subr.mxu0 %v5786_v63  ;;  %1543 = vmatprep.subr.mxu1 %v5788_v58 }
 0x39c   :  { %1473 = vmatpush1.msra.mxu0 %v5792_v51  ;;  %1544 = vmatpush1.msra.mxu1 %v5794_v5 }
 0x39d   :  { %1474 = vmatprep.subr.mxu0 %v5798_v6  ;;  %1545 = vmatprep.subr.mxu1 %v5800_v7 }
 0x39e   :  { %1475 = vmatpush1.msra.mxu0 %v5804_v8  ;;  %1546 = vmatpush1.msra.mxu1 %v5806_v9 }
 0x39f   :  { %1476 = vmatprep.subr.mxu0 %v5810_v10  ;;  %1547 = vmatprep.subr.mxu1 %v5812_v11 }
 0x3a0   :  { %1477 = vmatpush1.msra.mxu0 %v5816_v12  ;;  %1548 = vmatpush1.msra.mxu1 %v5818_v13 }
 0x3a1   :  { %1478 = vmatprep.subr.mxu0 %v5822_v14  ;;  %1549 = vmatprep.subr.mxu1 %v5824_v15 }
 0x3a2   :  { %1479 = vmatpush1.msra.mxu0 %v5828_v16  ;;  %1550 = vmatpush1.msra.mxu1 %v5830_v17 }
 0x3a3   :  { %1480 = vmatprep.subr.mxu0 %v5834_v18  ;;  %1551 = vmatprep.subr.mxu1 %v5836_v19 }
 0x3a4   :  { %1481 = vmatpush1.msra.mxu0 %v5840_v20  ;;  %1552 = vmatpush1.msra.mxu1 %v5842_v21 }
 0x3a5   :  { %1482 = vmatprep.subr.mxu0 %v5846_v22  ;;  %1553 = vmatprep.subr.mxu1 %v5848_v24 }
 0x3a6   :  { %1483 = vmatpush1.msra.mxu0 %v5852_v25  ;;  %1554 = vmatpush1.msra.mxu1 %v5854_v26 }
 0x3a7   :  { %1484 = vmatprep.subr.mxu0 %v5858_v27  ;;  %1555 = vmatprep.subr.mxu1 %v5860_v28 }
 0x3a8   :  { %1485 = vmatpush1.msra.mxu0 %v5864_v29  ;;  %1556 = vmatpush1.msra.mxu1 %v5866_v30 }
 0x3a9   :  { %1486 = vmatprep.subr.mxu0 %v5870_v31  ;;  %1557 = vmatprep.subr.mxu1 %v5872_v32 }
 0x3aa   :  { %1487 = vmatpush1.msra.mxu0 %v5876_v33  ;;  %1558 = vmatpush1.msra.mxu1 %v5878_v34 }
 0x3ab   :  { %1488 = vmatprep.subr.mxu0 %v5882_v35  ;;  %1559 = vmatprep.subr.mxu1 %v5884_v36 }
 0x3ac   :  { %1489 = vmatpush1.msra.mxu0 %v5888_v37  ;;  %1560 = vmatpush1.msra.mxu1 %v5890_v38 }
 0x3ad   :  { %1490 = vmatprep.subr.mxu0 %v5894_v39  ;;  %1561 = vmatprep.subr.mxu1 %v5896_v40 }
 0x3ae   :  { %1491 = vmatpush1.msra.mxu0 %v5900_v41  ;;  %1562 = vmatpush1.msra.mxu1 %v5902_v42 }
 0x3af   :  { %1492 = vmatprep.subr.mxu0 %v5906_v43  ;;  %1563 = vmatprep.subr.mxu1 %v5908_v44 }
 0x3b0   :  { %1493 = vmatpush1.msra.mxu0 %v7152_v45  ;;  %1564 = vmatpush1.msra.mxu1 %v7153_v56 }
 0x3b1   :  { %1494 = vmatprep.subr.mxu0 %v7154_v55  ;;  %1565 = vmatprep.subr.mxu1 %v7155_v1 }
 0x3b2   :  { %1495 = vmatpush1.msra.mxu0 %v7156_v2  ;;  %1566 = vmatpush1.msra.mxu1 %v7157_v50 }
 0x3b3   :  { %1496 = vmatprep.subr.mxu0 %v7158_v0  ;;  %1567 = vmatprep.subr.mxu1 %v7159_v60 }
 0x3b4   :  { %1497 = vmatpush1.msra.mxu0 %v7160_v47  ;;  %1568 = vmatpush1.msra.mxu1 %v7161_v61  ;;  %v7171_v61 = vld [vmem:[#allocation19_spill] sm:$0xff] }
 0x3b5   :  { %1498 = vmatprep.subr.mxu0 %v7162_v23  ;;  %1569 = vmatprep.subr.mxu1 %v7163_v57  ;;  %v7172_v23 = vld [vmem:[#allocation20_spill] sm:$0xff] }
 0x3b6   :  { %1499 = vmatpush1.msra.mxu0 %v7164_v59  ;;  %1570 = vmatpush1.msra.mxu1 %v7165_v3 }
 0x3b7   :  { %1500 = vmatprep.subr.mxu0 %v7166_v53  ;;  %1571 = vmatprep.subr.mxu1 %v7167_v52 }
 0x3b8   :  { %1501 = vmatpush1.msra.mxu0 %v7168_v46  ;;  %1534 = vmatprep.mubr.f32.mxu0 %v7169_v4 }
 0x3b9   :  { %1572 = vmatpush1.msra.mxu1 %v7170_v48  ;;  %1605 = vmatprep.mubr.f32.mxu1 %v7169_v4  ;;  %v1130_v48 = vld [vmem:[#allocation3 + $0x3] ss:$8 sm:$0xf] }
 0x3ba   :  { %1744 = vmatprep.subr.mxu0 %v7171_v61  ;;  %1815 = vmatprep.subr.mxu1 %v7172_v23 }
 0x459   :  { %v1262_v57 = vpop.f32.mrf.mxu0  ;;  %v1333_v59 = vpop.f32.mrf.mxu1 }
 0x45b   :  { %v1264_v47 = vpop.f32.mrf.mxu0  ;;  %v1335_v3 = vpop.f32.mrf.mxu1 }
 0x45c   :  { %v1342_v60 = vcombine.low %v1262_v57, %v1264_v47  ;;  %v1343_v53 = vcombine.low %v1333_v59, %v1335_v3 }
 0x45e   :  { %v1350_v52 = vrot.slane %v1342_v60, %v5700_v49  ;;  %v1357_v46 = vrot.slane %v1343_v53, %v5700_v49  ;;  %v1394_v53 = vld [vmem:[#allocation5] sm:$0x1] }
 0x460   :  { %v1358_v0 = vcombine.low %v1350_v52, %v1357_v46 }
 0x462   :  { %v1365_v50 = vrot.slane %v1358_v0, %v5700_v49 }
 0x464   :  { %v1367_v2 = vadd.f32 %v1365_v50, %v1130_v48  ;;  %v7175_v48 = vld [vmem:[#allocation23_spill] sm:$0xff] }
 0x466   :  { %v4950_v4 = vmul.f32 -1.442695, %v1367_v2  ;;  %v1375_v1 = vrot.slane %v1367_v2, 1  ;;  %v1386_v23 = vrot.slane %v1367_v2, 3  ;;  %v1383_v45 = vrot.slane %v1367_v2, 2 }
 0x468   :  { %5049 = vpow2.f32 %v4950_v4  ;;  %v4951_v61 = vmul.f32 -1.442695, %v1375_v1  ;;  %v4952_v55 = vmul.f32 -1.442695, %v1386_v23  ;;  %v7174_v4 = vld [vmem:[#allocation22_spill] sm:$0xff] }
 0x46a   :  { %5051 = vpow2.f32 %v4951_v61 }
 0x46b   :  { %5053 = vpow2.f32 %v4952_v55 }
 0x475   :  { %v5050_v56 = vpop.eup %5049 }
 0x476   :  { %v1371_v47 = vadd.f32 1.0, %v5050_v56 }
 0x477   :  { %v5052_v57 = vpop.eup %5051 }
 0x478   :  { %5055 = vrcp.f32 %v1371_v47  ;;  %v1380_v60 = vadd.f32 1.0, %v5052_v57  ;;  %v5054_v59 = vpop.eup %5053  ;;  %v7176_v47 = vld [vmem:[#allocation24_spill] sm:$0xff]  ;;  %v7177_v57 = vld [vmem:[#allocation25_spill] sm:$0xff] }
 0x479   :  { %5057 = vtanh.f32 %v1383_v45  ;;  %v1391_v52 = vadd.f32 1.0, %v5054_v59  ;;  %v7173_v45 = vld [vmem:[#allocation21_spill] sm:$0xff]  ;;  %v7179_v59 = vld [vmem:[#allocation27_spill] sm:$0xff] }
 0x47a   :  { %5059 = vrcp.f32 %v1380_v60  ;;  %v7178_v60 = vld [vmem:[#allocation26_spill] sm:$0xff] }
 0x47b   :  { %5061 = vrcp.f32 %v1391_v52  ;;  %v7184_v52 = vld [vmem:[#allocation32_spill] sm:$0xff] }
 0x485   :  { %v5056_v0 = vpop.eup %5055 }
 0x486   :  { %v5058_v3 = vpop.eup %5057 }
 0x487   :  { %v5060_v50 = vpop.eup %5059  ;;  %v1396_v1 = vmul.f32 %v5058_v3, %v5056_v0  ;;  %v7180_v0 = vld [vmem:[#allocation28_spill] sm:$0xff]  ;;  %v7181_v3 = vld [vmem:[#allocation29_spill] sm:$0xff] }
 0x488   :  { %v1395_v46 = vmul.f32 %v5060_v50, %v1394_v53  ;;  %v5062_v2 = vpop.eup %5061  ;;  %v7182_v50 = vld [vmem:[#allocation30_spill] sm:$0xff]  ;;  %v7183_v53 = vld [vmem:[#allocation31_spill] sm:$0xff] }
 0x48a   :  { %v1397_v61 = vadd.f32 %v1396_v1, %v1395_v46  ;;  %v7185_v46 = vld [vmem:[#allocation33_spill] sm:$0xff]  ;;  %v7186_v1 = vld [vmem:[#allocation34_spill] sm:$0xff] }
 0x48c   :  { %5063 = vtanh.f32 %v1397_v61  ;;  %1400 = vst [vmem:[#allocation5] sm:$0x1] %v1397_v61  ;;  %v7187_v61 = vld [vmem:[#allocation35_spill] sm:$0xff] }
 0x499   :  { %v5064_v56 = vpop.eup %5063 }
 0x49a   :  { %v1399_v23 = vmul.f32 %v5064_v56, %v5062_v2  ;;  %v7188_v2 = vld [vmem:[#allocation36_spill] sm:$0xff]  ;;  %v7189_v56 = vld [vmem:[#allocation37_spill] sm:$0xff] }
 0x49c   :  { %1401 = vst [vmem:[#allocation4] sm:$0x1] %v1399_v23  ;;  %1402 = vst [vmem:[#allocation2 + $0x3] sm:$0x1] %v1399_v23  ;;  %v7190_v23 = vmov 0.0  }
 0x4a3   :  { %v1405_v55 = vld [vmem:[#allocation4] sm:$0x1] }
 0x4a4   :  { %1535 = vmatmul.mubr.f32.vlgmr.msra.gmra.mxu0 %v1405_v55  ;;  %1606 = vmatmul.mubr.f32.vlgmr.msra.gmra.mxu1 %v1405_v55  ;;  %v7191_v55 = vld [vmem:[#allocation40_spill] sm:$0xff] }
 0x4a5   :  { %1745 = vmatpush1.msra.mxu0 %v5780_v62  ;;  %1816 = vmatpush1.msra.mxu1 %v5782_v54 }
 0x4a6   :  { %1746 = vmatprep.subr.mxu0 %v5786_v63  ;;  %1817 = vmatprep.subr.mxu1 %v5788_v58 }
 0x4a7   :  { %1747 = vmatpush1.msra.mxu0 %v5792_v51  ;;  %1818 = vmatpush1.msra.mxu1 %v5794_v5 }
 0x4a8   :  { %1748 = vmatprep.subr.mxu0 %v5798_v6  ;;  %1819 = vmatprep.subr.mxu1 %v5800_v7 }
 0x4a9   :  { %1749 = vmatpush1.msra.mxu0 %v5804_v8  ;;  %1820 = vmatpush1.msra.mxu1 %v5806_v9 }
 0x4aa   :  { %1750 = vmatprep.subr.mxu0 %v5810_v10  ;;  %1821 = vmatprep.subr.mxu1 %v5812_v11 }
 0x4ab   :  { %1751 = vmatpush1.msra.mxu0 %v5816_v12  ;;  %1822 = vmatpush1.msra.mxu1 %v5818_v13 }
 0x4ac   :  { %1752 = vmatprep.subr.mxu0 %v5822_v14  ;;  %1823 = vmatprep.subr.mxu1 %v5824_v15 }
 0x4ad   :  { %1753 = vmatpush1.msra.mxu0 %v5828_v16  ;;  %1824 = vmatpush1.msra.mxu1 %v5830_v17 }
 0x4ae   :  { %1754 = vmatprep.subr.mxu0 %v5834_v18  ;;  %1825 = vmatprep.subr.mxu1 %v5836_v19 }
 0x4af   :  { %1755 = vmatpush1.msra.mxu0 %v5840_v20  ;;  %1826 = vmatpush1.msra.mxu1 %v5842_v21 }
 0x4b0   :  { %1756 = vmatprep.subr.mxu0 %v5846_v22  ;;  %1827 = vmatprep.subr.mxu1 %v5848_v24 }
 0x4b1   :  { %1757 = vmatpush1.msra.mxu0 %v5852_v25  ;;  %1828 = vmatpush1.msra.mxu1 %v5854_v26 }
 0x4b2   :  { %1758 = vmatprep.subr.mxu0 %v5858_v27  ;;  %1829 = vmatprep.subr.mxu1 %v5860_v28 }
 0x4b3   :  { %1759 = vmatpush1.msra.mxu0 %v5864_v29  ;;  %1830 = vmatpush1.msra.mxu1 %v5866_v30 }
 0x4b4   :  { %1760 = vmatprep.subr.mxu0 %v5870_v31  ;;  %1831 = vmatprep.subr.mxu1 %v5872_v32 }
 0x4b5   :  { %1761 = vmatpush1.msra.mxu0 %v5876_v33  ;;  %1832 = vmatpush1.msra.mxu1 %v5878_v34 }
 0x4b6   :  { %1762 = vmatprep.subr.mxu0 %v5882_v35  ;;  %1833 = vmatprep.subr.mxu1 %v5884_v36 }
 0x4b7   :  { %1763 = vmatpush1.msra.mxu0 %v5888_v37  ;;  %1834 = vmatpush1.msra.mxu1 %v5890_v38 }
 0x4b8   :  { %1764 = vmatprep.subr.mxu0 %v5894_v39  ;;  %1835 = vmatprep.subr.mxu1 %v5896_v40 }
 0x4b9   :  { %1765 = vmatpush1.msra.mxu0 %v5900_v41  ;;  %1836 = vmatpush1.msra.mxu1 %v5902_v42 }
 0x4ba   :  { %1766 = vmatprep.subr.mxu0 %v5906_v43  ;;  %1837 = vmatprep.subr.mxu1 %v5908_v44 }
 0x4bb   :  { %1767 = vmatpush1.msra.mxu0 %v7173_v45  ;;  %1838 = vmatpush1.msra.mxu1 %v7174_v4 }
 0x4bc   :  { %1768 = vmatprep.subr.mxu0 %v7175_v48  ;;  %1839 = vmatprep.subr.mxu1 %v7176_v47 }
 0x4bd   :  { %1769 = vmatpush1.msra.mxu0 %v7177_v57  ;;  %1840 = vmatpush1.msra.mxu1 %v7178_v60 }
 0x4be   :  { %1770 = vmatprep.subr.mxu0 %v7179_v59  ;;  %1841 = vmatprep.subr.mxu1 %v7180_v0 }
 0x4bf   :  { %1771 = vmatpush1.msra.mxu0 %v7181_v3  ;;  %1842 = vmatpush1.msra.mxu1 %v7182_v50  ;;  %v7192_v50 = vld [vmem:[#allocation19_spill] sm:$0xff] }
 0x4c0   :  { %1772 = vmatprep.subr.mxu0 %v7183_v53  ;;  %1843 = vmatprep.subr.mxu1 %v7184_v52  ;;  %v7193_v53 = vld [vmem:[#allocation20_spill] sm:$0xff] }
 0x4c1   :  { %1773 = vmatpush1.msra.mxu0 %v7185_v46  ;;  %1844 = vmatpush1.msra.mxu1 %v7186_v1 }
 0x4c2   :  { %1774 = vmatprep.subr.mxu0 %v7187_v61  ;;  %1845 = vmatprep.subr.mxu1 %v7188_v2 }
 0x4c3   :  { %1775 = vmatpush1.msra.mxu0 %v7189_v56  ;;  %1808 = vmatprep.mubr.f32.mxu0 %v7190_v23 }
 0x4c4   :  { %1846 = vmatpush1.msra.mxu1 %v7191_v55  ;;  %1879 = vmatprep.mubr.f32.mxu1 %v7190_v23  ;;  %v1404_v55 = vld [vmem:[#allocation3 + $0x4] ss:$8 sm:$0xf] }
 0x4c5   :  { %2018 = vmatprep.subr.mxu0 %v7192_v50  ;;  %2089 = vmatprep.subr.mxu1 %v7193_v53 }
 0x564   :  { %v1536_v52 = vpop.f32.mrf.mxu0  ;;  %v1607_v46 = vpop.f32.mrf.mxu1 }
 0x566   :  { %v1538_v3 = vpop.f32.mrf.mxu0  ;;  %v1609_v1 = vpop.f32.mrf.mxu1 }
 0x567   :  { %v1616_v0 = vcombine.low %v1536_v52, %v1538_v3  ;;  %v1617_v61 = vcombine.low %v1607_v46, %v1609_v1 }
 0x569   :  { %v1624_v2 = vrot.slane %v1616_v0, %v5700_v49  ;;  %v1631_v56 = vrot.slane %v1617_v61, %v5700_v49 }
 0x56b   :  { %v1632_v59 = vcombine.low %v1624_v2, %v1631_v56  ;;  %v1668_v2 = vld [vmem:[#allocation5] sm:$0x1] }
 0x56d   :  { %v1639_v60 = vrot.slane %v1632_v59, %v5700_v49 }
 0x56f   :  { %v1641_v57 = vadd.f32 %v1639_v60, %v1404_v55 }
 0x571   :  { %v4953_v23 = vmul.f32 -1.442695, %v1641_v57  ;;  %v1649_v47 = vrot.slane %v1641_v57, 1  ;;  %v1660_v53 = vrot.slane %v1641_v57, 3  ;;  %v1657_v45 = vrot.slane %v1641_v57, 2 }
 0x573   :  { %5065 = vpow2.f32 %v4953_v23  ;;  %v4954_v50 = vmul.f32 -1.442695, %v1649_v47  ;;  %v4955_v48 = vmul.f32 -1.442695, %v1660_v53 }
 0x575   :  { %5067 = vpow2.f32 %v4954_v50 }
 0x576   :  { %5069 = vpow2.f32 %v4955_v48 }
 0x580   :  { %v5066_v4 = vpop.eup %5065 }
 0x581   :  { %v1645_v3 = vadd.f32 1.0, %v5066_v4 }
 0x582   :  { %v5068_v52 = vpop.eup %5067 }
 0x583   :  { %5071 = vrcp.f32 %v1645_v3  ;;  %v1654_v0 = vadd.f32 1.0, %v5068_v52  ;;  %v5070_v46 = vpop.eup %5069 }
 0x584   :  { %5073 = vtanh.f32 %v1657_v45  ;;  %v1665_v61 = vadd.f32 1.0, %v5070_v46 }
 0x585   :  { %5075 = vrcp.f32 %v1654_v0 }
 0x586   :  { %5077 = vrcp.f32 %v1665_v61  ;;  %v2289_v61 = vld [vmem:[#allocation11 + $0x1e8] sm:$0xff] }
 0x590   :  { %v5072_v59 = vpop.eup %5071 }
 0x591   :  { %v5074_v1 = vpop.eup %5073 }
 0x592   :  { %v5076_v60 = vpop.eup %5075  ;;  %v1670_v47 = vmul.f32 %v5074_v1, %v5072_v59 }
 0x593   :  { %v1669_v56 = vmul.f32 %v5076_v60, %v1668_v2  ;;  %v5078_v57 = vpop.eup %5077  ;;  %v2291_v2 = vld [vmem:[#allocation11 + $0x1f8] sm:$0xff] }
 0x595   :  { %v1671_v23 = vadd.f32 %v1670_v47, %v1669_v56  ;;  %v2288_v56 = vld [vmem:[#allocation11 + $0x1e0] sm:$0xff]  ;;  %v2290_v47 = vld [vmem:[#allocation11 + $0x1f0] sm:$0xff] }
 0x597   :  { %5079 = vtanh.f32 %v1671_v23  ;;  %1674 = vst [vmem:[#allocation5] sm:$0x1] %v1671_v23  ;;  %v2285_v23 = vld [vmem:[#allocation11 + $0x1c8] sm:$0xff] }
 0x59e   :  { %v1942_v53 = vld [vmem:[#allocation5] sm:$0x1] }
 0x5a4   :  { %v5080_v4 = vpop.eup %5079 }
 0x5a5   :  { %v1673_v55 = vmul.f32 %v5080_v4, %v5078_v57  ;;  %v2287_v57 = vld [vmem:[#allocation11 + $0x1d8] sm:$0xff]  ;;  %v2284_v4 = vld [vmem:[#allocation11 + $0x1c0] sm:$0xff] }
 0x5a7   :  { %1675 = vst [vmem:[#allocation4] sm:$0x1] %v1673_v55  ;;  %1676 = vst [vmem:[#allocation2 + $0x4] sm:$0x1] %v1673_v55  ;;  %v2286_v55 = vld [vmem:[#allocation11 + $0x1d0] sm:$0xff] }
 0x5ae   :  { %v1679_v48 = vld [vmem:[#allocation4] sm:$0x1] }
 0x5af   :  { %1809 = vmatmul.mubr.f32.vlgmr.msra.gmra.mxu0 %v1679_v48  ;;  %1880 = vmatmul.mubr.f32.vlgmr.msra.gmra.mxu1 %v1679_v48  ;;  %v2281_v48 = vld [vmem:[#allocation11 + $0x1a8] sm:$0xff] }
 0x5b0   :  { %2019 = vmatpush1.msra.mxu0 %v5780_v62  ;;  %2090 = vmatpush1.msra.mxu1 %v5782_v54  ;;  %v7194_v62 = vld [vmem:[#allocation21_spill] sm:$0xff]  ;;  %v7195_v54 = vld [vmem:[#allocation22_spill] sm:$0xff] }
 0x5b1   :  { %2020 = vmatprep.subr.mxu0 %v5786_v63  ;;  %2091 = vmatprep.subr.mxu1 %v5788_v58  ;;  %v7196_v63 = vld [vmem:[#allocation23_spill] sm:$0xff]  ;;  %v7197_v58 = vld [vmem:[#allocation24_spill] sm:$0xff] }
 0x5b2   :  { %2021 = vmatpush1.msra.mxu0 %v5792_v51  ;;  %2092 = vmatpush1.msra.mxu1 %v5794_v5  ;;  %v7198_v51 = vld [vmem:[#allocation25_spill] sm:$0xff]  ;;  %v7199_v5 = vld [vmem:[#allocation26_spill] sm:$0xff] }
 0x5b3   :  { %2022 = vmatprep.subr.mxu0 %v5798_v6  ;;  %2093 = vmatprep.subr.mxu1 %v5800_v7  ;;  %v7200_v6 = vld [vmem:[#allocation27_spill] sm:$0xff]  ;;  %v7201_v7 = vld [vmem:[#allocation28_spill] sm:$0xff] }
 0x5b4   :  { %2023 = vmatpush1.msra.mxu0 %v5804_v8  ;;  %2094 = vmatpush1.msra.mxu1 %v5806_v9  ;;  %v7202_v8 = vld [vmem:[#allocation29_spill] sm:$0xff]  ;;  %v7203_v9 = vld [vmem:[#allocation30_spill] sm:$0xff] }
 0x5b5   :  { %2024 = vmatprep.subr.mxu0 %v5810_v10  ;;  %2095 = vmatprep.subr.mxu1 %v5812_v11  ;;  %v7204_v10 = vld [vmem:[#allocation31_spill] sm:$0xff]  ;;  %v7205_v11 = vld [vmem:[#allocation32_spill] sm:$0xff] }
 0x5b6   :  { %2025 = vmatpush1.msra.mxu0 %v5816_v12  ;;  %2096 = vmatpush1.msra.mxu1 %v5818_v13  ;;  %v7206_v12 = vld [vmem:[#allocation33_spill] sm:$0xff]  ;;  %v7207_v13 = vld [vmem:[#allocation34_spill] sm:$0xff] }
 0x5b7   :  { %2026 = vmatprep.subr.mxu0 %v5822_v14  ;;  %2097 = vmatprep.subr.mxu1 %v5824_v15  ;;  %v7208_v14 = vld [vmem:[#allocation35_spill] sm:$0xff]  ;;  %v7209_v15 = vld [vmem:[#allocation36_spill] sm:$0xff] }
 0x5b8   :  { %2027 = vmatpush1.msra.mxu0 %v5828_v16  ;;  %2098 = vmatpush1.msra.mxu1 %v5830_v17  ;;  %v7210_v16 = vld [vmem:[#allocation37_spill] sm:$0xff]  ;;  %v7211_v17 = vmov 0.0  }
 0x5b9   :  { %2028 = vmatprep.subr.mxu0 %v5834_v18  ;;  %2099 = vmatprep.subr.mxu1 %v5836_v19  ;;  %v7212_v18 = vld [vmem:[#allocation40_spill] sm:$0xff] }
 0x5ba   :  { %2029 = vmatpush1.msra.mxu0 %v5840_v20  ;;  %2100 = vmatpush1.msra.mxu1 %v5842_v21 }
 0x5bb   :  { %2030 = vmatprep.subr.mxu0 %v5846_v22  ;;  %2101 = vmatprep.subr.mxu1 %v5848_v24 }
 0x5bc   :  { %2031 = vmatpush1.msra.mxu0 %v5852_v25  ;;  %2102 = vmatpush1.msra.mxu1 %v5854_v26 }
 0x5bd   :  { %2032 = vmatprep.subr.mxu0 %v5858_v27  ;;  %2103 = vmatprep.subr.mxu1 %v5860_v28 }
 0x5be   :  { %2033 = vmatpush1.msra.mxu0 %v5864_v29  ;;  %2104 = vmatpush1.msra.mxu1 %v5866_v30  ;;  %v1678_v30 = vld [vmem:[#allocation3 + $0x5] ss:$8 sm:$0xf] }
 0x5bf   :  { %2034 = vmatprep.subr.mxu0 %v5870_v31  ;;  %2105 = vmatprep.subr.mxu1 %v5872_v32 }
 0x5c0   :  { %2035 = vmatpush1.msra.mxu0 %v5876_v33  ;;  %2106 = vmatpush1.msra.mxu1 %v5878_v34 }
 0x5c1   :  { %2036 = vmatprep.subr.mxu0 %v5882_v35  ;;  %2107 = vmatprep.subr.mxu1 %v5884_v36 }
 0x5c2   :  { %2037 = vmatpush1.msra.mxu0 %v5888_v37  ;;  %2108 = vmatpush1.msra.mxu1 %v5890_v38 }
 0x5c3   :  { %2038 = vmatprep.subr.mxu0 %v5894_v39  ;;  %2109 = vmatprep.subr.mxu1 %v5896_v40 }
 0x5c4   :  { %2039 = vmatpush1.msra.mxu0 %v5900_v41  ;;  %2110 = vmatpush1.msra.mxu1 %v5902_v42 }
 0x5c5   :  { %2040 = vmatprep.subr.mxu0 %v5906_v43  ;;  %2111 = vmatprep.subr.mxu1 %v5908_v44 }
 0x5c6   :  { %2041 = vmatpush1.msra.mxu0 %v7194_v62  ;;  %2112 = vmatpush1.msra.mxu1 %v7195_v54  ;;  %v2283_v62 = vld [vmem:[#allocation11 + $0x1b8] sm:$0xff]  ;;  %v2280_v54 = vld [vmem:[#allocation11 + $0x1a0] sm:$0xff] }
 0x5c7   :  { %2042 = vmatprep.subr.mxu0 %v7196_v63  ;;  %2113 = vmatprep.subr.mxu1 %v7197_v58  ;;  %v2282_v63 = vld [vmem:[#allocation11 + $0x1b0] sm:$0xff]  ;;  %v2277_v58 = vld [vmem:[#allocation11 + $0x188] sm:$0xff] }
 0x5c8   :  { %2043 = vmatpush1.msra.mxu0 %v7198_v51  ;;  %2114 = vmatpush1.msra.mxu1 %v7199_v5  ;;  %v2279_v51 = vld [vmem:[#allocation11 + $0x198] sm:$0xff]  ;;  %v2276_v5 = vld [vmem:[#allocation11 + $0x180] sm:$0xff] }
 0x5c9   :  { %2044 = vmatprep.subr.mxu0 %v7200_v6  ;;  %2115 = vmatprep.subr.mxu1 %v7201_v7  ;;  %v2278_v6 = vld [vmem:[#allocation11 + $0x190] sm:$0xff]  ;;  %v2273_v7 = vld [vmem:[#allocation11 + $0x168] sm:$0xff] }
 0x5ca   :  { %2045 = vmatpush1.msra.mxu0 %v7202_v8  ;;  %2116 = vmatpush1.msra.mxu1 %v7203_v9  ;;  %v2275_v8 = vld [vmem:[#allocation11 + $0x178] sm:$0xff]  ;;  %v2272_v9 = vld [vmem:[#allocation11 + $0x160] sm:$0xff] }
 0x5cb   :  { %2046 = vmatprep.subr.mxu0 %v7204_v10  ;;  %2117 = vmatprep.subr.mxu1 %v7205_v11  ;;  %v2274_v10 = vld [vmem:[#allocation11 + $0x170] sm:$0xff]  ;;  %v2269_v11 = vld [vmem:[#allocation11 + $0x148] sm:$0xff] }
 0x5cc   :  { %2047 = vmatpush1.msra.mxu0 %v7206_v12  ;;  %2118 = vmatpush1.msra.mxu1 %v7207_v13  ;;  %v2271_v12 = vld [vmem:[#allocation11 + $0x158] sm:$0xff]  ;;  %v2268_v13 = vld [vmem:[#allocation11 + $0x140] sm:$0xff] }
 0x5cd   :  { %2048 = vmatprep.subr.mxu0 %v7208_v14  ;;  %2119 = vmatprep.subr.mxu1 %v7209_v15  ;;  %v2270_v14 = vld [vmem:[#allocation11 + $0x150] sm:$0xff]  ;;  %v2265_v15 = vld [vmem:[#allocation11 + $0x128] sm:$0xff] }
 0x5ce   :  { %2049 = vmatpush1.msra.mxu0 %v7210_v16  ;;  %2082 = vmatprep.mubr.f32.mxu0 %v7211_v17  ;;  %v2267_v16 = vld [vmem:[#allocation11 + $0x138] sm:$0xff] }
 0x5cf   :  { %2120 = vmatpush1.msra.mxu1 %v7212_v18  ;;  %2153 = vmatprep.mubr.f32.mxu1 %v7211_v17  ;;  %v2264_v18 = vld [vmem:[#allocation11 + $0x120] sm:$0xff] }
 0x5d0   :  { %2292 = vmatprep.subr.mxu0 %v2289_v61  ;;  %2363 = vmatprep.subr.mxu1 %v2291_v2  ;;  %v2228_v61 = vld [vmem:[#allocation11] sm:$0xff]  ;;  %v2230_v2 = vld [vmem:[#allocation11 + $0x10] sm:$0xff] }
 0x66f   :  { %v1810_v19 = vpop.f32.mrf.mxu0  ;;  %v1881_v20 = vpop.f32.mrf.mxu1 }
 0x671   :  { %v1812_v21 = vpop.f32.mrf.mxu0  ;;  %v1883_v22 = vpop.f32.mrf.mxu1 }
 0x672   :  { %v1890_v24 = vcombine.low %v1810_v19, %v1812_v21  ;;  %v1891_v25 = vcombine.low %v1881_v20, %v1883_v22  ;;  %v2266_v19 = vld [vmem:[#allocation11 + $0x130] sm:$0xff]  ;;  %v2261_v20 = vld [vmem:[#allocation11 + $0x108] sm:$0xff]  ;;  %v2263_v21 = vld [vmem:[#allocation11 + $0x118] sm:$0xff] }
 0x673   :  { %v2260_v22 = vld [vmem:[#allocation11 + $0x100] sm:$0xff] }
 0x674   :  { %v1898_v26 = vrot.slane %v1890_v24, %v5700_v49  ;;  %v1905_v27 = vrot.slane %v1891_v25, %v5700_v49  ;;  %v2262_v24 = vld [vmem:[#allocation11 + $0x110] sm:$0xff]  ;;  %v2257_v25 = vld [vmem:[#allocation11 + $0xe8] sm:$0xff] }
 0x676   :  { %v1906_v28 = vcombine.low %v1898_v26, %v1905_v27  ;;  %v2259_v26 = vld [vmem:[#allocation11 + $0xf8] sm:$0xff]  ;;  %v2256_v27 = vld [vmem:[#allocation11 + $0xe0] sm:$0xff] }
 0x678   :  { %v1913_v29 = vrot.slane %v1906_v28, %v5700_v49  ;;  %v2258_v28 = vld [vmem:[#allocation11 + $0xf0] sm:$0xff] }
 0x67a   :  { %v1915_v31 = vadd.f32 %v1913_v29, %v1678_v30  ;;  %v2253_v29 = vld [vmem:[#allocation11 + $0xc8] sm:$0xff]  ;;  %v2255_v30 = vld [vmem:[#allocation11 + $0xd8] sm:$0xff] }
 0x67c   :  { %v4956_v32 = vmul.f32 -1.442695, %v1915_v31  ;;  %v1923_v33 = vrot.slane %v1915_v31, 1  ;;  %v1934_v35 = vrot.slane %v1915_v31, 3  ;;  %v1931_v38 = vrot.slane %v1915_v31, 2  ;;  %v2252_v31 = vld [vmem:[#allocation11 + $0xc0] sm:$0xff] }
 0x67e   :  { %5081 = vpow2.f32 %v4956_v32  ;;  %v4957_v34 = vmul.f32 -1.442695, %v1923_v33  ;;  %v4958_v36 = vmul.f32 -1.442695, %v1934_v35  ;;  %v2254_v32 = vld [vmem:[#allocation11 + $0xd0] sm:$0xff]  ;;  %v2249_v33 = vld [vmem:[#allocation11 + $0xa8] sm:$0xff] }
 0x67f   :  { %v2248_v35 = vld [vmem:[#allocation11 + $0xa0] sm:$0xff] }
 0x680   :  { %5083 = vpow2.f32 %v4957_v34  ;;  %v2251_v34 = vld [vmem:[#allocation11 + $0xb8] sm:$0xff] }
 0x681   :  { %5085 = vpow2.f32 %v4958_v36  ;;  %v2250_v36 = vld [vmem:[#allocation11 + $0xb0] sm:$0xff] }
 0x68b   :  { %v5082_v37 = vpop.eup %5081 }
 0x68c   :  { %v1919_v39 = vadd.f32 1.0, %v5082_v37  ;;  %v2245_v37 = vld [vmem:[#allocation11 + $0x88] sm:$0xff] }
 0x68d   :  { %v5084_v40 = vpop.eup %5083 }
 0x68e   :  { %5087 = vrcp.f32 %v1919_v39  ;;  %v1928_v41 = vadd.f32 1.0, %v5084_v40  ;;  %v5086_v42 = vpop.eup %5085  ;;  %v2244_v39 = vld [vmem:[#allocation11 + $0x80] sm:$0xff]  ;;  %v2246_v40 = vld [vmem:[#allocation11 + $0x90] sm:$0xff] }
 0x68f   :  { %5089 = vtanh.f32 %v1931_v38  ;;  %v1939_v50 = vadd.f32 1.0, %v5086_v42  ;;  %v2247_v38 = vld [vmem:[#allocation11 + $0x98] sm:$0xff] }
 0x690   :  { %5091 = vrcp.f32 %v1928_v41  ;;  %v2241_v41 = vld [vmem:[#allocation11 + $0x68] sm:$0xff]  ;;  %v2243_v42 = vld [vmem:[#allocation11 + $0x78] sm:$0xff] }
 0x691   :  { %5093 = vrcp.f32 %v1939_v50  ;;  %v2239_v50 = vld [vmem:[#allocation11 + $0x58] sm:$0xff] }
 0x69b   :  { %v5088_v43 = vpop.eup %5087 }
 0x69c   :  { %v5090_v44 = vpop.eup %5089 }
 0x69d   :  { %v5092_v45 = vpop.eup %5091  ;;  %v1944_v52 = vmul.f32 %v5090_v44, %v5088_v43  ;;  %v2240_v43 = vld [vmem:[#allocation11 + $0x60] sm:$0xff]  ;;  %v2242_v44 = vld [vmem:[#allocation11 + $0x70] sm:$0xff] }
 0x69e   :  { %v1943_v3 = vmul.f32 %v5092_v45, %v1942_v53  ;;  %v5094_v46 = vpop.eup %5093  ;;  %v2237_v45 = vld [vmem:[#allocation11 + $0x48] sm:$0xff]  ;;  %v2236_v53 = vld [vmem:[#allocation11 + $0x40] sm:$0xff] }
 0x6a0   :  { %v1945_v0 = vadd.f32 %v1944_v52, %v1943_v3  ;;  %v2238_v3 = vld [vmem:[#allocation11 + $0x50] sm:$0xff]  ;;  %v2233_v52 = vld [vmem:[#allocation11 + $0x28] sm:$0xff] }
 0x6a2   :  { %5095 = vtanh.f32 %v1945_v0  ;;  %1948 = vst [vmem:[#allocation5] sm:$0x1] %v1945_v0  ;;  %v2235_v0 = vld [vmem:[#allocation11 + $0x38] sm:$0xff] }
 0x6af   :  { %v5096_v59 = vpop.eup %5095 }
 0x6b0   :  { %v1947_v1 = vmul.f32 %v5096_v59, %v5094_v46  ;;  %v2232_v46 = vld [vmem:[#allocation11 + $0x20] sm:$0xff]  ;;  %v2234_v59 = vld [vmem:[#allocation11 + $0x30] sm:$0xff] }
 0x6b2   :  { %1950 = vst [vmem:[#allocation2 + $0x5] sm:$0x1] %v1947_v1  ;;  %1949 = vst [vmem:[#allocation4] sm:$0x1] %v1947_v1  ;;  %v2229_v1 = vld [vmem:[#allocation11 + $0x8] sm:$0xff] }
 0x6b9   :  { %v1953_v60 = vld [vmem:[#allocation4] sm:$0x1] }
 0x6ba   :  { %2083 = vmatmul.mubr.f32.vlgmr.msra.gmra.mxu0 %v1953_v60  ;;  %2154 = vmatmul.mubr.f32.vlgmr.msra.gmra.mxu1 %v1953_v60  ;;  %v2231_v60 = vld [vmem:[#allocation11 + $0x18] sm:$0xff] }
 0x6bb   :  { %2356 = vmatprep.mubr.f32.mxu0 %v7211_v17  ;;  %2427 = vmatprep.mubr.f32.mxu1 %v7211_v17 }
 0x6bc   :  { %2293 = vmatpush1.msra.mxu0 %v2288_v56  ;;  %2364 = vmatpush1.msra.mxu1 %v2290_v47 }
 0x6bd   :  { %2294 = vmatprep.subr.mxu0 %v2285_v23  ;;  %2365 = vmatprep.subr.mxu1 %v2287_v57 }
 0x6be   :  { %2295 = vmatpush1.msra.mxu0 %v2284_v4  ;;  %2366 = vmatpush1.msra.mxu1 %v2286_v55 }
 0x6bf   :  { %2296 = vmatprep.subr.mxu0 %v2281_v48  ;;  %2367 = vmatprep.subr.mxu1 %v2283_v62 }
 0x6c0   :  { %2297 = vmatpush1.msra.mxu0 %v2280_v54  ;;  %2368 = vmatpush1.msra.mxu1 %v2282_v63 }
 0x6c1   :  { %2298 = vmatprep.subr.mxu0 %v2277_v58  ;;  %2369 = vmatprep.subr.mxu1 %v2279_v51  ;;  %v1952_v58 = vld [vmem:[#allocation3 + $0x6] ss:$8 sm:$0xf] }
 0x6c2   :  { %2299 = vmatpush1.msra.mxu0 %v2276_v5  ;;  %2370 = vmatpush1.msra.mxu1 %v2278_v6 }
 0x6c3   :  { %2300 = vmatprep.subr.mxu0 %v2273_v7  ;;  %2371 = vmatprep.subr.mxu1 %v2275_v8 }
 0x6c4   :  { %2301 = vmatpush1.msra.mxu0 %v2272_v9  ;;  %2372 = vmatpush1.msra.mxu1 %v2274_v10 }
 0x6c5   :  { %2302 = vmatprep.subr.mxu0 %v2269_v11  ;;  %2373 = vmatprep.subr.mxu1 %v2271_v12 }
 0x6c6   :  { %2303 = vmatpush1.msra.mxu0 %v2268_v13  ;;  %2374 = vmatpush1.msra.mxu1 %v2270_v14 }
 0x6c7   :  { %2304 = vmatprep.subr.mxu0 %v2265_v15  ;;  %2375 = vmatprep.subr.mxu1 %v2267_v16 }
 0x6c8   :  { %2305 = vmatpush1.msra.mxu0 %v2264_v18  ;;  %2376 = vmatpush1.msra.mxu1 %v2266_v19 }
 0x6c9   :  { %2306 = vmatprep.subr.mxu0 %v2261_v20  ;;  %2377 = vmatprep.subr.mxu1 %v2263_v21  ;;  %v2216_v21 = vld [vmem:[#allocation5] sm:$0x1] }
 0x6ca   :  { %2307 = vmatpush1.msra.mxu0 %v2260_v22  ;;  %2378 = vmatpush1.msra.mxu1 %v2262_v24 }
 0x6cb   :  { %2308 = vmatprep.subr.mxu0 %v2257_v25  ;;  %2379 = vmatprep.subr.mxu1 %v2259_v26 }
 0x6cc   :  { %2309 = vmatpush1.msra.mxu0 %v2256_v27  ;;  %2380 = vmatpush1.msra.mxu1 %v2258_v28 }
 0x6cd   :  { %2310 = vmatprep.subr.mxu0 %v2253_v29  ;;  %2381 = vmatprep.subr.mxu1 %v2255_v30  ;;  %v2570_v30 = vld [vmem:[#allocation9 + $0x3e8] sm:$0xff] }
 0x6ce   :  { %2311 = vmatpush1.msra.mxu0 %v2252_v31  ;;  %2382 = vmatpush1.msra.mxu1 %v2254_v32  ;;  %v2572_v31 = vld [vmem:[#allocation9 + $0x3f8] sm:$0xff]  ;;  %v2569_v32 = vld [vmem:[#allocation9 + $0x3e0] sm:$0xff] }
 0x6cf   :  { %2312 = vmatprep.subr.mxu0 %v2249_v33  ;;  %2383 = vmatprep.subr.mxu1 %v2251_v34  ;;  %v2571_v33 = vld [vmem:[#allocation9 + $0x3f0] sm:$0xff]  ;;  %v2566_v34 = vld [vmem:[#allocation9 + $0x3c8] sm:$0xff] }
 0x6d0   :  { %2313 = vmatpush1.msra.mxu0 %v2248_v35  ;;  %2384 = vmatpush1.msra.mxu1 %v2250_v36  ;;  %v2568_v35 = vld [vmem:[#allocation9 + $0x3d8] sm:$0xff]  ;;  %v2565_v36 = vld [vmem:[#allocation9 + $0x3c0] sm:$0xff] }
 0x6d1   :  { %2314 = vmatprep.subr.mxu0 %v2245_v37  ;;  %2385 = vmatprep.subr.mxu1 %v2247_v38  ;;  %v2567_v37 = vld [vmem:[#allocation9 + $0x3d0] sm:$0xff]  ;;  %v2562_v38 = vld [vmem:[#allocation9 + $0x3a8] sm:$0xff] }
 0x6d2   :  { %2315 = vmatpush1.msra.mxu0 %v2244_v39  ;;  %2386 = vmatpush1.msra.mxu1 %v2246_v40  ;;  %v2564_v39 = vld [vmem:[#allocation9 + $0x3b8] sm:$0xff]  ;;  %v2561_v40 = vld [vmem:[#allocation9 + $0x3a0] sm:$0xff] }
 0x6d3   :  { %2316 = vmatprep.subr.mxu0 %v2241_v41  ;;  %2387 = vmatprep.subr.mxu1 %v2243_v42  ;;  %v2563_v41 = vld [vmem:[#allocation9 + $0x3b0] sm:$0xff]  ;;  %v2558_v42 = vld [vmem:[#allocation9 + $0x388] sm:$0xff] }
 0x6d4   :  { %2317 = vmatpush1.msra.mxu0 %v2240_v43  ;;  %2388 = vmatpush1.msra.mxu1 %v2242_v44  ;;  %v2560_v43 = vld [vmem:[#allocation9 + $0x398] sm:$0xff]  ;;  %v2557_v44 = vld [vmem:[#allocation9 + $0x380] sm:$0xff] }
 0x6d5   :  { %2318 = vmatprep.subr.mxu0 %v2237_v45  ;;  %2389 = vmatprep.subr.mxu1 %v2239_v50  ;;  %v2559_v45 = vld [vmem:[#allocation9 + $0x390] sm:$0xff]  ;;  %v2554_v50 = vld [vmem:[#allocation9 + $0x368] sm:$0xff] }
 0x6d6   :  { %2319 = vmatpush1.msra.mxu0 %v2236_v53  ;;  %2390 = vmatpush1.msra.mxu1 %v2238_v3  ;;  %v2556_v53 = vld [vmem:[#allocation9 + $0x378] sm:$0xff]  ;;  %v2553_v3 = vld [vmem:[#allocation9 + $0x360] sm:$0xff] }
 0x6d7   :  { %2320 = vmatprep.subr.mxu0 %v2233_v52  ;;  %2391 = vmatprep.subr.mxu1 %v2235_v0  ;;  %v2555_v52 = vld [vmem:[#allocation9 + $0x370] sm:$0xff]  ;;  %v2550_v0 = vld [vmem:[#allocation9 + $0x348] sm:$0xff] }
 0x6d8   :  { %2321 = vmatpush1.msra.mxu0 %v2232_v46  ;;  %2392 = vmatpush1.msra.mxu1 %v2234_v59  ;;  %v2552_v46 = vld [vmem:[#allocation9 + $0x358] sm:$0xff]  ;;  %v2549_v59 = vld [vmem:[#allocation9 + $0x340] sm:$0xff] }
 0x6d9   :  { %2322 = vmatprep.subr.mxu0 %v2229_v1  ;;  %2393 = vmatprep.subr.mxu1 %v2231_v60  ;;  %v2551_v1 = vld [vmem:[#allocation9 + $0x350] sm:$0xff]  ;;  %v2546_v60 = vld [vmem:[#allocation9 + $0x328] sm:$0xff] }
 0x6da   :  { %2323 = vmatpush1.msra.mxu0 %v2228_v61  ;;  %2394 = vmatpush1.msra.mxu1 %v2230_v2  ;;  %v2548_v61 = vld [vmem:[#allocation9 + $0x338] sm:$0xff]  ;;  %v2545_v2 = vld [vmem:[#allocation9 + $0x320] sm:$0xff] }
 0x6db   :  { %2596 = vmatprep.subr.mxu0 %v2570_v30  ;;  %2667 = vmatprep.subr.mxu1 %v2572_v31  ;;  %v2509_v30 = vld [vmem:[#allocation9 + $0x200] sm:$0xff]  ;;  %v2511_v31 = vld [vmem:[#allocation9 + $0x210] sm:$0xff] }
 0x77a   :  { %v2084_v56 = vpop.f32.mrf.mxu0  ;;  %v2155_v47 = vpop.f32.mrf.mxu1 }
 0x77c   :  { %v2086_v23 = vpop.f32.mrf.mxu0  ;;  %v2157_v57 = vpop.f32.mrf.mxu1 }
 0x77d   :  { %v2164_v4 = vcombine.low %v2084_v56, %v2086_v23  ;;  %v2165_v55 = vcombine.low %v2155_v47, %v2157_v57  ;;  %v2547_v56 = vld [vmem:[#allocation9 + $0x330] sm:$0xff]  ;;  %v2542_v47 = vld [vmem:[#allocation9 + $0x308] sm:$0xff]  ;;  %v2544_v23 = vld [vmem:[#allocation9 + $0x318] sm:$0xff] }
 0x77e   :  { %v2541_v57 = vld [vmem:[#allocation9 + $0x300] sm:$0xff] }
 0x77f   :  { %v2172_v48 = vrot.slane %v2164_v4, %v5700_v49  ;;  %v2179_v62 = vrot.slane %v2165_v55, %v5700_v49  ;;  %v2543_v4 = vld [vmem:[#allocation9 + $0x310] sm:$0xff]  ;;  %v2538_v55 = vld [vmem:[#allocation9 + $0x2e8] sm:$0xff] }
 0x781   :  { %v2180_v54 = vcombine.low %v2172_v48, %v2179_v62  ;;  %v2540_v48 = vld [vmem:[#allocation9 + $0x2f8] sm:$0xff]  ;;  %v2537_v62 = vld [vmem:[#allocation9 + $0x2e0] sm:$0xff] }
 0x783   :  { %v2187_v63 = vrot.slane %v2180_v54, %v5700_v49  ;;  %v2539_v54 = vld [vmem:[#allocation9 + $0x2f0] sm:$0xff] }
 0x785   :  { %v2189_v51 = vadd.f32 %v2187_v63, %v1952_v58  ;;  %v2534_v63 = vld [vmem:[#allocation9 + $0x2c8] sm:$0xff]  ;;  %v2536_v58 = vld [vmem:[#allocation9 + $0x2d8] sm:$0xff] }
 0x787   :  { %v4959_v5 = vmul.f32 -1.442695, %v2189_v51  ;;  %v2197_v6 = vrot.slane %v2189_v51, 1  ;;  %v2208_v8 = vrot.slane %v2189_v51, 3  ;;  %v2205_v11 = vrot.slane %v2189_v51, 2  ;;  %v2533_v51 = vld [vmem:[#allocation9 + $0x2c0] sm:$0xff] }
 0x789   :  { %5097 = vpow2.f32 %v4959_v5  ;;  %v4960_v7 = vmul.f32 -1.442695, %v2197_v6  ;;  %v4961_v9 = vmul.f32 -1.442695, %v2208_v8  ;;  %v2535_v5 = vld [vmem:[#allocation9 + $0x2d0] sm:$0xff]  ;;  %v2530_v6 = vld [vmem:[#allocation9 + $0x2a8] sm:$0xff] }
 0x78a   :  { %v2529_v8 = vld [vmem:[#allocation9 + $0x2a0] sm:$0xff] }
 0x78b   :  { %5099 = vpow2.f32 %v4960_v7  ;;  %v2532_v7 = vld [vmem:[#allocation9 + $0x2b8] sm:$0xff] }
 0x78c   :  { %5101 = vpow2.f32 %v4961_v9  ;;  %v2531_v9 = vld [vmem:[#allocation9 + $0x2b0] sm:$0xff] }
 0x796   :  { %v5098_v10 = vpop.eup %5097 }
 0x797   :  { %v2193_v12 = vadd.f32 1.0, %v5098_v10  ;;  %v2526_v10 = vld [vmem:[#allocation9 + $0x288] sm:$0xff] }
 0x798   :  { %v5100_v13 = vpop.eup %5099 }
 0x799   :  { %5103 = vrcp.f32 %v2193_v12  ;;  %v2202_v14 = vadd.f32 1.0, %v5100_v13  ;;  %v5102_v15 = vpop.eup %5101  ;;  %v2525_v12 = vld [vmem:[#allocation9 + $0x280] sm:$0xff]  ;;  %v2527_v13 = vld [vmem:[#allocation9 + $0x290] sm:$0xff] }
 0x79a   :  { %5105 = vtanh.f32 %v2205_v11  ;;  %v2213_v20 = vadd.f32 1.0, %v5102_v15  ;;  %v2528_v11 = vld [vmem:[#allocation9 + $0x298] sm:$0xff] }
 0x79b   :  { %5107 = vrcp.f32 %v2202_v14  ;;  %v2522_v14 = vld [vmem:[#allocation9 + $0x268] sm:$0xff]  ;;  %v2524_v15 = vld [vmem:[#allocation9 + $0x278] sm:$0xff] }
 0x79c   :  { %5109 = vrcp.f32 %v2213_v20  ;;  %v2520_v20 = vld [vmem:[#allocation9 + $0x258] sm:$0xff] }
 0x7a6   :  { %v5104_v16 = vpop.eup %5103 }
 0x7a7   :  { %v5106_v18 = vpop.eup %5105 }
 0x7a8   :  { %v5108_v19 = vpop.eup %5107  ;;  %v2218_v24 = vmul.f32 %v5106_v18, %v5104_v16  ;;  %v2521_v16 = vld [vmem:[#allocation9 + $0x260] sm:$0xff]  ;;  %v2523_v18 = vld [vmem:[#allocation9 + $0x270] sm:$0xff] }
 0x7a9   :  { %v2217_v22 = vmul.f32 %v5108_v19, %v2216_v21  ;;  %v5110_v26 = vpop.eup %5109  ;;  %v2518_v19 = vld [vmem:[#allocation9 + $0x248] sm:$0xff]  ;;  %v2517_v21 = vld [vmem:[#allocation9 + $0x240] sm:$0xff] }
 0x7ab   :  { %v2219_v25 = vadd.f32 %v2218_v24, %v2217_v22  ;;  %v2519_v22 = vld [vmem:[#allocation9 + $0x250] sm:$0xff]  ;;  %v2514_v24 = vld [vmem:[#allocation9 + $0x228] sm:$0xff] }
 0x7ad   :  { %5111 = vtanh.f32 %v2219_v25  ;;  %2222 = vst [vmem:[#allocation5] sm:$0x1] %v2219_v25  ;;  %v2516_v25 = vld [vmem:[#allocation9 + $0x238] sm:$0xff] }
 0x7ba   :  { %v5112_v27 = vpop.eup %5111 }
 0x7bb   :  { %v2221_v28 = vmul.f32 %v5112_v27, %v5110_v26  ;;  %v2513_v26 = vld [vmem:[#allocation9 + $0x220] sm:$0xff]  ;;  %v2515_v27 = vld [vmem:[#allocation9 + $0x230] sm:$0xff] }
 0x7bd   :  { %2224 = vst [vmem:[#allocation2 + $0x6] sm:$0x1] %v2221_v28  ;;  %2223 = vst [vmem:[#allocation4] sm:$0x1] %v2221_v28  ;;  %v2510_v28 = vld [vmem:[#allocation9 + $0x208] sm:$0xff] }
 0x7c4   :  { %v2227_v29 = vld [vmem:[#allocation4] sm:$0x1] }
 0x7c5   :  { %2357 = vmatmul.mubr.f32.vlgmr.msra.gmra.mxu0 %v2227_v29  ;;  %2428 = vmatmul.mubr.f32.vlgmr.msra.gmra.mxu1 %v2227_v29  ;;  %v2512_v29 = vld [vmem:[#allocation9 + $0x218] sm:$0xff] }
 0x7c6   :  { %2660 = vmatprep.mubr.f32.mxu0 %v7211_v17  ;;  %2731 = vmatprep.mubr.f32.mxu1 %v7211_v17 }
 0x7c7   :  { %2597 = vmatpush1.msra.mxu0 %v2569_v32  ;;  %2668 = vmatpush1.msra.mxu1 %v2571_v33  ;;  %v6183_v32 = vld [vmem:[#allocation11 + $0x3e8] sm:$0xff]  ;;  %v6185_v33 = vld [vmem:[#allocation11 + $0x3f8] sm:$0xff] }
 0x7c8   :  { %2598 = vmatprep.subr.mxu0 %v2566_v34  ;;  %2669 = vmatprep.subr.mxu1 %v2568_v35 }
 0x7c9   :  { %2599 = vmatpush1.msra.mxu0 %v2565_v36  ;;  %2670 = vmatpush1.msra.mxu1 %v2567_v37 }
 0x7ca   :  { %2600 = vmatprep.subr.mxu0 %v2562_v38  ;;  %2671 = vmatprep.subr.mxu1 %v2564_v39 }
 0x7cb   :  { %2601 = vmatpush1.msra.mxu0 %v2561_v40  ;;  %2672 = vmatpush1.msra.mxu1 %v2563_v41 }
 0x7cc   :  { %2602 = vmatprep.subr.mxu0 %v2558_v42  ;;  %2673 = vmatprep.subr.mxu1 %v2560_v43 }
 0x7cd   :  { %2603 = vmatpush1.msra.mxu0 %v2557_v44  ;;  %2674 = vmatpush1.msra.mxu1 %v2559_v45  ;;  %v2226_v44 = vld [vmem:[#allocation3 + $0x7] ss:$8 sm:$0xf] }
 0x7ce   :  { %2604 = vmatprep.subr.mxu0 %v2554_v50  ;;  %2675 = vmatprep.subr.mxu1 %v2556_v53 }
 0x7cf   :  { %2605 = vmatpush1.msra.mxu0 %v2553_v3  ;;  %2676 = vmatpush1.msra.mxu1 %v2555_v52 }
 0x7d0   :  { %2606 = vmatprep.subr.mxu0 %v2550_v0  ;;  %2677 = vmatprep.subr.mxu1 %v2552_v46 }
 0x7d1   :  { %2607 = vmatpush1.msra.mxu0 %v2549_v59  ;;  %2678 = vmatpush1.msra.mxu1 %v2551_v1 }
 0x7d2   :  { %2608 = vmatprep.subr.mxu0 %v2546_v60  ;;  %2679 = vmatprep.subr.mxu1 %v2548_v61 }
 0x7d3   :  { %2609 = vmatpush1.msra.mxu0 %v2545_v2  ;;  %2680 = vmatpush1.msra.mxu1 %v2547_v56 }
 0x7d4   :  { %2610 = vmatprep.subr.mxu0 %v2542_v47  ;;  %2681 = vmatprep.subr.mxu1 %v2544_v23 }
 0x7d5   :  { %2611 = vmatpush1.msra.mxu0 %v2541_v57  ;;  %2682 = vmatpush1.msra.mxu1 %v2543_v4  ;;  %v2490_v4 = vld [vmem:[#allocation5] sm:$0x1] }
 0x7d6   :  { %2612 = vmatprep.subr.mxu0 %v2538_v55  ;;  %2683 = vmatprep.subr.mxu1 %v2540_v48 }
 0x7d7   :  { %2613 = vmatpush1.msra.mxu0 %v2537_v62  ;;  %2684 = vmatpush1.msra.mxu1 %v2539_v54 }
 0x7d8   :  { %2614 = vmatprep.subr.mxu0 %v2534_v63  ;;  %2685 = vmatprep.subr.mxu1 %v2536_v58 }
 0x7d9   :  { %2615 = vmatpush1.msra.mxu0 %v2533_v51  ;;  %2686 = vmatpush1.msra.mxu1 %v2535_v5 }
 0x7da   :  { %2616 = vmatprep.subr.mxu0 %v2530_v6  ;;  %2687 = vmatprep.subr.mxu1 %v2532_v7 }
 0x7db   :  { %2617 = vmatpush1.msra.mxu0 %v2529_v8  ;;  %2688 = vmatpush1.msra.mxu1 %v2531_v9  ;;  %v6194_v8 = vld [vmem:[#allocation11 + $0x3e0] sm:$0xff]  ;;  %v6196_v9 = vld [vmem:[#allocation11 + $0x3f0] sm:$0xff] }
 0x7dc   :  { %2618 = vmatprep.subr.mxu0 %v2526_v10  ;;  %2689 = vmatprep.subr.mxu1 %v2528_v11  ;;  %v6198_v11 = vld [vmem:[#allocation11 + $0x3c8] sm:$0xff] }
 0x7dd   :  { %2619 = vmatpush1.msra.mxu0 %v2525_v12  ;;  %2690 = vmatpush1.msra.mxu1 %v2527_v13  ;;  %v6200_v12 = vld [vmem:[#allocation11 + $0x3d8] sm:$0xff]  ;;  %v6202_v13 = vld [vmem:[#allocation11 + $0x3c0] sm:$0xff] }
 0x7de   :  { %2620 = vmatprep.subr.mxu0 %v2522_v14  ;;  %2691 = vmatprep.subr.mxu1 %v2524_v15  ;;  %v6204_v14 = vld [vmem:[#allocation11 + $0x3d0] sm:$0xff]  ;;  %v6208_v15 = vld [vmem:[#allocation11 + $0x3a8] sm:$0xff] }
 0x7df   :  { %2621 = vmatpush1.msra.mxu0 %v2521_v16  ;;  %2692 = vmatpush1.msra.mxu1 %v2523_v18  ;;  %v6210_v16 = vld [vmem:[#allocation11 + $0x3b8] sm:$0xff]  ;;  %v6214_v18 = vld [vmem:[#allocation11 + $0x3a0] sm:$0xff] }
 0x7e0   :  { %2622 = vmatprep.subr.mxu0 %v2518_v19  ;;  %2693 = vmatprep.subr.mxu1 %v2520_v20  ;;  %v6216_v19 = vld [vmem:[#allocation11 + $0x3b0] sm:$0xff]  ;;  %v6220_v20 = vld [vmem:[#allocation11 + $0x388] sm:$0xff] }
 0x7e1   :  { %2623 = vmatpush1.msra.mxu0 %v2517_v21  ;;  %2694 = vmatpush1.msra.mxu1 %v2519_v22  ;;  %v6222_v21 = vld [vmem:[#allocation11 + $0x398] sm:$0xff]  ;;  %v6226_v22 = vld [vmem:[#allocation11 + $0x380] sm:$0xff] }
 0x7e2   :  { %2624 = vmatprep.subr.mxu0 %v2514_v24  ;;  %2695 = vmatprep.subr.mxu1 %v2516_v25  ;;  %v6228_v24 = vld [vmem:[#allocation11 + $0x390] sm:$0xff]  ;;  %v6232_v25 = vld [vmem:[#allocation11 + $0x368] sm:$0xff] }
 0x7e3   :  { %2625 = vmatpush1.msra.mxu0 %v2513_v26  ;;  %2696 = vmatpush1.msra.mxu1 %v2515_v27  ;;  %v6234_v26 = vld [vmem:[#allocation11 + $0x378] sm:$0xff]  ;;  %v6238_v27 = vld [vmem:[#allocation11 + $0x360] sm:$0xff] }
 0x7e4   :  { %2626 = vmatprep.subr.mxu0 %v2510_v28  ;;  %2697 = vmatprep.subr.mxu1 %v2512_v29  ;;  %v6240_v28 = vld [vmem:[#allocation11 + $0x370] sm:$0xff]  ;;  %v6244_v29 = vld [vmem:[#allocation11 + $0x348] sm:$0xff] }
 0x7e5   :  { %2627 = vmatpush1.msra.mxu0 %v2509_v30  ;;  %2698 = vmatpush1.msra.mxu1 %v2511_v31  ;;  %v6246_v30 = vld [vmem:[#allocation11 + $0x358] sm:$0xff]  ;;  %v6250_v31 = vld [vmem:[#allocation11 + $0x340] sm:$0xff] }
 0x7e6   :  { %2811 = vmatprep.subr.mxu0 %v6183_v32  ;;  %2882 = vmatprep.subr.mxu1 %v6185_v33 }
 0x885   :  { %v2358_v34 = vpop.f32.mrf.mxu0  ;;  %v2429_v35 = vpop.f32.mrf.mxu1 }
 0x887   :  { %v2360_v36 = vpop.f32.mrf.mxu0  ;;  %v2431_v37 = vpop.f32.mrf.mxu1 }
 0x888   :  { %v2438_v38 = vcombine.low %v2358_v34, %v2360_v36  ;;  %v2439_v39 = vcombine.low %v2429_v35, %v2431_v37  ;;  %v6252_v34 = vld [vmem:[#allocation11 + $0x350] sm:$0xff]  ;;  %v6256_v35 = vld [vmem:[#allocation11 + $0x328] sm:$0xff]  ;;  %v6258_v36 = vld [vmem:[#allocation11 + $0x338] sm:$0xff] }
 0x889   :  { %v6262_v37 = vld [vmem:[#allocation11 + $0x320] sm:$0xff] }
 0x88a   :  { %v2446_v40 = vrot.slane %v2438_v38, %v5700_v49  ;;  %v2453_v41 = vrot.slane %v2439_v39, %v5700_v49  ;;  %v6264_v38 = vld [vmem:[#allocation11 + $0x330] sm:$0xff]  ;;  %v6268_v39 = vld [vmem:[#allocation11 + $0x308] sm:$0xff] }
 0x88c   :  { %v2454_v42 = vcombine.low %v2446_v40, %v2453_v41  ;;  %v6270_v40 = vld [vmem:[#allocation11 + $0x318] sm:$0xff]  ;;  %v6274_v41 = vld [vmem:[#allocation11 + $0x300] sm:$0xff] }
 0x88e   :  { %v2461_v43 = vrot.slane %v2454_v42, %v5700_v49  ;;  %v6276_v42 = vld [vmem:[#allocation11 + $0x310] sm:$0xff]  ;;  %v6370_v49 = vld [vmem:[#allocation11 + $0x200] sm:$0xff] }
 0x88f   :  { %7230 = vst [vmem:[#allocation36_spill] sm:$0xff] %v6370_v49 }
 0x890   :  { %v2463_v45 = vadd.f32 %v2461_v43, %v2226_v44  ;;  %v6280_v43 = vld [vmem:[#allocation11 + $0x2e8] sm:$0xff]  ;;  %v6282_v44 = vld [vmem:[#allocation11 + $0x2f8] sm:$0xff] }
 0x892   :  { %v4962_v50 = vmul.f32 -1.442695, %v2463_v45  ;;  %v2471_v53 = vrot.slane %v2463_v45, 1  ;;  %v2482_v52 = vrot.slane %v2463_v45, 3  ;;  %v2479_v59 = vrot.slane %v2463_v45, 2  ;;  %v6286_v45 = vld [vmem:[#allocation11 + $0x2e0] sm:$0xff] }
 0x894   :  { %5113 = vpow2.f32 %v4962_v50  ;;  %v4963_v3 = vmul.f32 -1.442695, %v2471_v53  ;;  %v4964_v0 = vmul.f32 -1.442695, %v2482_v52  ;;  %v6288_v50 = vld [vmem:[#allocation11 + $0x2f0] sm:$0xff]  ;;  %v6292_v53 = vld [vmem:[#allocation11 + $0x2c8] sm:$0xff] }
 0x895   :  { %v6298_v52 = vld [vmem:[#allocation11 + $0x2c0] sm:$0xff] }
 0x896   :  { %5115 = vpow2.f32 %v4963_v3  ;;  %v6294_v3 = vld [vmem:[#allocation11 + $0x2d8] sm:$0xff] }
 0x897   :  { %5117 = vpow2.f32 %v4964_v0  ;;  %v6300_v0 = vld [vmem:[#allocation11 + $0x2d0] sm:$0xff] }
 0x8a1   :  { %v5114_v46 = vpop.eup %5113 }
 0x8a2   :  { %v2467_v1 = vadd.f32 1.0, %v5114_v46  ;;  %v6304_v46 = vld [vmem:[#allocation11 + $0x2a8] sm:$0xff] }
 0x8a3   :  { %v5116_v60 = vpop.eup %5115 }
 0x8a4   :  { %5119 = vrcp.f32 %v2467_v1  ;;  %v2476_v61 = vadd.f32 1.0, %v5116_v60  ;;  %v5118_v2 = vpop.eup %5117  ;;  %v6310_v1 = vld [vmem:[#allocation11 + $0x2a0] sm:$0xff]  ;;  %v6312_v60 = vld [vmem:[#allocation11 + $0x2b0] sm:$0xff] }
 0x8a5   :  { %5121 = vtanh.f32 %v2479_v59  ;;  %v2487_v57 = vadd.f32 1.0, %v5118_v2  ;;  %v6306_v59 = vld [vmem:[#allocation11 + $0x2b8] sm:$0xff] }
 0x8a6   :  { %5123 = vrcp.f32 %v2476_v61  ;;  %v6316_v61 = vld [vmem:[#allocation11 + $0x288] sm:$0xff]  ;;  %v6318_v2 = vld [vmem:[#allocation11 + $0x298] sm:$0xff] }
 0x8a7   :  { %5125 = vrcp.f32 %v2487_v57  ;;  %7213 = vst [vmem:[#allocation19_spill] sm:$0xff] %v6316_v61  ;;  %v6330_v57 = vld [vmem:[#allocation11 + $0x278] sm:$0xff] }
 0x8a8   :  { %7217 = vst [vmem:[#allocation23_spill] sm:$0xff] %v6330_v57 }
 0x8b1   :  { %v5120_v56 = vpop.eup %5119 }
 0x8b2   :  { %v5122_v47 = vpop.eup %5121 }
 0x8b3   :  { %v5124_v23 = vpop.eup %5123  ;;  %v2492_v48 = vmul.f32 %v5122_v47, %v5120_v56  ;;  %v6322_v56 = vld [vmem:[#allocation11 + $0x280] sm:$0xff]  ;;  %v6324_v47 = vld [vmem:[#allocation11 + $0x290] sm:$0xff] }
 0x8b4   :  { %v2491_v55 = vmul.f32 %v5124_v23, %v2490_v4  ;;  %v5126_v54 = vpop.eup %5125  ;;  %7214 = vst [vmem:[#allocation20_spill] sm:$0xff] %v6322_v56  ;;  %7215 = vst [vmem:[#allocation21_spill] sm:$0xff] %v6324_v47  ;;  %v6328_v23 = vld [vmem:[#allocation11 + $0x268] sm:$0xff]  ;;  %v6334_v4 = vld [vmem:[#allocation11 + $0x260] sm:$0xff] }
 0x8b5   :  { %7216 = vst [vmem:[#allocation22_spill] sm:$0xff] %v6328_v23  ;;  %7218 = vst [vmem:[#allocation24_spill] sm:$0xff] %v6334_v4 }
 0x8b6   :  { %v2493_v62 = vadd.f32 %v2492_v48, %v2491_v55  ;;  %v6336_v55 = vld [vmem:[#allocation11 + $0x270] sm:$0xff]  ;;  %v6340_v48 = vld [vmem:[#allocation11 + $0x248] sm:$0xff] }
 0x8b7   :  { %7219 = vst [vmem:[#allocation25_spill] sm:$0xff] %v6336_v55  ;;  %7220 = vst [vmem:[#allocation26_spill] sm:$0xff] %v6340_v48 }
 0x8b8   :  { %5127 = vtanh.f32 %v2493_v62  ;;  %2496 = vst [vmem:[#allocation5] sm:$0x1] %v2493_v62  ;;  %v6342_v62 = vld [vmem:[#allocation11 + $0x258] sm:$0xff] }
 0x8b9   :  { %2743 = vst [vmem:[#allocation5] sm:$0x1] %v7211_v17  ;;  %7221 = vst [vmem:[#allocation27_spill] sm:$0xff] %v6342_v62 }
 0x8c5   :  { %v5128_v63 = vpop.eup %5127 }
 0x8c6   :  { %v2495_v58 = vmul.f32 %v5128_v63, %v5126_v54  ;;  %v6346_v54 = vld [vmem:[#allocation11 + $0x240] sm:$0xff]  ;;  %v6348_v63 = vld [vmem:[#allocation11 + $0x250] sm:$0xff] }
 0x8c7   :  { %7222 = vst [vmem:[#allocation28_spill] sm:$0xff] %v6346_v54  ;;  %7223 = vst [vmem:[#allocation29_spill] sm:$0xff] %v6348_v63 }
 0x8c8   :  { %2498 = vst [vmem:[#allocation2 + $0x7] sm:$0x1] %v2495_v58  ;;  %2497 = vst [vmem:[#allocation4] sm:$0x1] %v2495_v58  ;;  %v6352_v58 = vld [vmem:[#allocation11 + $0x228] sm:$0xff] }
 0x8c9   :  { %2742 = vst [vmem:[#allocation4] sm:$0x1] %v7211_v17  ;;  %7224 = vst [vmem:[#allocation30_spill] sm:$0xff] %v6352_v58 }
 0x8cf   :  { %v2499_v51 = vld [vmem:[#allocation2] sm:$0xff] }
 0x8d0   :  { %v4965_v5 = vmul.f32 -1.442695, %v2499_v51  ;;  %v6354_v51 = vld [vmem:[#allocation11 + $0x238] sm:$0xff] }
 0x8d1   :  { %7225 = vst [vmem:[#allocation31_spill] sm:$0xff] %v6354_v51 }
 0x8d2   :  { %5129 = vpow2.f32 %v4965_v5  ;;  %v6358_v5 = vld [vmem:[#allocation11 + $0x220] sm:$0xff] }
 0x8d3   :  { %7226 = vst [vmem:[#allocation32_spill] sm:$0xff] %v6358_v5 }
 0x8df   :  { %v5130_v6 = vpop.eup %5129 }
 0x8e0   :  { %v2503_v7 = vadd.f32 1.0, %v5130_v6  ;;  %v6360_v6 = vld [vmem:[#allocation11 + $0x230] sm:$0xff] }
 0x8e1   :  { %7227 = vst [vmem:[#allocation33_spill] sm:$0xff] %v6360_v6 }
 0x8e2   :  { %5131 = vrcp.f32 %v2503_v7  ;;  %v6364_v7 = vld [vmem:[#allocation11 + $0x208] sm:$0xff] }
 0x8e3   :  { %7228 = vst [vmem:[#allocation34_spill] sm:$0xff] %v6364_v7 }
 0x8ef   :  { %v5132_v10 = vpop.eup %5131 }
 0x8f0   :  { %2506 = vst [vmem:[#allocation2] sm:$0xff] %v5132_v10  ;;  %2661 = vmatmul.mubr.f32.vlgmr.msra.gmra.mxu0 %v5132_v10  ;;  %2732 = vmatmul.mubr.f32.vlgmr.msra.gmra.mxu1 %v5132_v10  ;;  %v6366_v10 = vld [vmem:[#allocation11 + $0x218] sm:$0xff] }
 0x8f1   :  { %2812 = vmatpush1.msra.mxu0 %v6194_v8  ;;  %2883 = vmatpush1.msra.mxu1 %v6196_v9  ;;  %7229 = vst [vmem:[#allocation35_spill] sm:$0xff] %v6366_v10 }
 0x8f2   :  { %2813 = vmatprep.subr.mxu0 %v6198_v11  ;;  %2884 = vmatprep.subr.mxu1 %v6200_v12 }
 0x8f3   :  { %2814 = vmatpush1.msra.mxu0 %v6202_v13  ;;  %2885 = vmatpush1.msra.mxu1 %v6204_v14 }
 0x8f4   :  { %2815 = vmatprep.subr.mxu0 %v6208_v15  ;;  %2886 = vmatprep.subr.mxu1 %v6210_v16 }
 0x8f5   :  { %2816 = vmatpush1.msra.mxu0 %v6214_v18  ;;  %2887 = vmatpush1.msra.mxu1 %v6216_v19 }
 0x8f6   :  { %2817 = vmatprep.subr.mxu0 %v6220_v20  ;;  %2888 = vmatprep.subr.mxu1 %v6222_v21 }
 0x8f7   :  { %2818 = vmatpush1.msra.mxu0 %v6226_v22  ;;  %2889 = vmatpush1.msra.mxu1 %v6228_v24 }
 0x8f8   :  { %2819 = vmatprep.subr.mxu0 %v6232_v25  ;;  %2890 = vmatprep.subr.mxu1 %v6234_v26 }
 0x8f9   :  { %2820 = vmatpush1.msra.mxu0 %v6238_v27  ;;  %2891 = vmatpush1.msra.mxu1 %v6240_v28 }
 0x8fa   :  { %2821 = vmatprep.subr.mxu0 %v6244_v29  ;;  %2892 = vmatprep.subr.mxu1 %v6246_v30 }
 0x8fb   :  { %2822 = vmatpush1.msra.mxu0 %v6250_v31  ;;  %2893 = vmatpush1.msra.mxu1 %v6252_v34 }
 0x8fc   :  { %2823 = vmatprep.subr.mxu0 %v6256_v35  ;;  %2894 = vmatprep.subr.mxu1 %v6258_v36 }
 0x8fd   :  { %2824 = vmatpush1.msra.mxu0 %v6262_v37  ;;  %2895 = vmatpush1.msra.mxu1 %v6264_v38 }
 0x8fe   :  { %2825 = vmatprep.subr.mxu0 %v6268_v39  ;;  %2896 = vmatprep.subr.mxu1 %v6270_v40 }
 0x8ff   :  { %2826 = vmatpush1.msra.mxu0 %v6274_v41  ;;  %2897 = vmatpush1.msra.mxu1 %v6276_v42 }
 0x900   :  { %2827 = vmatprep.subr.mxu0 %v6280_v43  ;;  %2898 = vmatprep.subr.mxu1 %v6282_v44 }
 0x901   :  { %2828 = vmatpush1.msra.mxu0 %v6286_v45  ;;  %2899 = vmatpush1.msra.mxu1 %v6288_v50 }
 0x902   :  { %2829 = vmatprep.subr.mxu0 %v6292_v53  ;;  %2900 = vmatprep.subr.mxu1 %v6294_v3 }
 0x903   :  { %2830 = vmatpush1.msra.mxu0 %v6298_v52  ;;  %2901 = vmatpush1.msra.mxu1 %v6300_v0 }
 0x904   :  { %2831 = vmatprep.subr.mxu0 %v6304_v46  ;;  %2902 = vmatprep.subr.mxu1 %v6306_v59 }
 0x905   :  { %2832 = vmatpush1.msra.mxu0 %v6310_v1  ;;  %2903 = vmatpush1.msra.mxu1 %v6312_v60 }
 0x906   :  { %2833 = vmatprep.subr.mxu0 %v6316_v61  ;;  %2904 = vmatprep.subr.mxu1 %v6318_v2 }
 0x907   :  { %2834 = vmatpush1.msra.mxu0 %v6322_v56  ;;  %2905 = vmatpush1.msra.mxu1 %v6324_v47 }
 0x908   :  { %2835 = vmatprep.subr.mxu0 %v6328_v23  ;;  %2906 = vmatprep.subr.mxu1 %v6330_v57 }
 0x909   :  { %2836 = vmatpush1.msra.mxu0 %v6334_v4  ;;  %2907 = vmatpush1.msra.mxu1 %v6336_v55 }
 0x90a   :  { %2837 = vmatprep.subr.mxu0 %v6340_v48  ;;  %2908 = vmatprep.subr.mxu1 %v6342_v62  ;;  %v6374_v62 = vld [vmem:[#allocation11 + $0x210] sm:$0xff] }
 0x90b   :  { %2838 = vmatpush1.msra.mxu0 %v6346_v54  ;;  %2909 = vmatpush1.msra.mxu1 %v6348_v63  ;;  %7231 = vst [vmem:[#allocation37_spill] sm:$0xff] %v6374_v62  ;;  %v2745_v63 = vld [vmem:[#allocation4] sm:$0x1] }
 0x90c   :  { %2839 = vmatprep.subr.mxu0 %v6352_v58  ;;  %2910 = vmatprep.subr.mxu1 %v6354_v51 }
 0x90d   :  { %2840 = vmatpush1.msra.mxu0 %v6358_v5  ;;  %2911 = vmatpush1.msra.mxu1 %v6360_v6 }
 0x90e   :  { %2841 = vmatprep.subr.mxu0 %v6364_v7  ;;  %2912 = vmatprep.subr.mxu1 %v6366_v10 }
 0x90f   :  { %2842 = vmatpush1.msra.mxu0 %v6370_v49  ;;  %2875 = vmatprep.mubr.f32.mxu0 %v7211_v17 }
 0x910   :  { %2913 = vmatpush1.msra.mxu1 %v6374_v62  ;;  %2946 = vmatprep.mubr.f32.mxu1 %v7211_v17 }
 0x911   :  { %2876 = vmatmul.mubr.f32.vlgmr.msra.gmra.mxu0 %v2745_v63  ;;  %2947 = vmatmul.mubr.f32.vlgmr.msra.gmra.mxu1 %v2745_v63  ;;  %v7232_v63 = vld [vmem:[#allocation27_spill] sm:$0xff] }
 0x912   :  { %3083 = vmatprep.subr.mxu0 %v6183_v32  ;;  %3154 = vmatprep.subr.mxu1 %v6185_v33 }
 0x913   :  { %3084 = vmatpush1.msra.mxu0 %v6194_v8  ;;  %3155 = vmatpush1.msra.mxu1 %v6196_v9 }
 0x914   :  { %3085 = vmatprep.subr.mxu0 %v6198_v11  ;;  %3156 = vmatprep.subr.mxu1 %v6200_v12 }
 0x915   :  { %3086 = vmatpush1.msra.mxu0 %v6202_v13  ;;  %3157 = vmatpush1.msra.mxu1 %v6204_v14 }
 0x916   :  { %3087 = vmatprep.subr.mxu0 %v6208_v15  ;;  %3158 = vmatprep.subr.mxu1 %v6210_v16 }
 0x917   :  { %3088 = vmatpush1.msra.mxu0 %v6214_v18  ;;  %3159 = vmatpush1.msra.mxu1 %v6216_v19 }
 0x918   :  { %3089 = vmatprep.subr.mxu0 %v6220_v20  ;;  %3160 = vmatprep.subr.mxu1 %v6222_v21 }
 0x919   :  { %3090 = vmatpush1.msra.mxu0 %v6226_v22  ;;  %3161 = vmatpush1.msra.mxu1 %v6228_v24 }
 0x91a   :  { %3091 = vmatprep.subr.mxu0 %v6232_v25  ;;  %3162 = vmatprep.subr.mxu1 %v6234_v26 }
 0x91b   :  { %3092 = vmatpush1.msra.mxu0 %v6238_v27  ;;  %3163 = vmatpush1.msra.mxu1 %v6240_v28 }
 0x91c   :  { %3093 = vmatprep.subr.mxu0 %v6244_v29  ;;  %3164 = vmatprep.subr.mxu1 %v6246_v30 }
 0x91d   :  { %3094 = vmatpush1.msra.mxu0 %v6250_v31  ;;  %3165 = vmatpush1.msra.mxu1 %v6252_v34 }
 0x91e   :  { %3095 = vmatprep.subr.mxu0 %v6256_v35  ;;  %3166 = vmatprep.subr.mxu1 %v6258_v36 }
 0x91f   :  { %3096 = vmatpush1.msra.mxu0 %v6262_v37  ;;  %3167 = vmatpush1.msra.mxu1 %v6264_v38 }
 0x920   :  { %3097 = vmatprep.subr.mxu0 %v6268_v39  ;;  %3168 = vmatprep.subr.mxu1 %v6270_v40 }
 0x921   :  { %3098 = vmatpush1.msra.mxu0 %v6274_v41  ;;  %3169 = vmatpush1.msra.mxu1 %v6276_v42 }
 0x922   :  { %3099 = vmatprep.subr.mxu0 %v6280_v43  ;;  %3170 = vmatprep.subr.mxu1 %v6282_v44 }
 0x923   :  { %3100 = vmatpush1.msra.mxu0 %v6286_v45  ;;  %3171 = vmatpush1.msra.mxu1 %v6288_v50 }
 0x924   :  { %3101 = vmatprep.subr.mxu0 %v6292_v53  ;;  %3172 = vmatprep.subr.mxu1 %v6294_v3 }
 0x925   :  { %3102 = vmatpush1.msra.mxu0 %v6298_v52  ;;  %3173 = vmatpush1.msra.mxu1 %v6300_v0 }
 0x926   :  { %3103 = vmatprep.subr.mxu0 %v6304_v46  ;;  %3174 = vmatprep.subr.mxu1 %v6306_v59 }
 0x927   :  { %3104 = vmatpush1.msra.mxu0 %v6310_v1  ;;  %3175 = vmatpush1.msra.mxu1 %v6312_v60 }
 0x928   :  { %3105 = vmatprep.subr.mxu0 %v6316_v61  ;;  %3176 = vmatprep.subr.mxu1 %v6318_v2  ;;  %v7233_v61 = vld [vmem:[#allocation29_spill] sm:$0xff] }
 0x929   :  { %3106 = vmatpush1.msra.mxu0 %v6322_v56  ;;  %3177 = vmatpush1.msra.mxu1 %v6324_v47 }
 0x92a   :  { %3107 = vmatprep.subr.mxu0 %v6328_v23  ;;  %3178 = vmatprep.subr.mxu1 %v6330_v57 }
 0x92b   :  { %3108 = vmatpush1.msra.mxu0 %v6334_v4  ;;  %3179 = vmatpush1.msra.mxu1 %v6336_v55 }
 0x92c   :  { %3109 = vmatprep.subr.mxu0 %v6340_v48  ;;  %3180 = vmatprep.subr.mxu1 %v7232_v63 }
 0x92d   :  { %3110 = vmatpush1.msra.mxu0 %v6346_v54  ;;  %3181 = vmatpush1.msra.mxu1 %v7233_v61 }
 0x92e   :  { %3111 = vmatprep.subr.mxu0 %v6352_v58  ;;  %3182 = vmatprep.subr.mxu1 %v6354_v51  ;;  %v2574_v51 = vld [vmem:[#allocation12 + $0x4] sm:$0xf] }
 0x92f   :  { %3112 = vmatpush1.msra.mxu0 %v6358_v5  ;;  %3183 = vmatpush1.msra.mxu1 %v6360_v6  ;;  %v7234_v5 = vld [vmem:[#allocation38_spill] sm:$0xff] }
 0x930   :  { %3113 = vmatprep.subr.mxu0 %v6364_v7  ;;  %3184 = vmatprep.subr.mxu1 %v6366_v10  ;;  %v7235_v58 = vsub.s32 0, %v7234_v5  ;;  %v7236_v7 = vsub.s32 2, %v7234_v5  ;;  %v7237_v10 = vsub.s32 1, %v7234_v5  ;;  %v7238_v54 = vsub.s32 3, %v7234_v5  ;;  %v7239_v5 = vld [vmem:[#allocation39_spill] sm:$0xff] }
 0x931   :  { %3114 = vmatpush1.msra.mxu0 %v6370_v49  ;;  %3147 = vmatprep.mubr.f32.mxu0 %v7211_v17 }
 0x932   :  { %3185 = vmatpush1.msra.mxu1 %v6374_v62  ;;  %3218 = vmatprep.mubr.f32.mxu1 %v7211_v17  ;;  %v2579_v6 = vrot.slane %v2574_v51, %v7235_v58  ;;  %v2587_v61 = vrot.slane %v2574_v51, %v7236_v7  ;;  %v2583_v49 = vrot.slane %v2574_v51, %v7237_v10 }
 0x933   :  { %3355 = vmatprep.subr.mxu0 %v6183_v32  ;;  %3426 = vmatprep.subr.mxu1 %v6185_v33  ;;  %v2591_v63 = vrot.slane %v2574_v51, %v7238_v54 }
 0x9b0   :  { %v2662_v62 = vpop.f32.mrf.mxu0  ;;  %v2733_v48 = vpop.f32.mrf.mxu1 }
 0x9b1   :  { %v2663_v17 = vadd.f32 %v2662_v62, %v2579_v6  ;;  %v2734_v55 = vadd.f32 %v2733_v48, %v2587_v61 }
 0x9b2   :  { %v2664_v32 = vpop.f32.mrf.mxu0  ;;  %v2735_v4 = vpop.f32.mrf.mxu1 }
 0x9b3   :  { %2738 = vst [vmem:[#allocation3] sm:$0xff] %v2663_v17  ;;  %2740 = vst [vmem:[#allocation3 + $0x10] sm:$0xff] %v2734_v55  ;;  %v2665_v33 = vadd.f32 %v2664_v32, %v2583_v49  ;;  %v2736_v57 = vadd.f32 %v2735_v4, %v2591_v63 }
 0x9b5   :  { %2739 = vst [vmem:[#allocation3 + $0x8] sm:$0xff] %v2665_v33  ;;  %2741 = vst [vmem:[#allocation3 + $0x18] sm:$0xff] %v2736_v57 }
 0x9bc   :  { %v2744_v48 = vld [vmem:[#allocation3] ss:$8 sm:$0xf] }
 0x9d1   :  { %v2877_v58 = vpop.f32.mrf.mxu0  ;;  %v2948_v7 = vpop.f32.mrf.mxu1 }
 0x9d3   :  { %v2879_v23 = vpop.f32.mrf.mxu0  ;;  %v2950_v47 = vpop.f32.mrf.mxu1 }
 0x9d4   :  { %v2957_v10 = vcombine.low %v2877_v58, %v2879_v23  ;;  %v2958_v56 = vcombine.low %v2948_v7, %v2950_v47  ;;  %v3009_v7 = vld [vmem:[#allocation5] sm:$0x1] }
 0x9d6   :  { %v2965_v54 = vrot.slane %v2957_v10, %v7239_v5  ;;  %v2972_v51 = vrot.slane %v2958_v56, %v7239_v5 }
 0x9d8   :  { %v2973_v62 = vcombine.low %v2965_v54, %v2972_v51 }
 0x9da   :  { %v2980_v61 = vrot.slane %v2973_v62, %v7239_v5 }
 0x9dc   :  { %v2982_v17 = vadd.f32 %v2980_v61, %v2744_v48 }
 0x9de   :  { %v4966_v55 = vmul.f32 -1.442695, %v2982_v17  ;;  %v2990_v49 = vrot.slane %v2982_v17, 1  ;;  %v3001_v57 = vrot.slane %v2982_v17, 3  ;;  %v2998_v32 = vrot.slane %v2982_v17, 2 }
 0x9e0   :  { %5133 = vpow2.f32 %v4966_v55  ;;  %v4967_v4 = vmul.f32 -1.442695, %v2990_v49  ;;  %v4968_v6 = vmul.f32 -1.442695, %v3001_v57 }
 0x9e2   :  { %5135 = vpow2.f32 %v4967_v4 }
 0x9e3   :  { %5137 = vpow2.f32 %v4968_v6 }
 0x9ed   :  { %v5134_v63 = vpop.eup %5133 }
 0x9ee   :  { %v2986_v23 = vadd.f32 1.0, %v5134_v63 }
 0x9ef   :  { %v5136_v47 = vpop.eup %5135 }
 0x9f0   :  { %5139 = vrcp.f32 %v2986_v23  ;;  %v2995_v33 = vadd.f32 1.0, %v5136_v47  ;;  %v5138_v56 = vpop.eup %5137 }
 0x9f1   :  { %5141 = vtanh.f32 %v2998_v32  ;;  %v3006_v51 = vadd.f32 1.0, %v5138_v56 }
 0x9f2   :  { %5143 = vrcp.f32 %v2995_v33 }
 0x9f3   :  { %5145 = vrcp.f32 %v3006_v51  ;;  %v6530_v51 = vld [vmem:[#allocation11 + $0x3e8] sm:$0xff] }
 0x9f4   :  { %7260 = vst [vmem:[#allocation40_spill] sm:$0xff] %v6530_v51 }
 0x9fd   :  { %v5140_v58 = vpop.eup %5139 }
 0x9fe   :  { %v5142_v10 = vpop.eup %5141 }
 0x9ff   :  { %v5144_v54 = vpop.eup %5143  ;;  %v3011_v61 = vmul.f32 %v5142_v10, %v5140_v58 }
 0xa00   :  { %v3010_v62 = vmul.f32 %v5144_v54, %v3009_v7  ;;  %v5146_v17 = vpop.eup %5145 }
 0xa02   :  { %v3012_v48 = vadd.f32 %v3011_v61, %v3010_v62  ;;  %v6532_v62 = vld [vmem:[#allocation11 + $0x3f8] sm:$0xff]  ;;  %v6536_v61 = vld [vmem:[#allocation11 + $0x3e0] sm:$0xff] }
 0xa03   :  { %7261 = vst [vmem:[#allocation38_spill] sm:$0xff] %v6532_v62 }
 0xa04   :  { %5147 = vtanh.f32 %v3012_v48  ;;  %3015 = vst [vmem:[#allocation5] sm:$0x1] %v3012_v48  ;;  %v6538_v48 = vld [vmem:[#allocation11 + $0x3f0] sm:$0xff] }
 0xa0b   :  { %v3281_v23 = vld [vmem:[#allocation5] sm:$0x1] }
 0xa11   :  { %v5148_v55 = vpop.eup %5147 }
 0xa12   :  { %v3014_v49 = vmul.f32 %v5148_v55, %v5146_v17  ;;  %v6542_v17 = vld [vmem:[#allocation11 + $0x3c8] sm:$0xff]  ;;  %v6544_v55 = vld [vmem:[#allocation11 + $0x3d8] sm:$0xff] }
 0xa14   :  { %3016 = vst [vmem:[#allocation4] sm:$0x1] %v3014_v49  ;;  %v6548_v49 = vld [vmem:[#allocation11 + $0x3c0] sm:$0xff] }
 0xa1b   :  { %v3018_v4 = vld [vmem:[#allocation4] sm:$0x1] }
 0xa1c   :  { %3148 = vmatmul.mubr.f32.vlgmr.msra.gmra.mxu0 %v3018_v4  ;;  %3219 = vmatmul.mubr.f32.vlgmr.msra.gmra.mxu1 %v3018_v4  ;;  %v6550_v4 = vld [vmem:[#allocation11 + $0x3d0] sm:$0xff] }
 0xa1d   :  { %3356 = vmatpush1.msra.mxu0 %v6194_v8  ;;  %3427 = vmatpush1.msra.mxu1 %v6196_v9  ;;  %v7240_v8 = vld [vmem:[#allocation19_spill] sm:$0xff]  ;;  %v7241_v9 = vld [vmem:[#allocation20_spill] sm:$0xff] }
 0xa1e   :  { %3357 = vmatprep.subr.mxu0 %v6198_v11  ;;  %3428 = vmatprep.subr.mxu1 %v6200_v12  ;;  %v7242_v11 = vld [vmem:[#allocation21_spill] sm:$0xff]  ;;  %v7243_v12 = vld [vmem:[#allocation22_spill] sm:$0xff] }
 0xa1f   :  { %3358 = vmatpush1.msra.mxu0 %v6202_v13  ;;  %3429 = vmatpush1.msra.mxu1 %v6204_v14  ;;  %v7244_v13 = vld [vmem:[#allocation23_spill] sm:$0xff]  ;;  %v7245_v14 = vld [vmem:[#allocation24_spill] sm:$0xff] }
 0xa20   :  { %3359 = vmatprep.subr.mxu0 %v6208_v15  ;;  %3430 = vmatprep.subr.mxu1 %v6210_v16  ;;  %v7246_v15 = vld [vmem:[#allocation25_spill] sm:$0xff]  ;;  %v7247_v16 = vld [vmem:[#allocation26_spill] sm:$0xff] }
 0xa21   :  { %3360 = vmatpush1.msra.mxu0 %v6214_v18  ;;  %3431 = vmatpush1.msra.mxu1 %v6216_v19  ;;  %v7248_v18 = vld [vmem:[#allocation27_spill] sm:$0xff]  ;;  %v7249_v19 = vld [vmem:[#allocation28_spill] sm:$0xff] }
 0xa22   :  { %3361 = vmatprep.subr.mxu0 %v6220_v20  ;;  %3432 = vmatprep.subr.mxu1 %v6222_v21  ;;  %v7250_v20 = vld [vmem:[#allocation29_spill] sm:$0xff]  ;;  %v7251_v21 = vld [vmem:[#allocation30_spill] sm:$0xff] }
 0xa23   :  { %3362 = vmatpush1.msra.mxu0 %v6226_v22  ;;  %3433 = vmatpush1.msra.mxu1 %v6228_v24  ;;  %v7252_v22 = vld [vmem:[#allocation31_spill] sm:$0xff]  ;;  %v7253_v24 = vld [vmem:[#allocation32_spill] sm:$0xff] }
 0xa24   :  { %3363 = vmatprep.subr.mxu0 %v6232_v25  ;;  %3434 = vmatprep.subr.mxu1 %v6234_v26  ;;  %v7254_v25 = vld [vmem:[#allocation33_spill] sm:$0xff]  ;;  %v7255_v26 = vld [vmem:[#allocation34_spill] sm:$0xff] }
 0xa25   :  { %3364 = vmatpush1.msra.mxu0 %v6238_v27  ;;  %3435 = vmatpush1.msra.mxu1 %v6240_v28  ;;  %v7256_v27 = vld [vmem:[#allocation35_spill] sm:$0xff]  ;;  %v7257_v28 = vld [vmem:[#allocation36_spill] sm:$0xff] }
 0xa26   :  { %3365 = vmatprep.subr.mxu0 %v6244_v29  ;;  %3436 = vmatprep.subr.mxu1 %v6246_v30  ;;  %v7258_v29 = vmov 0.0   ;;  %v7259_v30 = vld [vmem:[#allocation37_spill] sm:$0xff] }
 0xa27   :  { %3366 = vmatpush1.msra.mxu0 %v6250_v31  ;;  %3437 = vmatpush1.msra.mxu1 %v6252_v34 }
 0xa28   :  { %3367 = vmatprep.subr.mxu0 %v6256_v35  ;;  %3438 = vmatprep.subr.mxu1 %v6258_v36 }
 0xa29   :  { %3368 = vmatpush1.msra.mxu0 %v6262_v37  ;;  %3439 = vmatpush1.msra.mxu1 %v6264_v38 }
 0xa2a   :  { %3369 = vmatprep.subr.mxu0 %v6268_v39  ;;  %3440 = vmatprep.subr.mxu1 %v6270_v40 }
 0xa2b   :  { %3370 = vmatpush1.msra.mxu0 %v6274_v41  ;;  %3441 = vmatpush1.msra.mxu1 %v6276_v42 }
 0xa2c   :  { %3371 = vmatprep.subr.mxu0 %v6280_v43  ;;  %3442 = vmatprep.subr.mxu1 %v6282_v44  ;;  %v3017_v43 = vld [vmem:[#allocation3 + $0x1] ss:$8 sm:$0xf] }
 0xa2d   :  { %3372 = vmatpush1.msra.mxu0 %v6286_v45  ;;  %3443 = vmatpush1.msra.mxu1 %v6288_v50 }
 0xa2e   :  { %3373 = vmatprep.subr.mxu0 %v6292_v53  ;;  %3444 = vmatprep.subr.mxu1 %v6294_v3 }
 0xa2f   :  { %3374 = vmatpush1.msra.mxu0 %v6298_v52  ;;  %3445 = vmatpush1.msra.mxu1 %v6300_v0 }
 0xa30   :  { %3375 = vmatprep.subr.mxu0 %v6304_v46  ;;  %3446 = vmatprep.subr.mxu1 %v6306_v59 }
 0xa31   :  { %3376 = vmatpush1.msra.mxu0 %v6310_v1  ;;  %3447 = vmatpush1.msra.mxu1 %v6312_v60 }
 0xa32   :  { %3377 = vmatprep.subr.mxu0 %v7240_v8  ;;  %3448 = vmatprep.subr.mxu1 %v6318_v2  ;;  %v6554_v8 = vld [vmem:[#allocation11 + $0x3a8] sm:$0xff] }
 0xa33   :  { %3378 = vmatpush1.msra.mxu0 %v7241_v9  ;;  %3449 = vmatpush1.msra.mxu1 %v7242_v11  ;;  %v6556_v9 = vld [vmem:[#allocation11 + $0x3b8] sm:$0xff]  ;;  %v6560_v11 = vld [vmem:[#allocation11 + $0x3a0] sm:$0xff] }
 0xa34   :  { %3379 = vmatprep.subr.mxu0 %v7243_v12  ;;  %3450 = vmatprep.subr.mxu1 %v7244_v13  ;;  %v6562_v12 = vld [vmem:[#allocation11 + $0x3b0] sm:$0xff]  ;;  %v6566_v13 = vld [vmem:[#allocation11 + $0x388] sm:$0xff] }
 0xa35   :  { %3380 = vmatpush1.msra.mxu0 %v7245_v14  ;;  %3451 = vmatpush1.msra.mxu1 %v7246_v15  ;;  %v6568_v14 = vld [vmem:[#allocation11 + $0x398] sm:$0xff]  ;;  %v6572_v15 = vld [vmem:[#allocation11 + $0x380] sm:$0xff] }
 0xa36   :  { %3381 = vmatprep.subr.mxu0 %v7247_v16  ;;  %3452 = vmatprep.subr.mxu1 %v7248_v18  ;;  %v6574_v16 = vld [vmem:[#allocation11 + $0x390] sm:$0xff]  ;;  %v6578_v18 = vld [vmem:[#allocation11 + $0x368] sm:$0xff] }
 0xa37   :  { %3382 = vmatpush1.msra.mxu0 %v7249_v19  ;;  %3453 = vmatpush1.msra.mxu1 %v7250_v20  ;;  %v6580_v19 = vld [vmem:[#allocation11 + $0x378] sm:$0xff]  ;;  %v6584_v20 = vld [vmem:[#allocation11 + $0x360] sm:$0xff] }
 0xa38   :  { %3383 = vmatprep.subr.mxu0 %v7251_v21  ;;  %3454 = vmatprep.subr.mxu1 %v7252_v22  ;;  %v6586_v21 = vld [vmem:[#allocation11 + $0x370] sm:$0xff]  ;;  %v6590_v22 = vld [vmem:[#allocation11 + $0x348] sm:$0xff] }
 0xa39   :  { %3384 = vmatpush1.msra.mxu0 %v7253_v24  ;;  %3455 = vmatpush1.msra.mxu1 %v7254_v25  ;;  %v6592_v24 = vld [vmem:[#allocation11 + $0x358] sm:$0xff]  ;;  %v6596_v25 = vld [vmem:[#allocation11 + $0x340] sm:$0xff] }
 0xa3a   :  { %3385 = vmatprep.subr.mxu0 %v7255_v26  ;;  %3456 = vmatprep.subr.mxu1 %v7256_v27  ;;  %v6598_v26 = vld [vmem:[#allocation11 + $0x350] sm:$0xff]  ;;  %v6602_v27 = vld [vmem:[#allocation11 + $0x328] sm:$0xff] }
 0xa3b   :  { %3386 = vmatpush1.msra.mxu0 %v7257_v28  ;;  %3419 = vmatprep.mubr.f32.mxu0 %v7258_v29  ;;  %v6604_v28 = vld [vmem:[#allocation11 + $0x338] sm:$0xff] }
 0xa3c   :  { %3457 = vmatpush1.msra.mxu1 %v7259_v30  ;;  %3490 = vmatprep.mubr.f32.mxu1 %v7258_v29  ;;  %v6608_v30 = vld [vmem:[#allocation11 + $0x320] sm:$0xff] }
 0xa3d   :  { %3627 = vmatprep.subr.mxu0 %v6530_v51  ;;  %3698 = vmatprep.subr.mxu1 %v6532_v62 }
 0xadc   :  { %v3149_v31 = vpop.f32.mrf.mxu0  ;;  %v3220_v34 = vpop.f32.mrf.mxu1 }
 0xade   :  { %v3151_v35 = vpop.f32.mrf.mxu0  ;;  %v3222_v36 = vpop.f32.mrf.mxu1 }
 0xadf   :  { %v3229_v37 = vcombine.low %v3149_v31, %v3151_v35  ;;  %v3230_v38 = vcombine.low %v3220_v34, %v3222_v36  ;;  %v6610_v31 = vld [vmem:[#allocation11 + $0x330] sm:$0xff]  ;;  %v6614_v34 = vld [vmem:[#allocation11 + $0x308] sm:$0xff]  ;;  %v6616_v35 = vld [vmem:[#allocation11 + $0x318] sm:$0xff] }
 0xae0   :  { %v6620_v36 = vld [vmem:[#allocation11 + $0x300] sm:$0xff] }
 0xae1   :  { %v3237_v39 = vrot.slane %v3229_v37, %v7239_v5  ;;  %v3244_v40 = vrot.slane %v3230_v38, %v7239_v5  ;;  %v6622_v37 = vld [vmem:[#allocation11 + $0x310] sm:$0xff]  ;;  %v6626_v38 = vld [vmem:[#allocation11 + $0x2e8] sm:$0xff] }
 0xae3   :  { %v3245_v41 = vcombine.low %v3237_v39, %v3244_v40  ;;  %v6628_v39 = vld [vmem:[#allocation11 + $0x2f8] sm:$0xff]  ;;  %v6632_v40 = vld [vmem:[#allocation11 + $0x2e0] sm:$0xff] }
 0xae5   :  { %v3252_v42 = vrot.slane %v3245_v41, %v7239_v5  ;;  %v6634_v41 = vld [vmem:[#allocation11 + $0x2f0] sm:$0xff] }
 0xae7   :  { %v3254_v44 = vadd.f32 %v3252_v42, %v3017_v43  ;;  %v6638_v42 = vld [vmem:[#allocation11 + $0x2c8] sm:$0xff]  ;;  %v6640_v43 = vld [vmem:[#allocation11 + $0x2d8] sm:$0xff] }
 0xae9   :  { %v4969_v45 = vmul.f32 -1.442695, %v3254_v44  ;;  %v3262_v50 = vrot.slane %v3254_v44, 1  ;;  %v3273_v3 = vrot.slane %v3254_v44, 3  ;;  %v3270_v46 = vrot.slane %v3254_v44, 2  ;;  %v6644_v44 = vld [vmem:[#allocation11 + $0x2c0] sm:$0xff] }
 0xaeb   :  { %5149 = vpow2.f32 %v4969_v45  ;;  %v4970_v53 = vmul.f32 -1.442695, %v3262_v50  ;;  %v4971_v52 = vmul.f32 -1.442695, %v3273_v3  ;;  %v6646_v45 = vld [vmem:[#allocation11 + $0x2d0] sm:$0xff]  ;;  %v6650_v50 = vld [vmem:[#allocation11 + $0x2a8] sm:$0xff] }
 0xaec   :  { %v6656_v3 = vld [vmem:[#allocation11 + $0x2a0] sm:$0xff] }
 0xaed   :  { %5151 = vpow2.f32 %v4970_v53  ;;  %v6652_v53 = vld [vmem:[#allocation11 + $0x2b8] sm:$0xff] }
 0xaee   :  { %5153 = vpow2.f32 %v4971_v52  ;;  %v6658_v52 = vld [vmem:[#allocation11 + $0x2b0] sm:$0xff] }
 0xaf8   :  { %v5150_v0 = vpop.eup %5149 }
 0xaf9   :  { %v3258_v59 = vadd.f32 1.0, %v5150_v0  ;;  %v6662_v0 = vld [vmem:[#allocation11 + $0x288] sm:$0xff] }
 0xafa   :  { %v5152_v1 = vpop.eup %5151 }
 0xafb   :  { %5155 = vrcp.f32 %v3258_v59  ;;  %v3267_v60 = vadd.f32 1.0, %v5152_v1  ;;  %v5154_v2 = vpop.eup %5153  ;;  %v6668_v59 = vld [vmem:[#allocation11 + $0x280] sm:$0xff]  ;;  %v6670_v1 = vld [vmem:[#allocation11 + $0x290] sm:$0xff] }
 0xafc   :  { %5157 = vtanh.f32 %v3270_v46  ;;  %v3278_v32 = vadd.f32 1.0, %v5154_v2  ;;  %v6664_v46 = vld [vmem:[#allocation11 + $0x298] sm:$0xff]  ;;  %7262 = vst [vmem:[#allocation39_spill] sm:$0xff] %v6668_v59  ;;  %7263 = vst [vmem:[#allocation19_spill] sm:$0xff] %v6670_v1 }
 0xafd   :  { %5159 = vrcp.f32 %v3267_v60  ;;  %v6674_v60 = vld [vmem:[#allocation11 + $0x268] sm:$0xff]  ;;  %v6676_v2 = vld [vmem:[#allocation11 + $0x278] sm:$0xff] }
 0xafe   :  { %5161 = vrcp.f32 %v3278_v32  ;;  %7264 = vst [vmem:[#allocation20_spill] sm:$0xff] %v6674_v60  ;;  %7265 = vst [vmem:[#allocation21_spill] sm:$0xff] %v6676_v2  ;;  %v6686_v32 = vld [vmem:[#allocation11 + $0x258] sm:$0xff] }
 0xaff   :  { %7269 = vst [vmem:[#allocation25_spill] sm:$0xff] %v6686_v32 }
 0xb08   :  { %v5156_v57 = vpop.eup %5155 }
 0xb09   :  { %v5158_v6 = vpop.eup %5157 }
 0xb0a   :  { %v5160_v63 = vpop.eup %5159  ;;  %v3283_v33 = vmul.f32 %v5158_v6, %v5156_v57  ;;  %v6678_v57 = vld [vmem:[#allocation11 + $0x260] sm:$0xff]  ;;  %v6682_v6 = vld [vmem:[#allocation11 + $0x270] sm:$0xff] }
 0xb0b   :  { %v3282_v47 = vmul.f32 %v5160_v63, %v3281_v23  ;;  %v5162_v58 = vpop.eup %5161  ;;  %7266 = vst [vmem:[#allocation22_spill] sm:$0xff] %v6678_v57  ;;  %7267 = vst [vmem:[#allocation23_spill] sm:$0xff] %v6682_v6  ;;  %v6684_v63 = vld [vmem:[#allocation11 + $0x248] sm:$0xff]  ;;  %v6690_v23 = vld [vmem:[#allocation11 + $0x240] sm:$0xff] }
 0xb0c   :  { %7268 = vst [vmem:[#allocation24_spill] sm:$0xff] %v6684_v63  ;;  %7270 = vst [vmem:[#allocation26_spill] sm:$0xff] %v6690_v23 }
 0xb0d   :  { %v3284_v56 = vadd.f32 %v3283_v33, %v3282_v47  ;;  %v6692_v47 = vld [vmem:[#allocation11 + $0x250] sm:$0xff]  ;;  %v6694_v33 = vld [vmem:[#allocation11 + $0x228] sm:$0xff] }
 0xb0e   :  { %7271 = vst [vmem:[#allocation27_spill] sm:$0xff] %v6692_v47  ;;  %7272 = vst [vmem:[#allocation28_spill] sm:$0xff] %v6694_v33 }
 0xb0f   :  { %5163 = vtanh.f32 %v3284_v56  ;;  %3287 = vst [vmem:[#allocation5] sm:$0x1] %v3284_v56  ;;  %v6698_v56 = vld [vmem:[#allocation11 + $0x238] sm:$0xff] }
 0xb10   :  { %7273 = vst [vmem:[#allocation29_spill] sm:$0xff] %v6698_v56 }
 0xb1c   :  { %v5164_v7 = vpop.eup %5163 }
 0xb1d   :  { %v3286_v10 = vmul.f32 %v5164_v7, %v5162_v58  ;;  %v6700_v58 = vld [vmem:[#allocation11 + $0x220] sm:$0xff]  ;;  %v6702_v7 = vld [vmem:[#allocation11 + $0x230] sm:$0xff] }
 0xb1e   :  { %7274 = vst [vmem:[#allocation30_spill] sm:$0xff] %v6700_v58  ;;  %7275 = vst [vmem:[#allocation31_spill] sm:$0xff] %v6702_v7 }
 0xb1f   :  { %3288 = vst [vmem:[#allocation4] sm:$0x1] %v3286_v10  ;;  %v6706_v10 = vld [vmem:[#allocation11 + $0x208] sm:$0xff] }
 0xb20   :  { %7276 = vst [vmem:[#allocation32_spill] sm:$0xff] %v6706_v10 }
 0xb26   :  { %v3290_v54 = vld [vmem:[#allocation4] sm:$0x1] }
 0xb27   :  { %3420 = vmatmul.mubr.f32.vlgmr.msra.gmra.mxu0 %v3290_v54  ;;  %3491 = vmatmul.mubr.f32.vlgmr.msra.gmra.mxu1 %v3290_v54  ;;  %v6708_v54 = vld [vmem:[#allocation11 + $0x218] sm:$0xff] }
 0xb28   :  { %3691 = vmatprep.mubr.f32.mxu0 %v7258_v29  ;;  %3762 = vmatprep.mubr.f32.mxu1 %v7258_v29  ;;  %7277 = vst [vmem:[#allocation33_spill] sm:$0xff] %v6708_v54  ;;  %v6712_v29 = vld [vmem:[#allocation11 + $0x200] sm:$0xff] }
 0xb29   :  { %3628 = vmatpush1.msra.mxu0 %v6536_v61  ;;  %3699 = vmatpush1.msra.mxu1 %v6538_v48  ;;  %7278 = vst [vmem:[#allocation34_spill] sm:$0xff] %v6712_v29 }
 0xb2a   :  { %3629 = vmatprep.subr.mxu0 %v6542_v17  ;;  %3700 = vmatprep.subr.mxu1 %v6544_v55 }
 0xb2b   :  { %3630 = vmatpush1.msra.mxu0 %v6548_v49  ;;  %3701 = vmatpush1.msra.mxu1 %v6550_v4 }
 0xb2c   :  { %3631 = vmatprep.subr.mxu0 %v6554_v8  ;;  %3702 = vmatprep.subr.mxu1 %v6556_v9 }
 0xb2d   :  { %3632 = vmatpush1.msra.mxu0 %v6560_v11  ;;  %3703 = vmatpush1.msra.mxu1 %v6562_v12 }
 0xb2e   :  { %3633 = vmatprep.subr.mxu0 %v6566_v13  ;;  %3704 = vmatprep.subr.mxu1 %v6568_v14 }
 0xb2f   :  { %3634 = vmatpush1.msra.mxu0 %v6572_v15  ;;  %3705 = vmatpush1.msra.mxu1 %v6574_v16 }
 0xb30   :  { %3635 = vmatprep.subr.mxu0 %v6578_v18  ;;  %3706 = vmatprep.subr.mxu1 %v6580_v19 }
 0xb31   :  { %3636 = vmatpush1.msra.mxu0 %v6584_v20  ;;  %3707 = vmatpush1.msra.mxu1 %v6586_v21 }
 0xb32   :  { %3637 = vmatprep.subr.mxu0 %v6590_v22  ;;  %3708 = vmatprep.subr.mxu1 %v6592_v24 }
 0xb33   :  { %3638 = vmatpush1.msra.mxu0 %v6596_v25  ;;  %3709 = vmatpush1.msra.mxu1 %v6598_v26 }
 0xb34   :  { %3639 = vmatprep.subr.mxu0 %v6602_v27  ;;  %3710 = vmatprep.subr.mxu1 %v6604_v28 }
 0xb35   :  { %3640 = vmatpush1.msra.mxu0 %v6608_v30  ;;  %3711 = vmatpush1.msra.mxu1 %v6610_v31 }
 0xb36   :  { %3641 = vmatprep.subr.mxu0 %v6614_v34  ;;  %3712 = vmatprep.subr.mxu1 %v6616_v35 }
 0xb37   :  { %3642 = vmatpush1.msra.mxu0 %v6620_v36  ;;  %3713 = vmatpush1.msra.mxu1 %v6622_v37 }
 0xb38   :  { %3643 = vmatprep.subr.mxu0 %v6626_v38  ;;  %3714 = vmatprep.subr.mxu1 %v6628_v39 }
 0xb39   :  { %3644 = vmatpush1.msra.mxu0 %v6632_v40  ;;  %3715 = vmatpush1.msra.mxu1 %v6634_v41 }
 0xb3a   :  { %3645 = vmatprep.subr.mxu0 %v6638_v42  ;;  %3716 = vmatprep.subr.mxu1 %v6640_v43 }
 0xb3b   :  { %3646 = vmatpush1.msra.mxu0 %v6644_v44  ;;  %3717 = vmatpush1.msra.mxu1 %v6646_v45 }
 0xb3c   :  { %3647 = vmatprep.subr.mxu0 %v6650_v50  ;;  %3718 = vmatprep.subr.mxu1 %v6652_v53 }
 0xb3d   :  { %3648 = vmatpush1.msra.mxu0 %v6656_v3  ;;  %3719 = vmatpush1.msra.mxu1 %v6658_v52 }
 0xb3e   :  { %3649 = vmatprep.subr.mxu0 %v6662_v0  ;;  %3720 = vmatprep.subr.mxu1 %v6664_v46 }
 0xb3f   :  { %3650 = vmatpush1.msra.mxu0 %v6668_v59  ;;  %3721 = vmatpush1.msra.mxu1 %v6670_v1 }
 0xb40   :  { %3651 = vmatprep.subr.mxu0 %v6674_v60  ;;  %3722 = vmatprep.subr.mxu1 %v6676_v2 }
 0xb41   :  { %3652 = vmatpush1.msra.mxu0 %v6678_v57  ;;  %3723 = vmatpush1.msra.mxu1 %v6682_v6 }
 0xb42   :  { %3653 = vmatprep.subr.mxu0 %v6684_v63  ;;  %3724 = vmatprep.subr.mxu1 %v6686_v32  ;;  %v6714_v32 = vld [vmem:[#allocation11 + $0x210] sm:$0xff] }
 0xb43   :  { %3654 = vmatpush1.msra.mxu0 %v6690_v23  ;;  %3725 = vmatpush1.msra.mxu1 %v6692_v47  ;;  %7279 = vst [vmem:[#allocation35_spill] sm:$0xff] %v6714_v32 }
 0xb44   :  { %3655 = vmatprep.subr.mxu0 %v6694_v33  ;;  %3726 = vmatprep.subr.mxu1 %v6698_v56 }
 0xb45   :  { %3656 = vmatpush1.msra.mxu0 %v6700_v58  ;;  %3727 = vmatpush1.msra.mxu1 %v6702_v7 }
 0xb46   :  { %3657 = vmatprep.subr.mxu0 %v6706_v10  ;;  %3728 = vmatprep.subr.mxu1 %v6708_v54 }
 0xb47   :  { %3658 = vmatpush1.msra.mxu0 %v6712_v29  ;;  %3729 = vmatpush1.msra.mxu1 %v6714_v32  ;;  %v3289_v29 = vld [vmem:[#allocation3 + $0x2] ss:$8 sm:$0xf] }
 0xb48   :  { %3899 = vmatprep.subr.mxu0 %v6530_v51  ;;  %3970 = vmatprep.subr.mxu1 %v6532_v62 }
 0xbe7   :  { %v3421_v56 = vpop.f32.mrf.mxu0  ;;  %v3492_v33 = vpop.f32.mrf.mxu1 }
 0xbe9   :  { %v3423_v47 = vpop.f32.mrf.mxu0  ;;  %v3494_v23 = vpop.f32.mrf.mxu1 }
 0xbea   :  { %v3501_v63 = vcombine.low %v3421_v56, %v3423_v47  ;;  %v3502_v58 = vcombine.low %v3492_v33, %v3494_v23 }
 0xbec   :  { %v3509_v7 = vrot.slane %v3501_v63, %v7239_v5  ;;  %v3516_v10 = vrot.slane %v3502_v58, %v7239_v5 }
 0xbee   :  { %v3517_v6 = vcombine.low %v3509_v7, %v3516_v10  ;;  %v3553_v7 = vld [vmem:[#allocation5] sm:$0x1]  ;;  %v7281_v10 = vld [vmem:[#allocation19_spill] sm:$0xff] }
 0xbf0   :  { %v3524_v54 = vrot.slane %v3517_v6, %v7239_v5 }
 0xbf2   :  { %v3526_v57 = vadd.f32 %v3524_v54, %v3289_v29  ;;  %v7282_v54 = vld [vmem:[#allocation20_spill] sm:$0xff] }
 0xbf4   :  { %v4972_v32 = vmul.f32 -1.442695, %v3526_v57  ;;  %v3534_v2 = vrot.slane %v3526_v57, 1  ;;  %v3545_v62 = vrot.slane %v3526_v57, 3  ;;  %v3542_v59 = vrot.slane %v3526_v57, 2 }
 0xbf6   :  { %5165 = vpow2.f32 %v4972_v32  ;;  %v4973_v51 = vmul.f32 -1.442695, %v3534_v2  ;;  %v4974_v60 = vmul.f32 -1.442695, %v3545_v62 }
 0xbf8   :  { %5167 = vpow2.f32 %v4973_v51 }
 0xbf9   :  { %5169 = vpow2.f32 %v4974_v60 }
 0xc03   :  { %v5166_v1 = vpop.eup %5165 }
 0xc04   :  { %v3530_v47 = vadd.f32 1.0, %v5166_v1 }
 0xc05   :  { %v5168_v23 = vpop.eup %5167 }
 0xc06   :  { %5171 = vrcp.f32 %v3530_v47  ;;  %v3539_v63 = vadd.f32 1.0, %v5168_v23  ;;  %v5170_v33 = vpop.eup %5169  ;;  %v7283_v47 = vld [vmem:[#allocation21_spill] sm:$0xff]  ;;  %v7284_v23 = vld [vmem:[#allocation22_spill] sm:$0xff] }
 0xc07   :  { %5173 = vtanh.f32 %v3542_v59  ;;  %v3550_v58 = vadd.f32 1.0, %v5170_v33  ;;  %v7280_v59 = vld [vmem:[#allocation39_spill] sm:$0xff]  ;;  %v7286_v33 = vld [vmem:[#allocation24_spill] sm:$0xff] }
 0xc08   :  { %5175 = vrcp.f32 %v3539_v63  ;;  %v7285_v63 = vld [vmem:[#allocation23_spill] sm:$0xff] }
 0xc09   :  { %5177 = vrcp.f32 %v3550_v58  ;;  %v7290_v58 = vld [vmem:[#allocation28_spill] sm:$0xff] }
 0xc13   :  { %v5172_v6 = vpop.eup %5171 }
 0xc14   :  { %v5174_v56 = vpop.eup %5173 }
 0xc15   :  { %v5176_v29 = vpop.eup %5175  ;;  %v3555_v2 = vmul.f32 %v5174_v56, %v5172_v6  ;;  %v7287_v6 = vld [vmem:[#allocation25_spill] sm:$0xff]  ;;  %v7288_v56 = vld [vmem:[#allocation26_spill] sm:$0xff] }
 0xc16   :  { %v3554_v32 = vmul.f32 %v5176_v29, %v3553_v7  ;;  %v5178_v62 = vpop.eup %5177  ;;  %v7289_v29 = vld [vmem:[#allocation27_spill] sm:$0xff]  ;;  %v7291_v7 = vld [vmem:[#allocation29_spill] sm:$0xff] }
 0xc18   :  { %v3556_v51 = vadd.f32 %v3555_v2, %v3554_v32  ;;  %v7292_v32 = vld [vmem:[#allocation30_spill] sm:$0xff]  ;;  %v7293_v2 = vld [vmem:[#allocation31_spill] sm:$0xff] }
 0xc1a   :  { %5179 = vtanh.f32 %v3556_v51  ;;  %3559 = vst [vmem:[#allocation5] sm:$0x1] %v3556_v51  ;;  %v7294_v51 = vld [vmem:[#allocation32_spill] sm:$0xff] }
 0xc27   :  { %v5180_v1 = vpop.eup %5179 }
 0xc28   :  { %v3558_v57 = vmul.f32 %v5180_v1, %v5178_v62  ;;  %v7295_v62 = vld [vmem:[#allocation33_spill] sm:$0xff]  ;;  %v7296_v1 = vld [vmem:[#allocation34_spill] sm:$0xff] }
 0xc2a   :  { %3560 = vst [vmem:[#allocation4] sm:$0x1] %v3558_v57  ;;  %v7297_v57 = vmov 0.0  }
 0xc31   :  { %v3562_v60 = vld [vmem:[#allocation4] sm:$0x1] }
 0xc32   :  { %3692 = vmatmul.mubr.f32.vlgmr.msra.gmra.mxu0 %v3562_v60  ;;  %3763 = vmatmul.mubr.f32.vlgmr.msra.gmra.mxu1 %v3562_v60  ;;  %v7298_v60 = vld [vmem:[#allocation35_spill] sm:$0xff] }
 0xc33   :  { %3900 = vmatpush1.msra.mxu0 %v6536_v61  ;;  %3971 = vmatpush1.msra.mxu1 %v6538_v48 }
 0xc34   :  { %3901 = vmatprep.subr.mxu0 %v6542_v17  ;;  %3972 = vmatprep.subr.mxu1 %v6544_v55 }
 0xc35   :  { %3902 = vmatpush1.msra.mxu0 %v6548_v49  ;;  %3973 = vmatpush1.msra.mxu1 %v6550_v4 }
 0xc36   :  { %3903 = vmatprep.subr.mxu0 %v6554_v8  ;;  %3974 = vmatprep.subr.mxu1 %v6556_v9 }
 0xc37   :  { %3904 = vmatpush1.msra.mxu0 %v6560_v11  ;;  %3975 = vmatpush1.msra.mxu1 %v6562_v12 }
 0xc38   :  { %3905 = vmatprep.subr.mxu0 %v6566_v13  ;;  %3976 = vmatprep.subr.mxu1 %v6568_v14 }
 0xc39   :  { %3906 = vmatpush1.msra.mxu0 %v6572_v15  ;;  %3977 = vmatpush1.msra.mxu1 %v6574_v16 }
 0xc3a   :  { %3907 = vmatprep.subr.mxu0 %v6578_v18  ;;  %3978 = vmatprep.subr.mxu1 %v6580_v19 }
 0xc3b   :  { %3908 = vmatpush1.msra.mxu0 %v6584_v20  ;;  %3979 = vmatpush1.msra.mxu1 %v6586_v21 }
 0xc3c   :  { %3909 = vmatprep.subr.mxu0 %v6590_v22  ;;  %3980 = vmatprep.subr.mxu1 %v6592_v24 }
 0xc3d   :  { %3910 = vmatpush1.msra.mxu0 %v6596_v25  ;;  %3981 = vmatpush1.msra.mxu1 %v6598_v26 }
 0xc3e   :  { %3911 = vmatprep.subr.mxu0 %v6602_v27  ;;  %3982 = vmatprep.subr.mxu1 %v6604_v28 }
 0xc3f   :  { %3912 = vmatpush1.msra.mxu0 %v6608_v30  ;;  %3983 = vmatpush1.msra.mxu1 %v6610_v31 }
 0xc40   :  { %3913 = vmatprep.subr.mxu0 %v6614_v34  ;;  %3984 = vmatprep.subr.mxu1 %v6616_v35 }
 0xc41   :  { %3914 = vmatpush1.msra.mxu0 %v6620_v36  ;;  %3985 = vmatpush1.msra.mxu1 %v6622_v37 }
 0xc42   :  { %3915 = vmatprep.subr.mxu0 %v6626_v38  ;;  %3986 = vmatprep.subr.mxu1 %v6628_v39 }
 0xc43   :  { %3916 = vmatpush1.msra.mxu0 %v6632_v40  ;;  %3987 = vmatpush1.msra.mxu1 %v6634_v41 }
 0xc44   :  { %3917 = vmatprep.subr.mxu0 %v6638_v42  ;;  %3988 = vmatprep.subr.mxu1 %v6640_v43 }
 0xc45   :  { %3918 = vmatpush1.msra.mxu0 %v6644_v44  ;;  %3989 = vmatpush1.msra.mxu1 %v6646_v45 }
 0xc46   :  { %3919 = vmatprep.subr.mxu0 %v6650_v50  ;;  %3990 = vmatprep.subr.mxu1 %v6652_v53 }
 0xc47   :  { %3920 = vmatpush1.msra.mxu0 %v6656_v3  ;;  %3991 = vmatpush1.msra.mxu1 %v6658_v52 }
 0xc48   :  { %3921 = vmatprep.subr.mxu0 %v6662_v0  ;;  %3992 = vmatprep.subr.mxu1 %v6664_v46 }
 0xc49   :  { %3922 = vmatpush1.msra.mxu0 %v7280_v59  ;;  %3993 = vmatpush1.msra.mxu1 %v7281_v10 }
 0xc4a   :  { %3923 = vmatprep.subr.mxu0 %v7282_v54  ;;  %3994 = vmatprep.subr.mxu1 %v7283_v47 }
 0xc4b   :  { %3924 = vmatpush1.msra.mxu0 %v7284_v23  ;;  %3995 = vmatpush1.msra.mxu1 %v7285_v63 }
 0xc4c   :  { %3925 = vmatprep.subr.mxu0 %v7286_v33  ;;  %3996 = vmatprep.subr.mxu1 %v7287_v6 }
 0xc4d   :  { %3926 = vmatpush1.msra.mxu0 %v7288_v56  ;;  %3997 = vmatpush1.msra.mxu1 %v7289_v29  ;;  %v7299_v29 = vld [vmem:[#allocation40_spill] sm:$0xff] }
 0xc4e   :  { %3927 = vmatprep.subr.mxu0 %v7290_v58  ;;  %3998 = vmatprep.subr.mxu1 %v7291_v7  ;;  %v7300_v58 = vld [vmem:[#allocation38_spill] sm:$0xff] }
 0xc4f   :  { %3928 = vmatpush1.msra.mxu0 %v7292_v32  ;;  %3999 = vmatpush1.msra.mxu1 %v7293_v2 }
 0xc50   :  { %3929 = vmatprep.subr.mxu0 %v7294_v51  ;;  %4000 = vmatprep.subr.mxu1 %v7295_v62 }
 0xc51   :  { %3930 = vmatpush1.msra.mxu0 %v7296_v1  ;;  %3963 = vmatprep.mubr.f32.mxu0 %v7297_v57 }
 0xc52   :  { %4001 = vmatpush1.msra.mxu1 %v7298_v60  ;;  %4034 = vmatprep.mubr.f32.mxu1 %v7297_v57  ;;  %v3561_v60 = vld [vmem:[#allocation3 + $0x3] ss:$8 sm:$0xf] }
 0xc53   :  { %4171 = vmatprep.subr.mxu0 %v7299_v29  ;;  %4242 = vmatprep.subr.mxu1 %v7300_v58 }
 0xcf2   :  { %v3693_v7 = vpop.f32.mrf.mxu0  ;;  %v3764_v32 = vpop.f32.mrf.mxu1 }
 0xcf4   :  { %v3695_v56 = vpop.f32.mrf.mxu0  ;;  %v3766_v2 = vpop.f32.mrf.mxu1 }
 0xcf5   :  { %v3773_v6 = vcombine.low %v3693_v7, %v3695_v56  ;;  %v3774_v51 = vcombine.low %v3764_v32, %v3766_v2 }
 0xcf7   :  { %v3781_v62 = vrot.slane %v3773_v6, %v7239_v5  ;;  %v3788_v1 = vrot.slane %v3774_v51, %v7239_v5 }
 0xcf9   :  { %v3789_v33 = vcombine.low %v3781_v62, %v3788_v1  ;;  %v3825_v62 = vld [vmem:[#allocation5] sm:$0x1] }
 0xcfb   :  { %v3796_v63 = vrot.slane %v3789_v33, %v7239_v5 }
 0xcfd   :  { %v3798_v23 = vadd.f32 %v3796_v63, %v3561_v60  ;;  %v7303_v60 = vld [vmem:[#allocation20_spill] sm:$0xff] }
 0xcff   :  { %v4975_v57 = vmul.f32 -1.442695, %v3798_v23  ;;  %v3806_v47 = vrot.slane %v3798_v23, 1  ;;  %v3817_v58 = vrot.slane %v3798_v23, 3  ;;  %v3814_v59 = vrot.slane %v3798_v23, 2 }
 0xd01   :  { %5181 = vpow2.f32 %v4975_v57  ;;  %v4976_v29 = vmul.f32 -1.442695, %v3806_v47  ;;  %v4977_v54 = vmul.f32 -1.442695, %v3817_v58  ;;  %v7302_v57 = vld [vmem:[#allocation19_spill] sm:$0xff] }
 0xd03   :  { %5183 = vpow2.f32 %v4976_v29 }
 0xd04   :  { %5185 = vpow2.f32 %v4977_v54 }
 0xd0e   :  { %v5182_v10 = vpop.eup %5181 }
 0xd0f   :  { %v3802_v56 = vadd.f32 1.0, %v5182_v10 }
 0xd10   :  { %v5184_v7 = vpop.eup %5183 }
 0xd11   :  { %5187 = vrcp.f32 %v3802_v56  ;;  %v3811_v6 = vadd.f32 1.0, %v5184_v7  ;;  %v5186_v32 = vpop.eup %5185  ;;  %v7304_v56 = vld [vmem:[#allocation21_spill] sm:$0xff]  ;;  %v7305_v7 = vld [vmem:[#allocation22_spill] sm:$0xff] }
 0xd12   :  { %5189 = vtanh.f32 %v3814_v59  ;;  %v3822_v51 = vadd.f32 1.0, %v5186_v32  ;;  %v7301_v59 = vld [vmem:[#allocation39_spill] sm:$0xff]  ;;  %v7307_v32 = vld [vmem:[#allocation24_spill] sm:$0xff] }
 0xd13   :  { %5191 = vrcp.f32 %v3811_v6  ;;  %v7306_v6 = vld [vmem:[#allocation23_spill] sm:$0xff] }
 0xd14   :  { %5193 = vrcp.f32 %v3822_v51  ;;  %v7311_v51 = vld [vmem:[#allocation28_spill] sm:$0xff] }
 0xd1e   :  { %v5188_v33 = vpop.eup %5187 }
 0xd1f   :  { %v5190_v2 = vpop.eup %5189 }
 0xd20   :  { %v5192_v63 = vpop.eup %5191  ;;  %v3827_v47 = vmul.f32 %v5190_v2, %v5188_v33  ;;  %v7308_v33 = vld [vmem:[#allocation25_spill] sm:$0xff]  ;;  %v7309_v2 = vld [vmem:[#allocation26_spill] sm:$0xff] }
 0xd21   :  { %v3826_v1 = vmul.f32 %v5192_v63, %v3825_v62  ;;  %v5194_v23 = vpop.eup %5193  ;;  %v7310_v63 = vld [vmem:[#allocation27_spill] sm:$0xff]  ;;  %v7312_v62 = vld [vmem:[#allocation29_spill] sm:$0xff] }
 0xd23   :  { %v3828_v29 = vadd.f32 %v3827_v47, %v3826_v1  ;;  %v7313_v1 = vld [vmem:[#allocation30_spill] sm:$0xff]  ;;  %v7314_v47 = vld [vmem:[#allocation31_spill] sm:$0xff] }
 0xd25   :  { %5195 = vtanh.f32 %v3828_v29  ;;  %3831 = vst [vmem:[#allocation5] sm:$0x1] %v3828_v29  ;;  %v7315_v29 = vld [vmem:[#allocation32_spill] sm:$0xff] }
 0xd32   :  { %v5196_v10 = vpop.eup %5195 }
 0xd33   :  { %v3830_v58 = vmul.f32 %v5196_v10, %v5194_v23  ;;  %v7316_v23 = vld [vmem:[#allocation33_spill] sm:$0xff]  ;;  %v7317_v10 = vld [vmem:[#allocation34_spill] sm:$0xff] }
 0xd35   :  { %3832 = vst [vmem:[#allocation4] sm:$0x1] %v3830_v58  ;;  %v7318_v58 = vmov 0.0  }
 0xd3c   :  { %v3834_v54 = vld [vmem:[#allocation4] sm:$0x1] }
 0xd3d   :  { %3964 = vmatmul.mubr.f32.vlgmr.msra.gmra.mxu0 %v3834_v54  ;;  %4035 = vmatmul.mubr.f32.vlgmr.msra.gmra.mxu1 %v3834_v54  ;;  %v7319_v54 = vld [vmem:[#allocation35_spill] sm:$0xff] }
 0xd3e   :  { %4172 = vmatpush1.msra.mxu0 %v6536_v61  ;;  %4243 = vmatpush1.msra.mxu1 %v6538_v48 }
 0xd3f   :  { %4173 = vmatprep.subr.mxu0 %v6542_v17  ;;  %4244 = vmatprep.subr.mxu1 %v6544_v55 }
 0xd40   :  { %4174 = vmatpush1.msra.mxu0 %v6548_v49  ;;  %4245 = vmatpush1.msra.mxu1 %v6550_v4 }
 0xd41   :  { %4175 = vmatprep.subr.mxu0 %v6554_v8  ;;  %4246 = vmatprep.subr.mxu1 %v6556_v9 }
 0xd42   :  { %4176 = vmatpush1.msra.mxu0 %v6560_v11  ;;  %4247 = vmatpush1.msra.mxu1 %v6562_v12 }
 0xd43   :  { %4177 = vmatprep.subr.mxu0 %v6566_v13  ;;  %4248 = vmatprep.subr.mxu1 %v6568_v14 }
 0xd44   :  { %4178 = vmatpush1.msra.mxu0 %v6572_v15  ;;  %4249 = vmatpush1.msra.mxu1 %v6574_v16 }
 0xd45   :  { %4179 = vmatprep.subr.mxu0 %v6578_v18  ;;  %4250 = vmatprep.subr.mxu1 %v6580_v19 }
 0xd46   :  { %4180 = vmatpush1.msra.mxu0 %v6584_v20  ;;  %4251 = vmatpush1.msra.mxu1 %v6586_v21 }
 0xd47   :  { %4181 = vmatprep.subr.mxu0 %v6590_v22  ;;  %4252 = vmatprep.subr.mxu1 %v6592_v24 }
 0xd48   :  { %4182 = vmatpush1.msra.mxu0 %v6596_v25  ;;  %4253 = vmatpush1.msra.mxu1 %v6598_v26 }
 0xd49   :  { %4183 = vmatprep.subr.mxu0 %v6602_v27  ;;  %4254 = vmatprep.subr.mxu1 %v6604_v28 }
 0xd4a   :  { %4184 = vmatpush1.msra.mxu0 %v6608_v30  ;;  %4255 = vmatpush1.msra.mxu1 %v6610_v31 }
 0xd4b   :  { %4185 = vmatprep.subr.mxu0 %v6614_v34  ;;  %4256 = vmatprep.subr.mxu1 %v6616_v35 }
 0xd4c   :  { %4186 = vmatpush1.msra.mxu0 %v6620_v36  ;;  %4257 = vmatpush1.msra.mxu1 %v6622_v37 }
 0xd4d   :  { %4187 = vmatprep.subr.mxu0 %v6626_v38  ;;  %4258 = vmatprep.subr.mxu1 %v6628_v39 }
 0xd4e   :  { %4188 = vmatpush1.msra.mxu0 %v6632_v40  ;;  %4259 = vmatpush1.msra.mxu1 %v6634_v41 }
 0xd4f   :  { %4189 = vmatprep.subr.mxu0 %v6638_v42  ;;  %4260 = vmatprep.subr.mxu1 %v6640_v43 }
 0xd50   :  { %4190 = vmatpush1.msra.mxu0 %v6644_v44  ;;  %4261 = vmatpush1.msra.mxu1 %v6646_v45 }
 0xd51   :  { %4191 = vmatprep.subr.mxu0 %v6650_v50  ;;  %4262 = vmatprep.subr.mxu1 %v6652_v53 }
 0xd52   :  { %4192 = vmatpush1.msra.mxu0 %v6656_v3  ;;  %4263 = vmatpush1.msra.mxu1 %v6658_v52 }
 0xd53   :  { %4193 = vmatprep.subr.mxu0 %v6662_v0  ;;  %4264 = vmatprep.subr.mxu1 %v6664_v46 }
 0xd54   :  { %4194 = vmatpush1.msra.mxu0 %v7301_v59  ;;  %4265 = vmatpush1.msra.mxu1 %v7302_v57 }
 0xd55   :  { %4195 = vmatprep.subr.mxu0 %v7303_v60  ;;  %4266 = vmatprep.subr.mxu1 %v7304_v56 }
 0xd56   :  { %4196 = vmatpush1.msra.mxu0 %v7305_v7  ;;  %4267 = vmatpush1.msra.mxu1 %v7306_v6 }
 0xd57   :  { %4197 = vmatprep.subr.mxu0 %v7307_v32  ;;  %4268 = vmatprep.subr.mxu1 %v7308_v33 }
 0xd58   :  { %4198 = vmatpush1.msra.mxu0 %v7309_v2  ;;  %4269 = vmatpush1.msra.mxu1 %v7310_v63  ;;  %v7320_v63 = vld [vmem:[#allocation40_spill] sm:$0xff] }
 0xd59   :  { %4199 = vmatprep.subr.mxu0 %v7311_v51  ;;  %4270 = vmatprep.subr.mxu1 %v7312_v62  ;;  %v7321_v51 = vld [vmem:[#allocation38_spill] sm:$0xff] }
 0xd5a   :  { %4200 = vmatpush1.msra.mxu0 %v7313_v1  ;;  %4271 = vmatpush1.msra.mxu1 %v7314_v47 }
 0xd5b   :  { %4201 = vmatprep.subr.mxu0 %v7315_v29  ;;  %4272 = vmatprep.subr.mxu1 %v7316_v23 }
 0xd5c   :  { %4202 = vmatpush1.msra.mxu0 %v7317_v10  ;;  %4235 = vmatprep.mubr.f32.mxu0 %v7318_v58 }
 0xd5d   :  { %4273 = vmatpush1.msra.mxu1 %v7319_v54  ;;  %4306 = vmatprep.mubr.f32.mxu1 %v7318_v58  ;;  %v3833_v54 = vld [vmem:[#allocation3 + $0x4] ss:$8 sm:$0xf] }
 0xd5e   :  { %4443 = vmatprep.subr.mxu0 %v7320_v63  ;;  %4514 = vmatprep.subr.mxu1 %v7321_v51 }
 0xdfd   :  { %v3965_v62 = vpop.f32.mrf.mxu0  ;;  %v4036_v1 = vpop.f32.mrf.mxu1 }
 0xdff   :  { %v3967_v2 = vpop.f32.mrf.mxu0  ;;  %v4038_v47 = vpop.f32.mrf.mxu1 }
 0xe00   :  { %v4045_v33 = vcombine.low %v3965_v62, %v3967_v2  ;;  %v4046_v29 = vcombine.low %v4036_v1, %v4038_v47 }
 0xe02   :  { %v4053_v23 = vrot.slane %v4045_v33, %v7239_v5  ;;  %v4060_v10 = vrot.slane %v4046_v29, %v7239_v5 }
 0xe04   :  { %v4061_v32 = vcombine.low %v4053_v23, %v4060_v10  ;;  %v4097_v23 = vld [vmem:[#allocation5] sm:$0x1] }
 0xe06   :  { %v4068_v6 = vrot.slane %v4061_v32, %v7239_v5 }
 0xe08   :  { %v4070_v7 = vadd.f32 %v4068_v6, %v3833_v54 }
 0xe0a   :  { %v4978_v58 = vmul.f32 -1.442695, %v4070_v7  ;;  %v4078_v56 = vrot.slane %v4070_v7, 1  ;;  %v4089_v51 = vrot.slane %v4070_v7, 3  ;;  %v4086_v59 = vrot.slane %v4070_v7, 2 }
 0xe0c   :  { %5197 = vpow2.f32 %v4978_v58  ;;  %v4979_v63 = vmul.f32 -1.442695, %v4078_v56  ;;  %v4980_v60 = vmul.f32 -1.442695, %v4089_v51 }
 0xe0e   :  { %5199 = vpow2.f32 %v4979_v63 }
 0xe0f   :  { %5201 = vpow2.f32 %v4980_v60 }
 0xe19   :  { %v5198_v57 = vpop.eup %5197 }
 0xe1a   :  { %v4074_v2 = vadd.f32 1.0, %v5198_v57 }
 0xe1b   :  { %v5200_v62 = vpop.eup %5199 }
 0xe1c   :  { %5203 = vrcp.f32 %v4074_v2  ;;  %v4083_v33 = vadd.f32 1.0, %v5200_v62  ;;  %v5202_v1 = vpop.eup %5201 }
 0xe1d   :  { %5205 = vtanh.f32 %v4086_v59  ;;  %v4094_v29 = vadd.f32 1.0, %v5202_v1 }
 0xe1e   :  { %5207 = vrcp.f32 %v4083_v33 }
 0xe1f   :  { %5209 = vrcp.f32 %v4094_v29  ;;  %v4712_v29 = vld [vmem:[#allocation11 + $0x3e8] sm:$0xff] }
 0xe29   :  { %v5204_v32 = vpop.eup %5203 }
 0xe2a   :  { %v5206_v47 = vpop.eup %5205 }
 0xe2b   :  { %v5208_v6 = vpop.eup %5207  ;;  %v4099_v56 = vmul.f32 %v5206_v47, %v5204_v32 }
 0xe2c   :  { %v4098_v10 = vmul.f32 %v5208_v6, %v4097_v23  ;;  %v5210_v7 = vpop.eup %5209  ;;  %v4714_v23 = vld [vmem:[#allocation11 + $0x3f8] sm:$0xff] }
 0xe2e   :  { %v4100_v58 = vadd.f32 %v4099_v56, %v4098_v10  ;;  %v4711_v10 = vld [vmem:[#allocation11 + $0x3e0] sm:$0xff]  ;;  %v4713_v56 = vld [vmem:[#allocation11 + $0x3f0] sm:$0xff] }
 0xe30   :  { %5211 = vtanh.f32 %v4100_v58  ;;  %4103 = vst [vmem:[#allocation5] sm:$0x1] %v4100_v58  ;;  %v4708_v58 = vld [vmem:[#allocation11 + $0x3c8] sm:$0xff] }
 0xe37   :  { %v4369_v51 = vld [vmem:[#allocation5] sm:$0x1] }
 0xe3d   :  { %v5212_v57 = vpop.eup %5211 }
 0xe3e   :  { %v4102_v54 = vmul.f32 %v5212_v57, %v5210_v7  ;;  %v4710_v7 = vld [vmem:[#allocation11 + $0x3d8] sm:$0xff]  ;;  %v4707_v57 = vld [vmem:[#allocation11 + $0x3c0] sm:$0xff] }
 0xe40   :  { %4104 = vst [vmem:[#allocation4] sm:$0x1] %v4102_v54  ;;  %v4709_v54 = vld [vmem:[#allocation11 + $0x3d0] sm:$0xff] }
 0xe47   :  { %v4106_v60 = vld [vmem:[#allocation4] sm:$0x1] }
 0xe48   :  { %4236 = vmatmul.mubr.f32.vlgmr.msra.gmra.mxu0 %v4106_v60  ;;  %4307 = vmatmul.mubr.f32.vlgmr.msra.gmra.mxu1 %v4106_v60  ;;  %v4704_v60 = vld [vmem:[#allocation11 + $0x3a8] sm:$0xff] }
 0xe49   :  { %4444 = vmatpush1.msra.mxu0 %v6536_v61  ;;  %4515 = vmatpush1.msra.mxu1 %v6538_v48  ;;  %v7322_v61 = vld [vmem:[#allocation39_spill] sm:$0xff] }
 0xe4a   :  { %4445 = vmatprep.subr.mxu0 %v6542_v17  ;;  %4516 = vmatprep.subr.mxu1 %v6544_v55  ;;  %v7323_v48 = vld [vmem:[#allocation19_spill] sm:$0xff]  ;;  %v7324_v17 = vld [vmem:[#allocation20_spill] sm:$0xff]  ;;  %v7325_v55 = vld [vmem:[#allocation21_spill] sm:$0xff] }
 0xe4b   :  { %4446 = vmatpush1.msra.mxu0 %v6548_v49  ;;  %4517 = vmatpush1.msra.mxu1 %v6550_v4  ;;  %v7326_v49 = vld [vmem:[#allocation22_spill] sm:$0xff]  ;;  %v7327_v4 = vld [vmem:[#allocation23_spill] sm:$0xff] }
 0xe4c   :  { %4447 = vmatprep.subr.mxu0 %v6554_v8  ;;  %4518 = vmatprep.subr.mxu1 %v6556_v9  ;;  %v7328_v8 = vld [vmem:[#allocation24_spill] sm:$0xff]  ;;  %v7329_v9 = vld [vmem:[#allocation25_spill] sm:$0xff] }
 0xe4d   :  { %4448 = vmatpush1.msra.mxu0 %v6560_v11  ;;  %4519 = vmatpush1.msra.mxu1 %v6562_v12  ;;  %v7330_v11 = vld [vmem:[#allocation26_spill] sm:$0xff]  ;;  %v7331_v12 = vld [vmem:[#allocation27_spill] sm:$0xff] }
 0xe4e   :  { %4449 = vmatprep.subr.mxu0 %v6566_v13  ;;  %4520 = vmatprep.subr.mxu1 %v6568_v14  ;;  %v7332_v13 = vld [vmem:[#allocation28_spill] sm:$0xff]  ;;  %v7333_v14 = vld [vmem:[#allocation29_spill] sm:$0xff] }
 0xe4f   :  { %4450 = vmatpush1.msra.mxu0 %v6572_v15  ;;  %4521 = vmatpush1.msra.mxu1 %v6574_v16  ;;  %v7334_v15 = vld [vmem:[#allocation30_spill] sm:$0xff]  ;;  %v7335_v16 = vld [vmem:[#allocation31_spill] sm:$0xff] }
 0xe50   :  { %4451 = vmatprep.subr.mxu0 %v6578_v18  ;;  %4522 = vmatprep.subr.mxu1 %v6580_v19  ;;  %v7336_v18 = vld [vmem:[#allocation32_spill] sm:$0xff]  ;;  %v7337_v19 = vld [vmem:[#allocation33_spill] sm:$0xff] }
 0xe51   :  { %4452 = vmatpush1.msra.mxu0 %v6584_v20  ;;  %4523 = vmatpush1.msra.mxu1 %v6586_v21  ;;  %v7338_v20 = vld [vmem:[#allocation34_spill] sm:$0xff]  ;;  %v7339_v21 = vmov 0.0  }
 0xe52   :  { %4453 = vmatprep.subr.mxu0 %v6590_v22  ;;  %4524 = vmatprep.subr.mxu1 %v6592_v24  ;;  %v7340_v22 = vld [vmem:[#allocation35_spill] sm:$0xff] }
 0xe53   :  { %4454 = vmatpush1.msra.mxu0 %v6596_v25  ;;  %4525 = vmatpush1.msra.mxu1 %v6598_v26 }
 0xe54   :  { %4455 = vmatprep.subr.mxu0 %v6602_v27  ;;  %4526 = vmatprep.subr.mxu1 %v6604_v28 }
 0xe55   :  { %4456 = vmatpush1.msra.mxu0 %v6608_v30  ;;  %4527 = vmatpush1.msra.mxu1 %v6610_v31 }
 0xe56   :  { %4457 = vmatprep.subr.mxu0 %v6614_v34  ;;  %4528 = vmatprep.subr.mxu1 %v6616_v35 }
 0xe57   :  { %4458 = vmatpush1.msra.mxu0 %v6620_v36  ;;  %4529 = vmatpush1.msra.mxu1 %v6622_v37  ;;  %v4105_v37 = vld [vmem:[#allocation3 + $0x5] ss:$8 sm:$0xf] }
 0xe58   :  { %4459 = vmatprep.subr.mxu0 %v6626_v38  ;;  %4530 = vmatprep.subr.mxu1 %v6628_v39 }
 0xe59   :  { %4460 = vmatpush1.msra.mxu0 %v6632_v40  ;;  %4531 = vmatpush1.msra.mxu1 %v6634_v41 }
 0xe5a   :  { %4461 = vmatprep.subr.mxu0 %v6638_v42  ;;  %4532 = vmatprep.subr.mxu1 %v6640_v43 }
 0xe5b   :  { %4462 = vmatpush1.msra.mxu0 %v6644_v44  ;;  %4533 = vmatpush1.msra.mxu1 %v6646_v45 }
 0xe5c   :  { %4463 = vmatprep.subr.mxu0 %v6650_v50  ;;  %4534 = vmatprep.subr.mxu1 %v6652_v53 }
 0xe5d   :  { %4464 = vmatpush1.msra.mxu0 %v6656_v3  ;;  %4535 = vmatpush1.msra.mxu1 %v6658_v52 }
 0xe5e   :  { %4465 = vmatprep.subr.mxu0 %v6662_v0  ;;  %4536 = vmatprep.subr.mxu1 %v6664_v46 }
 0xe5f   :  { %4466 = vmatpush1.msra.mxu0 %v7322_v61  ;;  %4537 = vmatpush1.msra.mxu1 %v7323_v48  ;;  %v4706_v61 = vld [vmem:[#allocation11 + $0x3b8] sm:$0xff]  ;;  %v4703_v48 = vld [vmem:[#allocation11 + $0x3a0] sm:$0xff] }
 0xe60   :  { %4467 = vmatprep.subr.mxu0 %v7324_v17  ;;  %4538 = vmatprep.subr.mxu1 %v7325_v55  ;;  %v4705_v17 = vld [vmem:[#allocation11 + $0x3b0] sm:$0xff]  ;;  %v4700_v55 = vld [vmem:[#allocation11 + $0x388] sm:$0xff] }
 0xe61   :  { %4468 = vmatpush1.msra.mxu0 %v7326_v49  ;;  %4539 = vmatpush1.msra.mxu1 %v7327_v4  ;;  %v4702_v49 = vld [vmem:[#allocation11 + $0x398] sm:$0xff]  ;;  %v4699_v4 = vld [vmem:[#allocation11 + $0x380] sm:$0xff] }
 0xe62   :  { %4469 = vmatprep.subr.mxu0 %v7328_v8  ;;  %4540 = vmatprep.subr.mxu1 %v7329_v9  ;;  %v4701_v8 = vld [vmem:[#allocation11 + $0x390] sm:$0xff]  ;;  %v4696_v9 = vld [vmem:[#allocation11 + $0x368] sm:$0xff] }
 0xe63   :  { %4470 = vmatpush1.msra.mxu0 %v7330_v11  ;;  %4541 = vmatpush1.msra.mxu1 %v7331_v12  ;;  %v4698_v11 = vld [vmem:[#allocation11 + $0x378] sm:$0xff]  ;;  %v4695_v12 = vld [vmem:[#allocation11 + $0x360] sm:$0xff] }
 0xe64   :  { %4471 = vmatprep.subr.mxu0 %v7332_v13  ;;  %4542 = vmatprep.subr.mxu1 %v7333_v14  ;;  %v4697_v13 = vld [vmem:[#allocation11 + $0x370] sm:$0xff]  ;;  %v4692_v14 = vld [vmem:[#allocation11 + $0x348] sm:$0xff] }
 0xe65   :  { %4472 = vmatpush1.msra.mxu0 %v7334_v15  ;;  %4543 = vmatpush1.msra.mxu1 %v7335_v16  ;;  %v4694_v15 = vld [vmem:[#allocation11 + $0x358] sm:$0xff]  ;;  %v4691_v16 = vld [vmem:[#allocation11 + $0x340] sm:$0xff] }
 0xe66   :  { %4473 = vmatprep.subr.mxu0 %v7336_v18  ;;  %4544 = vmatprep.subr.mxu1 %v7337_v19  ;;  %v4693_v18 = vld [vmem:[#allocation11 + $0x350] sm:$0xff]  ;;  %v4688_v19 = vld [vmem:[#allocation11 + $0x328] sm:$0xff] }
 0xe67   :  { %4474 = vmatpush1.msra.mxu0 %v7338_v20  ;;  %4507 = vmatprep.mubr.f32.mxu0 %v7339_v21  ;;  %v4690_v20 = vld [vmem:[#allocation11 + $0x338] sm:$0xff] }
 0xe68   :  { %4545 = vmatpush1.msra.mxu1 %v7340_v22  ;;  %4578 = vmatprep.mubr.f32.mxu1 %v7339_v21  ;;  %v4689_v22 = vld [vmem:[#allocation11 + $0x330] sm:$0xff] }
 0xe69   :  { %4715 = vmatprep.subr.mxu0 %v4712_v29  ;;  %4786 = vmatprep.subr.mxu1 %v4714_v23  ;;  %v4653_v29 = vld [vmem:[#allocation11 + $0x210] sm:$0xff] }
 0xf08   :  { %v4237_v24 = vpop.f32.mrf.mxu0  ;;  %v4308_v25 = vpop.f32.mrf.mxu1 }
 0xf0a   :  { %v4239_v26 = vpop.f32.mrf.mxu0  ;;  %v4310_v27 = vpop.f32.mrf.mxu1 }
 0xf0b   :  { %v4317_v28 = vcombine.low %v4237_v24, %v4239_v26  ;;  %v4318_v30 = vcombine.low %v4308_v25, %v4310_v27  ;;  %v4684_v24 = vld [vmem:[#allocation11 + $0x308] sm:$0xff]  ;;  %v4686_v25 = vld [vmem:[#allocation11 + $0x318] sm:$0xff]  ;;  %v4683_v26 = vld [vmem:[#allocation11 + $0x300] sm:$0xff] }
 0xf0c   :  { %v4685_v27 = vld [vmem:[#allocation11 + $0x310] sm:$0xff] }
 0xf0d   :  { %v4325_v31 = vrot.slane %v4317_v28, %v7239_v5  ;;  %v4332_v34 = vrot.slane %v4318_v30, %v7239_v5  ;;  %v4680_v28 = vld [vmem:[#allocation11 + $0x2e8] sm:$0xff]  ;;  %v4682_v30 = vld [vmem:[#allocation11 + $0x2f8] sm:$0xff] }
 0xf0f   :  { %v4333_v35 = vcombine.low %v4325_v31, %v4332_v34  ;;  %v4679_v31 = vld [vmem:[#allocation11 + $0x2e0] sm:$0xff]  ;;  %v4681_v34 = vld [vmem:[#allocation11 + $0x2f0] sm:$0xff] }
 0xf11   :  { %v4340_v36 = vrot.slane %v4333_v35, %v7239_v5  ;;  %v4676_v35 = vld [vmem:[#allocation11 + $0x2c8] sm:$0xff] }
 0xf13   :  { %v4342_v38 = vadd.f32 %v4340_v36, %v4105_v37  ;;  %v4678_v36 = vld [vmem:[#allocation11 + $0x2d8] sm:$0xff]  ;;  %v4675_v37 = vld [vmem:[#allocation11 + $0x2c0] sm:$0xff] }
 0xf15   :  { %v4981_v39 = vmul.f32 -1.442695, %v4342_v38  ;;  %v4350_v40 = vrot.slane %v4342_v38, 1  ;;  %v4361_v42 = vrot.slane %v4342_v38, 3  ;;  %v4358_v45 = vrot.slane %v4342_v38, 2  ;;  %v4677_v38 = vld [vmem:[#allocation11 + $0x2d0] sm:$0xff] }
 0xf17   :  { %5213 = vpow2.f32 %v4981_v39  ;;  %v4982_v41 = vmul.f32 -1.442695, %v4350_v40  ;;  %v4983_v43 = vmul.f32 -1.442695, %v4361_v42  ;;  %v4672_v39 = vld [vmem:[#allocation11 + $0x2a8] sm:$0xff]  ;;  %v4674_v40 = vld [vmem:[#allocation11 + $0x2b8] sm:$0xff] }
 0xf18   :  { %v4673_v42 = vld [vmem:[#allocation11 + $0x2b0] sm:$0xff] }
 0xf19   :  { %5215 = vpow2.f32 %v4982_v41  ;;  %v4671_v41 = vld [vmem:[#allocation11 + $0x2a0] sm:$0xff] }
 0xf1a   :  { %5217 = vpow2.f32 %v4983_v43  ;;  %v4668_v43 = vld [vmem:[#allocation11 + $0x288] sm:$0xff] }
 0xf24   :  { %v5214_v44 = vpop.eup %5213 }
 0xf25   :  { %v4346_v50 = vadd.f32 1.0, %v5214_v44  ;;  %v4670_v44 = vld [vmem:[#allocation11 + $0x298] sm:$0xff] }
 0xf26   :  { %v5216_v53 = vpop.eup %5215 }
 0xf27   :  { %5219 = vrcp.f32 %v4346_v50  ;;  %v4355_v3 = vadd.f32 1.0, %v5216_v53  ;;  %v5218_v52 = vpop.eup %5217  ;;  %v4669_v50 = vld [vmem:[#allocation11 + $0x290] sm:$0xff]  ;;  %v4664_v53 = vld [vmem:[#allocation11 + $0x268] sm:$0xff] }
 0xf28   :  { %5221 = vtanh.f32 %v4358_v45  ;;  %v4366_v63 = vadd.f32 1.0, %v5218_v52  ;;  %v4667_v45 = vld [vmem:[#allocation11 + $0x280] sm:$0xff] }
 0xf29   :  { %5223 = vrcp.f32 %v4355_v3  ;;  %v4666_v3 = vld [vmem:[#allocation11 + $0x278] sm:$0xff]  ;;  %v4663_v52 = vld [vmem:[#allocation11 + $0x260] sm:$0xff] }
 0xf2a   :  { %5225 = vrcp.f32 %v4366_v63  ;;  %v4659_v63 = vld [vmem:[#allocation11 + $0x240] sm:$0xff] }
 0xf34   :  { %v5220_v0 = vpop.eup %5219 }
 0xf35   :  { %v5222_v46 = vpop.eup %5221 }
 0xf36   :  { %v5224_v59 = vpop.eup %5223  ;;  %v4371_v62 = vmul.f32 %v5222_v46, %v5220_v0  ;;  %v4665_v0 = vld [vmem:[#allocation11 + $0x270] sm:$0xff]  ;;  %v4660_v46 = vld [vmem:[#allocation11 + $0x248] sm:$0xff] }
 0xf37   :  { %v4370_v2 = vmul.f32 %v5224_v59, %v4369_v51  ;;  %v5226_v1 = vpop.eup %5225  ;;  %v4662_v59 = vld [vmem:[#allocation11 + $0x258] sm:$0xff]  ;;  %v4661_v51 = vld [vmem:[#allocation11 + $0x250] sm:$0xff] }
 0xf39   :  { %v4372_v33 = vadd.f32 %v4371_v62, %v4370_v2  ;;  %v4656_v2 = vld [vmem:[#allocation11 + $0x228] sm:$0xff]  ;;  %v4658_v62 = vld [vmem:[#allocation11 + $0x238] sm:$0xff] }
 0xf3b   :  { %5227 = vtanh.f32 %v4372_v33  ;;  %4375 = vst [vmem:[#allocation5] sm:$0x1] %v4372_v33  ;;  %v4655_v33 = vld [vmem:[#allocation11 + $0x220] sm:$0xff] }
 0xf48   :  { %v5228_v32 = vpop.eup %5227 }
 0xf49   :  { %v4374_v47 = vmul.f32 %v5228_v32, %v5226_v1  ;;  %v4657_v1 = vld [vmem:[#allocation11 + $0x230] sm:$0xff]  ;;  %v4652_v32 = vld [vmem:[#allocation11 + $0x208] sm:$0xff] }
 0xf4b   :  { %4376 = vst [vmem:[#allocation4] sm:$0x1] %v4374_v47  ;;  %v4654_v47 = vld [vmem:[#allocation11 + $0x218] sm:$0xff] }
 0xf52   :  { %v4378_v6 = vld [vmem:[#allocation4] sm:$0x1] }
 0xf53   :  { %4508 = vmatmul.mubr.f32.vlgmr.msra.gmra.mxu0 %v4378_v6  ;;  %4579 = vmatmul.mubr.f32.vlgmr.msra.gmra.mxu1 %v4378_v6  ;;  %v4651_v6 = vld [vmem:[#allocation11 + $0x200] sm:$0xff] }
 0xf54   :  { %4779 = vmatprep.mubr.f32.mxu0 %v7339_v21  ;;  %4850 = vmatprep.mubr.f32.mxu1 %v7339_v21  ;;  %v4687_v21 = vld [vmem:[#allocation11 + $0x320] sm:$0xff] }
 0xf55   :  { %4716 = vmatpush1.msra.mxu0 %v4711_v10  ;;  %4787 = vmatpush1.msra.mxu1 %v4713_v56 }
 0xf56   :  { %4717 = vmatprep.subr.mxu0 %v4708_v58  ;;  %4788 = vmatprep.subr.mxu1 %v4710_v7 }
 0xf57   :  { %4718 = vmatpush1.msra.mxu0 %v4707_v57  ;;  %4789 = vmatpush1.msra.mxu1 %v4709_v54 }
 0xf58   :  { %4719 = vmatprep.subr.mxu0 %v4704_v60  ;;  %4790 = vmatprep.subr.mxu1 %v4706_v61 }
 0xf59   :  { %4720 = vmatpush1.msra.mxu0 %v4703_v48  ;;  %4791 = vmatpush1.msra.mxu1 %v4705_v17  ;;  %v4377_v17 = vld [vmem:[#allocation3 + $0x6] ss:$8 sm:$0xf] }
 0xf5a   :  { %4721 = vmatprep.subr.mxu0 %v4700_v55  ;;  %4792 = vmatprep.subr.mxu1 %v4702_v49 }
 0xf5b   :  { %4722 = vmatpush1.msra.mxu0 %v4699_v4  ;;  %4793 = vmatpush1.msra.mxu1 %v4701_v8 }
 0xf5c   :  { %4723 = vmatprep.subr.mxu0 %v4696_v9  ;;  %4794 = vmatprep.subr.mxu1 %v4698_v11 }
 0xf5d   :  { %4724 = vmatpush1.msra.mxu0 %v4695_v12  ;;  %4795 = vmatpush1.msra.mxu1 %v4697_v13 }
 0xf5e   :  { %4725 = vmatprep.subr.mxu0 %v4692_v14  ;;  %4796 = vmatprep.subr.mxu1 %v4694_v15 }
 0xf5f   :  { %4726 = vmatpush1.msra.mxu0 %v4691_v16  ;;  %4797 = vmatpush1.msra.mxu1 %v4693_v18 }
 0xf60   :  { %4727 = vmatprep.subr.mxu0 %v4688_v19  ;;  %4798 = vmatprep.subr.mxu1 %v4690_v20 }
 0xf61   :  { %4728 = vmatpush1.msra.mxu0 %v4687_v21  ;;  %4799 = vmatpush1.msra.mxu1 %v4689_v22 }
 0xf62   :  { %4729 = vmatprep.subr.mxu0 %v4684_v24  ;;  %4800 = vmatprep.subr.mxu1 %v4686_v25  ;;  %v4641_v24 = vld [vmem:[#allocation5] sm:$0x1] }
 0xf63   :  { %4730 = vmatpush1.msra.mxu0 %v4683_v26  ;;  %4801 = vmatpush1.msra.mxu1 %v4685_v27 }
 0xf64   :  { %4731 = vmatprep.subr.mxu0 %v4680_v28  ;;  %4802 = vmatprep.subr.mxu1 %v4682_v30 }
 0xf65   :  { %4732 = vmatpush1.msra.mxu0 %v4679_v31  ;;  %4803 = vmatpush1.msra.mxu1 %v4681_v34 }
 0xf66   :  { %4733 = vmatprep.subr.mxu0 %v4676_v35  ;;  %4804 = vmatprep.subr.mxu1 %v4678_v36 }
 0xf67   :  { %4734 = vmatpush1.msra.mxu0 %v4675_v37  ;;  %4805 = vmatpush1.msra.mxu1 %v4677_v38 }
 0xf68   :  { %4735 = vmatprep.subr.mxu0 %v4672_v39  ;;  %4806 = vmatprep.subr.mxu1 %v4674_v40 }
 0xf69   :  { %4736 = vmatpush1.msra.mxu0 %v4671_v41  ;;  %4807 = vmatpush1.msra.mxu1 %v4673_v42 }
 0xf6a   :  { %4737 = vmatprep.subr.mxu0 %v4668_v43  ;;  %4808 = vmatprep.subr.mxu1 %v4670_v44 }
 0xf6b   :  { %4738 = vmatpush1.msra.mxu0 %v4667_v45  ;;  %4809 = vmatpush1.msra.mxu1 %v4669_v50  ;;  %v4649_v45 = vld [vmem:[#allocation3 + $0x7] ss:$8 sm:$0xf] }
 0xf6c   :  { %4739 = vmatprep.subr.mxu0 %v4664_v53  ;;  %4810 = vmatprep.subr.mxu1 %v4666_v3 }
 0xf6d   :  { %4740 = vmatpush1.msra.mxu0 %v4663_v52  ;;  %4811 = vmatpush1.msra.mxu1 %v4665_v0 }
 0xf6e   :  { %4741 = vmatprep.subr.mxu0 %v4660_v46  ;;  %4812 = vmatprep.subr.mxu1 %v4662_v59 }
 0xf6f   :  { %4742 = vmatpush1.msra.mxu0 %v4659_v63  ;;  %4813 = vmatpush1.msra.mxu1 %v4661_v51 }
 0xf70   :  { %4743 = vmatprep.subr.mxu0 %v4656_v2  ;;  %4814 = vmatprep.subr.mxu1 %v4658_v62 }
 0xf71   :  { %4744 = vmatpush1.msra.mxu0 %v4655_v33  ;;  %4815 = vmatpush1.msra.mxu1 %v4657_v1 }
 0xf72   :  { %4745 = vmatprep.subr.mxu0 %v4652_v32  ;;  %4816 = vmatprep.subr.mxu1 %v4654_v47 }
 0xf73   :  { %4746 = vmatpush1.msra.mxu0 %v4651_v6  ;;  %4817 = vmatpush1.msra.mxu1 %v4653_v29 }
0x1013   :  { %v4509_v23 = vpop.f32.mrf.mxu0  ;;  %v4580_v10 = vpop.f32.mrf.mxu1 }
0x1015   :  { %v4511_v56 = vpop.f32.mrf.mxu0  ;;  %v4582_v58 = vpop.f32.mrf.mxu1 }
0x1016   :  { %v4589_v7 = vcombine.low %v4509_v23, %v4511_v56  ;;  %v4590_v57 = vcombine.low %v4580_v10, %v4582_v58 }
0x1018   :  { %v4597_v54 = vrot.slane %v4589_v7, %v7239_v5  ;;  %v4604_v60 = vrot.slane %v4590_v57, %v7239_v5 }
0x101a   :  { %v4605_v61 = vcombine.low %v4597_v54, %v4604_v60 }
0x101c   :  { %v4612_v48 = vrot.slane %v4605_v61, %v7239_v5 }
0x101e   :  { %v4614_v55 = vadd.f32 %v4612_v48, %v4377_v17 }
0x1020   :  { %v4984_v49 = vmul.f32 -1.442695, %v4614_v55  ;;  %v4622_v4 = vrot.slane %v4614_v55, 1  ;;  %v4633_v9 = vrot.slane %v4614_v55, 3  ;;  %v4630_v13 = vrot.slane %v4614_v55, 2 }
0x1022   :  { %5229 = vpow2.f32 %v4984_v49  ;;  %v4985_v8 = vmul.f32 -1.442695, %v4622_v4  ;;  %v4986_v11 = vmul.f32 -1.442695, %v4633_v9 }
0x1024   :  { %5231 = vpow2.f32 %v4985_v8 }
0x1025   :  { %5233 = vpow2.f32 %v4986_v11 }
0x102f   :  { %v5230_v12 = vpop.eup %5229 }
0x1030   :  { %v4618_v14 = vadd.f32 1.0, %v5230_v12 }
0x1031   :  { %v5232_v15 = vpop.eup %5231 }
0x1032   :  { %5235 = vrcp.f32 %v4618_v14  ;;  %v4627_v16 = vadd.f32 1.0, %v5232_v15  ;;  %v5234_v18 = vpop.eup %5233 }
0x1033   :  { %5237 = vtanh.f32 %v4630_v13  ;;  %v4638_v22 = vadd.f32 1.0, %v5234_v18 }
0x1034   :  { %5239 = vrcp.f32 %v4627_v16 }
0x1035   :  { %5241 = vrcp.f32 %v4638_v22 }
0x103f   :  { %v5236_v19 = vpop.eup %5235 }
0x1040   :  { %v5238_v20 = vpop.eup %5237 }
0x1041   :  { %v5240_v21 = vpop.eup %5239  ;;  %v4643_v26 = vmul.f32 %v5238_v20, %v5236_v19 }
0x1042   :  { %v4642_v25 = vmul.f32 %v5240_v21, %v4641_v24  ;;  %v5242_v28 = vpop.eup %5241 }
0x1044   :  { %v4644_v27 = vadd.f32 %v4643_v26, %v4642_v25 }
0x1046   :  { %5243 = vtanh.f32 %v4644_v27  ;;  %4647 = vst [vmem:[#allocation5] sm:$0x1] %v4644_v27 }
0x104d   :  { %v4913_v6 = vld [vmem:[#allocation5] sm:$0x1] }
0x1053   :  { %v5244_v30 = vpop.eup %5243 }
0x1054   :  { %v4646_v31 = vmul.f32 %v5244_v30, %v5242_v28 }
0x1056   :  { %4648 = vst [vmem:[#allocation4] sm:$0x1] %v4646_v31 }
0x105d   :  { %v4650_v34 = vld [vmem:[#allocation4] sm:$0x1] }
0x105e   :  { %4780 = vmatmul.mubr.f32.vlgmr.msra.gmra.mxu0 %v4650_v34  ;;  %4851 = vmatmul.mubr.f32.vlgmr.msra.gmra.mxu1 %v4650_v34 }
0x111e   :  { %v4781_v35 = vpop.f32.mrf.mxu0  ;;  %v4852_v36 = vpop.f32.mrf.mxu1 }
0x1120   :  { %v4783_v37 = vpop.f32.mrf.mxu0  ;;  %v4854_v38 = vpop.f32.mrf.mxu1 }
0x1121   :  { %v4861_v39 = vcombine.low %v4781_v35, %v4783_v37  ;;  %v4862_v40 = vcombine.low %v4852_v36, %v4854_v38 }
0x1123   :  { %v4869_v41 = vrot.slane %v4861_v39, %v7239_v5  ;;  %v4876_v42 = vrot.slane %v4862_v40, %v7239_v5 }
0x1125   :  { %v4877_v43 = vcombine.low %v4869_v41, %v4876_v42 }
0x1127   :  { %v4884_v44 = vrot.slane %v4877_v43, %v7239_v5 }
0x1129   :  { %v4886_v50 = vadd.f32 %v4884_v44, %v4649_v45 }
0x112b   :  { %v4987_v53 = vmul.f32 -1.442695, %v4886_v50  ;;  %v4894_v3 = vrot.slane %v4886_v50, 1  ;;  %v4905_v0 = vrot.slane %v4886_v50, 3  ;;  %v4902_v63 = vrot.slane %v4886_v50, 2 }
0x112d   :  { %5245 = vpow2.f32 %v4987_v53  ;;  %v4988_v52 = vmul.f32 -1.442695, %v4894_v3  ;;  %v4989_v46 = vmul.f32 -1.442695, %v4905_v0 }
0x112f   :  { %5247 = vpow2.f32 %v4988_v52 }
0x1130   :  { %5249 = vpow2.f32 %v4989_v46 }
0x113a   :  { %v5246_v59 = vpop.eup %5245 }
0x113b   :  { %v4890_v51 = vadd.f32 1.0, %v5246_v59 }
0x113c   :  { %v5248_v2 = vpop.eup %5247 }
0x113d   :  { %5251 = vrcp.f32 %v4890_v51  ;;  %v4899_v62 = vadd.f32 1.0, %v5248_v2  ;;  %v5250_v33 = vpop.eup %5249 }
0x113e   :  { %5253 = vtanh.f32 %v4902_v63  ;;  %v4910_v47 = vadd.f32 1.0, %v5250_v33 }
0x113f   :  { %5255 = vrcp.f32 %v4899_v62 }
0x1140   :  { %5257 = vrcp.f32 %v4910_v47 }
0x114a   :  { %v5252_v5 = vpop.eup %5251 }
0x114b   :  { %v5254_v1 = vpop.eup %5253 }
0x114c   :  { %v5256_v32 = vpop.eup %5255  ;;  %v4915_v23 = vmul.f32 %v5254_v1, %v5252_v5 }
0x114d   :  { %v4914_v29 = vmul.f32 %v5256_v32, %v4913_v6  ;;  %v5258_v56 = vpop.eup %5257 }
0x114f   :  { %v4916_v10 = vadd.f32 %v4915_v23, %v4914_v29 }
0x1151   :  { %5259 = vtanh.f32 %v4916_v10  ;;  %4919 = vst [vmem:[#allocation5] sm:$0x1] %v4916_v10 }
0x115e   :  { %v5260_v58 = vpop.eup %5259 }
0x115f   :  { %v4918_v7 = vmul.f32 %v5260_v58, %v5258_v56 }
0x1161   :  { %4920 = vst [vmem:[#allocation4] sm:$0x1] %v4918_v7 }
0x1168   :  { %v4921_v57 = vld [vmem:[#allocation4] sm:$0x1] }
0x1169   :  { %5261 = vtanh.f32 %v4921_v57 }
0x1176   :  { %v5262_v54 = vpop.eup %5261 }
0x1177   :  { %4923 = vst [vmem:[#allocation14] sm:$0x1] %v5262_v54 }
0x1178   :  { %5354 = shalt.err (!%p5351_p10)
}
0x1179   :  { %4933 = dma.vmem_to_hbm [thread:$0]  %s4931_s3, 16, %s6947_s4, [#allocation8]  }
0x117a   :  { %5369 = dma.done.wait [#allocation8], 16  }
0x117b   :  { %5370 = vsyncadd [#allocation8], 4294967280 }
0x117c   :  { %4937 = vsyncpa [#allocation7], 1 }
0x117d   :  { %4938 = vsyncpa [#allocation10], 1 }
0x117e   :  { %4939 = vsyncpa [#allocation13], 1 }
0x117f   :  { %4940 = vsyncpa [#allocation8], 1 }

</bundles_post_ra>
